<compile_context>
chip_gen: v6e
topology: v6e:2x2x1
jax: 0.10.0
libtpu: 0.0.40
codegen_flags: <defaults>
</compile_context>

<pallas_src>
import math
from functools import partial

import jax
import jax.numpy as jnp
from jax.experimental import pallas as pl
from jax.experimental.pallas import tpu as pltpu


# ---------------------------------------------------------------------------
# In-kernel math helpers
# ---------------------------------------------------------------------------
def _layer_norm(x, w, b, eps=1e-5):
    mu = jnp.mean(x, axis=-1, keepdims=True)
    var = jnp.mean(jnp.square(x - mu), axis=-1, keepdims=True)
    return (x - mu) * jax.lax.rsqrt(var + eps) * w + b


def _erf(x):
    # Abramowitz & Stegun 7.1.26 rational approximation (max abs err ~1.5e-7),
    # built from exp/abs/where/reciprocal which all lower cleanly in Mosaic.
    # The reciprocal is routed to the EUP slot (approx=True) instead of VPU divide.
    # TODO(synk): swap to lax.erf if/when Mosaic grows a direct erf lowering.
    p = 0.3275911
    a1, a2, a3, a4, a5 = (0.254829592, -0.284496736, 1.421413741,
                          -1.453152027, 1.061405429)
    ax = jnp.abs(x)
    t = pl.reciprocal(1.0 + p * ax, approx=True)
    poly = ((((a5 * t + a4) * t + a3) * t + a2) * t + a1) * t
    y = 1.0 - poly * jnp.exp(-ax * ax)
    return jnp.where(x >= 0, y, -y)


def _gelu_exact(x):
    # Matches torch.nn.GELU() default (erf-based, not tanh approximation).
    return 0.5 * x * (1.0 + _erf(x * (1.0 / math.sqrt(2.0))))


# ---------------------------------------------------------------------------
# Pallas kernel: one (batch, q-tile) per grid step
# ---------------------------------------------------------------------------
def _cross_attention_kernel(heads, dim_head, has_skip, *refs):
    if has_skip:
        q_ref, k_ref, v_ref, skip_ref = refs[:4]
        prm = refs[4:-1]
    else:
        q_ref, k_ref, v_ref = refs[:3]
        skip_ref = None
        prm = refs[3:-1]
    o_ref = refs[-1]
    (lnq_w, lnq_b, lnk_w, lnk_b, lnv_w, lnv_b,
     wq, bq, wk, bk, wv, bv,
     wp, bp, pre_w, pre_b, w1, b1, w2, b2, post_w, post_b) = prm

    n, tq = q_ref.shape[1], q_ref.shape[2]
    kc = k_ref.shape[2]
    dim = q_ref.shape[3]
    dh = dim_head
    f32, bf16 = jnp.float32, jnp.bfloat16

    # Hoist all parameter reads (JAX does not CSE per-use loads/broadcasts).
    LNQ_w, LNQ_b = lnq_w[...], lnq_b[...]
    LNK_w, LNK_b = lnk_w[...], lnk_b[...]
    LNV_w, LNV_b = lnv_w[...], lnv_b[...]
    Wq, Bq = wq[...], bq[...]
    Wk, Bk = wk[...], bk[...]
    Wv, Bv = wv[...], bv[...]
    Bp = bp[...]
    PRE_w, PRE_b = pre_w[...], pre_b[...]
    W1, B1 = w1[...], b1[...]
    W2, B2 = w2[...], b2[...]
    POST_w, POST_b = post_w[...], post_b[...]

    # ---- fused LayerNorm + q/k/v projections over all cameras at once ------
    # (merging leading dims does not touch the lane dim; one big matmul each)
    q_tok = q_ref[0].reshape(n * tq, dim)
    k_tok = k_ref[0].reshape(n * kc, dim)
    v_tok = v_ref[0].reshape(n * kc, dim)

    # Attention scale is pre-folded into Wq/Bq by the wrapper.
    qp = jnp.dot(_layer_norm(q_tok, LNQ_w, LNQ_b).astype(bf16), Wq,
                 preferred_element_type=f32) + Bq          # (n*tq, heads*dh)
    kp = jnp.dot(_layer_norm(k_tok, LNK_w, LNK_b).astype(bf16), Wk,
                 preferred_element_type=f32) + Bk          # (n*kc, heads*dh)
    vp = jnp.dot(_layer_norm(v_tok, LNV_w, LNV_b).astype(bf16), Wv,
                 preferred_element_type=f32) + Bv          # (n*kc, heads*dh)

    # ---- multi-head cross attention --------------------------------------
    # Softmax is joint over (camera, key) pairs, matching
    # rearrange('b n Q K -> b Q (n K)') + softmax(-1). Each head uses a single
    # camera-batched dot_general; no concatenations are materialized and the
    # head output is folded directly into the output projection.
    z = jnp.zeros((tq, dim), f32)
    for m in range(heads):            # heads is small & static; per-head
        lo = m * dh                   # intermediates die inside the iteration.
        qm = qp[:, lo:lo + dh].reshape(n, tq, dh).astype(bf16)
        km = kp[:, lo:lo + dh].reshape(n, kc, dh).astype(bf16)
        vm = vp[:, lo:lo + dh].reshape(n, kc, dh).astype(bf16)

        s = jnp.einsum('nqd,nkd->nqk', qm, km,
                       preferred_element_type=f32)          # (n, tq, kc)
        smax = jnp.max(jnp.max(s, axis=-1, keepdims=True), axis=0, keepdims=True)
        e = jnp.exp(s - smax)
        denom = jnp.sum(jnp.sum(e, axis=-1, keepdims=True), axis=0, keepdims=True)
        att = (e * pl.reciprocal(denom, approx=True)).astype(bf16)

        av = jnp.sum(jnp.einsum('nqk,nkd->nqd', att, vm,
                                preferred_element_type=f32), axis=0)  # (tq, dh)
        # Output projection folded per head: z += a_m @ Wp[m]  (no concat).
        z = z + jnp.dot(av.astype(bf16), wp[m], preferred_element_type=f32)

    z = z + Bp
    if has_skip:
        z = z + skip_ref[0]

    z = _layer_norm(z, PRE_w, PRE_b)
    hmid = jnp.dot(z.astype(bf16), W1, preferred_element_type=f32) + B1
    hmid = _gelu_exact(hmid)
    z = z + (jnp.dot(hmid.astype(bf16), W2, preferred_element_type=f32) + B2)
    z = _layer_norm(z, POST_w, POST_b)
    o_ref[0] = z


# ---------------------------------------------------------------------------
# Wrapper: layout plumbing + pallas_call
# ---------------------------------------------------------------------------
def _pick_q_tile(q_len, target=128):
    """Largest tile <= target that divides q_len and keeps the (8,128) rule."""
    if q_len <= target:
        return q_len
    for t in range(target, 7, -1):
        if q_len % t == 0 and t % 8 == 0:
            return t
    return q_len


def _vmem_limit_bytes():
    """Scoped-VMEM budget with headroom, sized from the detected chip."""
    try:
        cap = int(pltpu.get_tpu_info().vmem_capacity_bytes)
    except Exception:
        cap = 64 * 2**20                     # conservative (v7x physical VMEM)
    return int(max(32 * 2**20, min(cap - 16 * 2**20, 96 * 2**20)))


def cross_attention_forward(params, q, k, v, skip=None):
    b, n, dim, H, W = q.shape
    _, _, _, h, w = k.shape
    heads = int(params["heads"])
    dim_head = int(params["dim_head"])
    scale = dim_head ** (-0.5)
    q_len, k_len = H * W, h * w
    tq = _pick_q_tile(q_len)
    nq = q_len // tq
    has_skip = skip is not None
    f32, bf16 = jnp.float32, jnp.bfloat16

    # b n d H W -> b n (H W) d  (channels become the lane dim)
    q2 = jnp.transpose(q, (0, 1, 3, 4, 2)).reshape(b, n, q_len, dim).astype(f32)
    k2 = jnp.transpose(k, (0, 1, 3, 4, 2)).reshape(b, n, k_len, dim).astype(f32)
    v2 = jnp.transpose(v, (0, 1, 3, 4, 2)).reshape(b, n, k_len, dim).astype(f32)

    inputs = [q2, k2, v2]
    in_specs = [
        pl.BlockSpec((1, n, tq, dim), lambda i, j: (i, 0, j, 0)),
        pl.BlockSpec((1, n, k_len, dim), lambda i, j: (i, 0, 0, 0)),
        pl.BlockSpec((1, n, k_len, dim), lambda i, j: (i, 0, 0, 0)),
    ]
    if has_skip:  # static branch: no all-zeros skip tensor is ever allocated
        skip2 = jnp.transpose(skip, (0, 2, 3, 1)).reshape(b, q_len, dim).astype(f32)
        inputs.append(skip2)
        in_specs.append(pl.BlockSpec((1, tq, dim), lambda i, j: (i, j, 0)))

    # Matmul weights in bf16 (f32 accumulation happens in-kernel); attention
    # scale folded into the q projection; output projection pre-split by head.
    flat_params = [
        params["lnq_w"], params["lnq_b"],
        params["lnk_w"], params["lnk_b"],
        params["lnv_w"], params["lnv_b"],
        (params["wq"] * scale).astype(bf16), (params["bq"] * scale).astype(f32),
        params["wk"].astype(bf16), params["bk"].astype(f32),
        params["wv"].astype(bf16), params["bv"].astype(f32),
        params["wp"].reshape(heads, dim_head, dim).astype(bf16), params["bp"],
        params["pre_w"], params["pre_b"],
        params["w1"].astype(bf16), params["b1"],
        params["w2"].astype(bf16), params["b2"],
        params["post_w"], params["post_b"],
    ]
    for p in flat_params:
        in_specs.append(pl.BlockSpec(p.shape, lambda i, j, _r=p.ndim: (0,) * _r))
    inputs.extend(flat_params)

    kernel = partial(_cross_attention_kernel, heads, dim_head, has_skip)

    out = pl.pallas_call(
        kernel,
        out_shape=jax.ShapeDtypeStruct((b, q_len, dim), f32),
        grid=(b, nq),
        in_specs=in_specs,
        out_specs=pl.BlockSpec((1, tq, dim), lambda i, j: (i, j, 0)),
        compiler_params=pltpu.CompilerParams(
            dimension_semantics=("parallel", "parallel"),
            vmem_limit_bytes=_vmem_limit_bytes()),
    )(*inputs)

    # b (H W) d -> b d H W
    return jnp.transpose(out.reshape(b, H, W, dim), (0, 3, 1, 2))


# ---------------------------------------------------------------------------
# Deterministic parameter init (shapes follow the PyTorch module's __init__)
# ---------------------------------------------------------------------------
def init_params(key, dim, heads, dim_head, qkv_bias=True):
    hd = heads * dim_head
    ks = jax.random.split(key, 16)

    def w(k_, shape, s=0.05):
        return (s * jax.random.normal(k_, shape)).astype(jnp.float32)

    def bias(k_, shape):
        if qkv_bias:
            return w(k_, shape)
        return jnp.zeros(shape, jnp.float32)

    return dict(
        heads=heads, dim_head=dim_head,
        lnq_w=1.0 + w(ks[0], (1, dim)), lnq_b=w(ks[1], (1, dim)),
        wq=w(ks[2], (dim, hd)), bq=bias(ks[3], (1, hd)),
        lnk_w=1.0 + w(ks[4], (1, dim)), lnk_b=w(ks[5], (1, dim)),
        wk=w(ks[6], (dim, hd)), bk=bias(ks[7], (1, hd)),
        lnv_w=1.0 + w(ks[8], (1, dim)), lnv_b=w(ks[9], (1, dim)),
        wv=w(ks[10], (dim, hd)), bv=bias(ks[11], (1, hd)),
        wp=w(ks[12], (hd, dim)), bp=w(ks[13], (1, dim)),
        pre_w=jnp.ones((1, dim), jnp.float32), pre_b=jnp.zeros((1, dim), jnp.float32),
        w1=w(ks[14], (dim, 2 * dim)), b1=jnp.zeros((1, 2 * dim), jnp.float32),
        w2=w(ks[15], (2 * dim, dim)), b2=jnp.zeros((1, dim), jnp.float32),
        post_w=jnp.ones((1, dim), jnp.float32), post_b=jnp.zeros((1, dim), jnp.float32),
    )


# ---------------------------------------------------------------------------
# Pure-JAX reference (mirrors the PyTorch forward, full f32) for checking
# ---------------------------------------------------------------------------
def reference_forward(params, q, k, v, skip=None):
    b, n, dim, H, W = q.shape
    _, _, _, h, w = k.shape
    heads, dim_head = params["heads"], params["dim_head"]
    scale = dim_head ** (-0.5)
    Qn, Kc = H * W, h * w

    def ln(x, wt, bs):
        mu = jnp.mean(x, -1, keepdims=True)
        var = jnp.mean(jnp.square(x - mu), -1, keepdims=True)
        return (x - mu) / jnp.sqrt(var + 1e-5) * wt[0] + bs[0]

    qf = jnp.transpose(q, (0, 1, 3, 4, 2)).reshape(b, n, Qn, dim)
    kf = jnp.transpose(k, (0, 1, 3, 4, 2)).reshape(b, n, Kc, dim)
    vf = jnp.transpose(v, (0, 1, 3, 4, 2)).reshape(b, n, Kc, dim)

    qp = ln(qf, params["lnq_w"], params["lnq_b"]) @ params["wq"] + params["bq"][0]
    kp = ln(kf, params["lnk_w"], params["lnk_b"]) @ params["wk"] + params["bk"][0]
    vp = ln(vf, params["lnv_w"], params["lnv_b"]) @ params["wv"] + params["bv"][0]

    qh = qp.reshape(b, n, Qn, heads, dim_head)
    kh = kp.reshape(b, n, Kc, heads, dim_head)
    vh = vp.reshape(b, n, Kc, heads, dim_head)

    dot = scale * jnp.einsum('bnqmd,bnkmd->bmqnk', qh, kh)
    dot = dot.reshape(b, heads, Qn, n * Kc)
    att = jax.nn.softmax(dot, axis=-1)
    vcat = jnp.transpose(vh, (0, 3, 1, 2, 4)).reshape(b, heads, n * Kc, dim_head)
    a = jnp.einsum('bmqk,bmkd->bmqd', att, vcat)
    a = jnp.transpose(a, (0, 2, 1, 3)).reshape(b, Qn, heads * dim_head)

    z = a @ params["wp"] + params["bp"][0]
    if skip is not None:
        z = z + jnp.transpose(skip, (0, 2, 3, 1)).reshape(b, Qn, dim)
    z = ln(z, params["pre_w"], params["pre_b"])
    hid = jax.nn.gelu(z @ params["w1"] + params["b1"][0], approximate=False)
    z = z + (hid @ params["w2"] + params["b2"][0])
    z = ln(z, params["post_w"], params["post_b"])
    return jnp.transpose(z.reshape(b, H, W, dim), (0, 3, 1, 2))


if __name__ == "__main__":
    key = jax.random.PRNGKey(0)
    b, n, dim, H, W = 2, 2, 32, 4, 4
    h, w = 4, 4
    heads, dim_head = 4, 8

    kq, kk, kv, ksk, kpar = jax.random.split(key, 5)
    q = jax.random.normal(kq, (b, n, dim, H, W), jnp.float32)
    k = jax.random.normal(kk, (b, n, dim, h, w), jnp.float32)
    v = jax.random.normal(kv, (b, n, dim, h, w), jnp.float32)
    skip = jax.random.normal(ksk, (b, dim, H, W), jnp.float32)
    params = init_params(kpar, dim, heads, dim_head, qkv_bias=True)

    out = jax.block_until_ready(cross_attention_forward(params, q, k, v, skip))
    assert out.shape == (b, dim, H, W)
    out_ns = jax.block_until_ready(cross_attention_forward(params, q, k, v, None))

    ref = reference_forward(params, q, k, v, skip)
    ref_ns = reference_forward(params, q, k, v, None)

    # bf16 matmul operands (with f32 accumulation) + EUP approx reciprocals vs
    # a pure-f32 reference: typical max abs err ~1e-2; 5e-2 still catches any
    # structural/semantic mistake (those produce O(0.1-1) errors).
    tol = 5e-2
    err = float(jnp.max(jnp.abs(out - ref)))
    err_ns = float(jnp.max(jnp.abs(out_ns - ref_ns)))
    if err < tol and err_ns < tol:
        print("KERNEL_OK")
    else:
        print(f"MISMATCH max_err={err} max_err_noskip={err_ns}")
</pallas_src>

<mosaic_0001>
module attributes {stable_mosaic.version = 11 : i64} {
  func.func @_cross_attention_kernel(%arg0: i32, %arg1: i32, %arg2: memref<1x2x16x32xf32, #tpu.memory_space<vmem>>, %arg3: memref<1x2x16x32xf32, #tpu.memory_space<vmem>>, %arg4: memref<1x2x16x32xf32, #tpu.memory_space<vmem>>, %arg5: memref<1x16x32xf32, #tpu.memory_space<vmem>>, %arg6: memref<1x32xf32, #tpu.memory_space<vmem>>, %arg7: memref<1x32xf32, #tpu.memory_space<vmem>>, %arg8: memref<1x32xf32, #tpu.memory_space<vmem>>, %arg9: memref<1x32xf32, #tpu.memory_space<vmem>>, %arg10: memref<1x32xf32, #tpu.memory_space<vmem>>, %arg11: memref<1x32xf32, #tpu.memory_space<vmem>>, %arg12: memref<32x32xbf16, #tpu.memory_space<vmem>>, %arg13: memref<1x32xf32, #tpu.memory_space<vmem>>, %arg14: memref<32x32xbf16, #tpu.memory_space<vmem>>, %arg15: memref<1x32xf32, #tpu.memory_space<vmem>>, %arg16: memref<32x32xbf16, #tpu.memory_space<vmem>>, %arg17: memref<1x32xf32, #tpu.memory_space<vmem>>, %arg18: memref<4x8x32xbf16, #tpu.memory_space<vmem>>, %arg19: memref<1x32xf32, #tpu.memory_space<vmem>>, %arg20: memref<1x32xf32, #tpu.memory_space<vmem>>, %arg21: memref<1x32xf32, #tpu.memory_space<vmem>>, %arg22: memref<32x64xbf16, #tpu.memory_space<vmem>>, %arg23: memref<1x64xf32, #tpu.memory_space<vmem>>, %arg24: memref<64x32xbf16, #tpu.memory_space<vmem>>, %arg25: memref<1x32xf32, #tpu.memory_space<vmem>>, %arg26: memref<1x32xf32, #tpu.memory_space<vmem>>, %arg27: memref<1x32xf32, #tpu.memory_space<vmem>>, %arg28: memref<1x16x32xf32, #tpu.memory_space<vmem>>) attributes {dimension_semantics = [#tpu.dimension_semantics<parallel>, #tpu.dimension_semantics<parallel>], iteration_bounds = array<i64: 2, 1>, scalar_prefetch = 0 : i64, scratch_operands = 0 : i64, tpu.core_type = #tpu.core_type<tc>, window_params = [{transform_indices = @transform_0, window_bounds = array<i64: 1, 2, 16, 32>}, {transform_indices = @transform_1, window_bounds = array<i64: 1, 2, 16, 32>}, {transform_indices = @transform_2, window_bounds = array<i64: 1, 2, 16, 32>}, {transform_indices = @transform_3, window_bounds = array<i64: 1, 16, 32>}, {pipeline_mode = #tpu.pipeline_mode<synchronous>, transform_indices = @transform_4, window_bounds = array<i64: 1, 32>}, {pipeline_mode = #tpu.pipeline_mode<synchronous>, transform_indices = @transform_5, window_bounds = array<i64: 1, 32>}, {pipeline_mode = #tpu.pipeline_mode<synchronous>, transform_indices = @transform_6, window_bounds = array<i64: 1, 32>}, {pipeline_mode = #tpu.pipeline_mode<synchronous>, transform_indices = @transform_7, window_bounds = array<i64: 1, 32>}, {pipeline_mode = #tpu.pipeline_mode<synchronous>, transform_indices = @transform_8, window_bounds = array<i64: 1, 32>}, {pipeline_mode = #tpu.pipeline_mode<synchronous>, transform_indices = @transform_9, window_bounds = array<i64: 1, 32>}, {pipeline_mode = #tpu.pipeline_mode<synchronous>, transform_indices = @transform_10, window_bounds = array<i64: 32, 32>}, {pipeline_mode = #tpu.pipeline_mode<synchronous>, transform_indices = @transform_11, window_bounds = array<i64: 1, 32>}, {pipeline_mode = #tpu.pipeline_mode<synchronous>, transform_indices = @transform_12, window_bounds = array<i64: 32, 32>}, {pipeline_mode = #tpu.pipeline_mode<synchronous>, transform_indices = @transform_13, window_bounds = array<i64: 1, 32>}, {pipeline_mode = #tpu.pipeline_mode<synchronous>, transform_indices = @transform_14, window_bounds = array<i64: 32, 32>}, {pipeline_mode = #tpu.pipeline_mode<synchronous>, transform_indices = @transform_15, window_bounds = array<i64: 1, 32>}, {pipeline_mode = #tpu.pipeline_mode<synchronous>, transform_indices = @transform_16, window_bounds = array<i64: 4, 8, 32>}, {pipeline_mode = #tpu.pipeline_mode<synchronous>, transform_indices = @transform_17, window_bounds = array<i64: 1, 32>}, {pipeline_mode = #tpu.pipeline_mode<synchronous>, transform_indices = @transform_18, window_bounds = array<i64: 1, 32>}, {pipeline_mode = #tpu.pipeline_mode<synchronous>, transform_indices = @transform_19, window_bounds = array<i64: 1, 32>}, {pipeline_mode = #tpu.pipeline_mode<synchronous>, transform_indices = @transform_20, window_bounds = array<i64: 32, 64>}, {pipeline_mode = #tpu.pipeline_mode<synchronous>, transform_indices = @transform_21, window_bounds = array<i64: 1, 64>}, {pipeline_mode = #tpu.pipeline_mode<synchronous>, transform_indices = @transform_22, window_bounds = array<i64: 64, 32>}, {pipeline_mode = #tpu.pipeline_mode<synchronous>, transform_indices = @transform_23, window_bounds = array<i64: 1, 32>}, {pipeline_mode = #tpu.pipeline_mode<synchronous>, transform_indices = @transform_24, window_bounds = array<i64: 1, 32>}, {pipeline_mode = #tpu.pipeline_mode<synchronous>, transform_indices = @transform_25, window_bounds = array<i64: 1, 32>}, {transform_indices = @transform_26, window_bounds = array<i64: 1, 16, 32>}]} {
    %c0 = arith.constant 0 : index
    %c0_0 = arith.constant 0 : index
    %0 = vector.load %arg6[%c0, %c0_0] : memref<1x32xf32, #tpu.memory_space<vmem>>, vector<1x32xf32>
    %c0_1 = arith.constant 0 : index
    %c0_2 = arith.constant 0 : index
    %1 = vector.load %arg7[%c0_1, %c0_2] : memref<1x32xf32, #tpu.memory_space<vmem>>, vector<1x32xf32>
    %c0_3 = arith.constant 0 : index
    %c0_4 = arith.constant 0 : index
    %2 = vector.load %arg8[%c0_3, %c0_4] : memref<1x32xf32, #tpu.memory_space<vmem>>, vector<1x32xf32>
    %c0_5 = arith.constant 0 : index
    %c0_6 = arith.constant 0 : index
    %3 = vector.load %arg9[%c0_5, %c0_6] : memref<1x32xf32, #tpu.memory_space<vmem>>, vector<1x32xf32>
    %c0_7 = arith.constant 0 : index
    %c0_8 = arith.constant 0 : index
    %4 = vector.load %arg10[%c0_7, %c0_8] : memref<1x32xf32, #tpu.memory_space<vmem>>, vector<1x32xf32>
    %c0_9 = arith.constant 0 : index
    %c0_10 = arith.constant 0 : index
    %5 = vector.load %arg11[%c0_9, %c0_10] : memref<1x32xf32, #tpu.memory_space<vmem>>, vector<1x32xf32>
    %c0_11 = arith.constant 0 : index
    %c0_12 = arith.constant 0 : index
    %6 = vector.load %arg12[%c0_11, %c0_12] : memref<32x32xbf16, #tpu.memory_space<vmem>>, vector<32x32xbf16>
    %c0_13 = arith.constant 0 : index
    %c0_14 = arith.constant 0 : index
    %7 = vector.load %arg13[%c0_13, %c0_14] : memref<1x32xf32, #tpu.memory_space<vmem>>, vector<1x32xf32>
    %c0_15 = arith.constant 0 : index
    %c0_16 = arith.constant 0 : index
    %8 = vector.load %arg14[%c0_15, %c0_16] : memref<32x32xbf16, #tpu.memory_space<vmem>>, vector<32x32xbf16>
    %c0_17 = arith.constant 0 : index
    %c0_18 = arith.constant 0 : index
    %9 = vector.load %arg15[%c0_17, %c0_18] : memref<1x32xf32, #tpu.memory_space<vmem>>, vector<1x32xf32>
    %c0_19 = arith.constant 0 : index
    %c0_20 = arith.constant 0 : index
    %10 = vector.load %arg16[%c0_19, %c0_20] : memref<32x32xbf16, #tpu.memory_space<vmem>>, vector<32x32xbf16>
    %c0_21 = arith.constant 0 : index
    %c0_22 = arith.constant 0 : index
    %11 = vector.load %arg17[%c0_21, %c0_22] : memref<1x32xf32, #tpu.memory_space<vmem>>, vector<1x32xf32>
    %c0_23 = arith.constant 0 : index
    %c0_24 = arith.constant 0 : index
    %12 = vector.load %arg19[%c0_23, %c0_24] : memref<1x32xf32, #tpu.memory_space<vmem>>, vector<1x32xf32>
    %c0_25 = arith.constant 0 : index
    %c0_26 = arith.constant 0 : index
    %13 = vector.load %arg20[%c0_25, %c0_26] : memref<1x32xf32, #tpu.memory_space<vmem>>, vector<1x32xf32>
    %c0_27 = arith.constant 0 : index
    %c0_28 = arith.constant 0 : index
    %14 = vector.load %arg21[%c0_27, %c0_28] : memref<1x32xf32, #tpu.memory_space<vmem>>, vector<1x32xf32>
    %c0_29 = arith.constant 0 : index
    %c0_30 = arith.constant 0 : index
    %15 = vector.load %arg22[%c0_29, %c0_30] : memref<32x64xbf16, #tpu.memory_space<vmem>>, vector<32x64xbf16>
    %c0_31 = arith.constant 0 : index
    %c0_32 = arith.constant 0 : index
    %16 = vector.load %arg23[%c0_31, %c0_32] : memref<1x64xf32, #tpu.memory_space<vmem>>, vector<1x64xf32>
    %c0_33 = arith.constant 0 : index
    %c0_34 = arith.constant 0 : index
    %17 = vector.load %arg24[%c0_33, %c0_34] : memref<64x32xbf16, #tpu.memory_space<vmem>>, vector<64x32xbf16>
    %c0_35 = arith.constant 0 : index
    %c0_36 = arith.constant 0 : index
    %18 = vector.load %arg25[%c0_35, %c0_36] : memref<1x32xf32, #tpu.memory_space<vmem>>, vector<1x32xf32>
    %c0_37 = arith.constant 0 : index
    %c0_38 = arith.constant 0 : index
    %19 = vector.load %arg26[%c0_37, %c0_38] : memref<1x32xf32, #tpu.memory_space<vmem>>, vector<1x32xf32>
    %c0_39 = arith.constant 0 : index
    %c0_40 = arith.constant 0 : index
    %20 = vector.load %arg27[%c0_39, %c0_40] : memref<1x32xf32, #tpu.memory_space<vmem>>, vector<1x32xf32>
    %c0_41 = arith.constant 0 : index
    %c0_42 = arith.constant 0 : index
    %c0_43 = arith.constant 0 : index
    %c0_44 = arith.constant 0 : index
    %21 = vector.load %arg2[%c0_41, %c0_42, %c0_43, %c0_44] : memref<1x2x16x32xf32, #tpu.memory_space<vmem>>, vector<1x2x16x32xf32>
    %22 = vector.shape_cast %21 : vector<1x2x16x32xf32> to vector<2x16x32xf32>
    %23 = vector.shape_cast %22 : vector<2x16x32xf32> to vector<32x32xf32>
    %c0_45 = arith.constant 0 : index
    %c0_46 = arith.constant 0 : index
    %c0_47 = arith.constant 0 : index
    %c0_48 = arith.constant 0 : index
    %24 = vector.load %arg3[%c0_45, %c0_46, %c0_47, %c0_48] : memref<1x2x16x32xf32, #tpu.memory_space<vmem>>, vector<1x2x16x32xf32>
    %25 = vector.shape_cast %24 : vector<1x2x16x32xf32> to vector<2x16x32xf32>
    %26 = vector.shape_cast %25 : vector<2x16x32xf32> to vector<32x32xf32>
    %c0_49 = arith.constant 0 : index
    %c0_50 = arith.constant 0 : index
    %c0_51 = arith.constant 0 : index
    %c0_52 = arith.constant 0 : index
    %27 = vector.load %arg4[%c0_49, %c0_50, %c0_51, %c0_52] : memref<1x2x16x32xf32, #tpu.memory_space<vmem>>, vector<1x2x16x32xf32>
    %28 = vector.shape_cast %27 : vector<1x2x16x32xf32> to vector<2x16x32xf32>
    %29 = vector.shape_cast %28 : vector<2x16x32xf32> to vector<32x32xf32>
    %cst = arith.constant dense<0.000000e+00> : vector<32xf32>
    %30 = vector.multi_reduction <add>, %23, %cst [1] : vector<32x32xf32> to vector<32xf32>
    %31 = vector.shape_cast %30 : vector<32xf32> to vector<32x1xf32>
    %cst_53 = arith.constant 3.200000e+01 : f32
    %32 = vector.broadcast %cst_53 : f32 to vector<32x1xf32>
    %33 = arith.divf %31, %32 : vector<32x1xf32>
    %34 = vector.broadcast %33 : vector<32x1xf32> to vector<32x32xf32>
    %35 = arith.subf %23, %34 : vector<32x32xf32>
    %36 = arith.mulf %35, %35 : vector<32x32xf32>
    %cst_54 = arith.constant dense<0.000000e+00> : vector<32xf32>
    %37 = vector.multi_reduction <add>, %36, %cst_54 [1] : vector<32x32xf32> to vector<32xf32>
    %38 = vector.shape_cast %37 : vector<32xf32> to vector<32x1xf32>
    %cst_55 = arith.constant 3.200000e+01 : f32
    %39 = vector.broadcast %cst_55 : f32 to vector<32x1xf32>
    %40 = arith.divf %38, %39 : vector<32x1xf32>
    %41 = vector.broadcast %33 : vector<32x1xf32> to vector<32x32xf32>
    %42 = arith.subf %23, %41 : vector<32x32xf32>
    %cst_56 = arith.constant 9.99999974E-6 : f32
    %43 = vector.broadcast %cst_56 : f32 to vector<32x1xf32>
    %44 = arith.addf %40, %43 : vector<32x1xf32>
    %45 = math.rsqrt %44 : vector<32x1xf32>
    %46 = vector.broadcast %45 : vector<32x1xf32> to vector<32x32xf32>
    %47 = arith.mulf %42, %46 : vector<32x32xf32>
    %48 = vector.broadcast %0 : vector<1x32xf32> to vector<32x32xf32>
    %49 = arith.mulf %47, %48 : vector<32x32xf32>
    %50 = vector.broadcast %1 : vector<1x32xf32> to vector<32x32xf32>
    %51 = arith.addf %49, %50 : vector<32x32xf32>
    %52 = arith.truncf %51 : vector<32x32xf32> to vector<32x32xbf16>
    %cst_57 = arith.constant dense<0.000000e+00> : vector<32x32xf32>
    %53 = tpu.matmul %52, %6, %cst_57 {dimension_numbers = #tpu.dot_dimension_numbers<[1], [0], [0], [1], [0, 0, 1, 1], [], []>} : vector<32x32xbf16>, vector<32x32xbf16>, vector<32x32xf32> -> vector<32x32xf32>
    %54 = vector.broadcast %7 : vector<1x32xf32> to vector<32x32xf32>
    %55 = arith.addf %53, %54 : vector<32x32xf32>
    %cst_58 = arith.constant dense<0.000000e+00> : vector<32xf32>
    %56 = vector.multi_reduction <add>, %26, %cst_58 [1] : vector<32x32xf32> to vector<32xf32>
    %57 = vector.shape_cast %56 : vector<32xf32> to vector<32x1xf32>
    %cst_59 = arith.constant 3.200000e+01 : f32
    %58 = vector.broadcast %cst_59 : f32 to vector<32x1xf32>
    %59 = arith.divf %57, %58 : vector<32x1xf32>
    %60 = vector.broadcast %59 : vector<32x1xf32> to vector<32x32xf32>
    %61 = arith.subf %26, %60 : vector<32x32xf32>
    %62 = arith.mulf %61, %61 : vector<32x32xf32>
    %cst_60 = arith.constant dense<0.000000e+00> : vector<32xf32>
    %63 = vector.multi_reduction <add>, %62, %cst_60 [1] : vector<32x32xf32> to vector<32xf32>
    %64 = vector.shape_cast %63 : vector<32xf32> to vector<32x1xf32>
    %cst_61 = arith.constant 3.200000e+01 : f32
    %65 = vector.broadcast %cst_61 : f32 to vector<32x1xf32>
    %66 = arith.divf %64, %65 : vector<32x1xf32>
    %67 = vector.broadcast %59 : vector<32x1xf32> to vector<32x32xf32>
    %68 = arith.subf %26, %67 : vector<32x32xf32>
    %cst_62 = arith.constant 9.99999974E-6 : f32
    %69 = vector.broadcast %cst_62 : f32 to vector<32x1xf32>
    %70 = arith.addf %66, %69 : vector<32x1xf32>
    %71 = math.rsqrt %70 : vector<32x1xf32>
    %72 = vector.broadcast %71 : vector<32x1xf32> to vector<32x32xf32>
    %73 = arith.mulf %68, %72 : vector<32x32xf32>
    %74 = vector.broadcast %2 : vector<1x32xf32> to vector<32x32xf32>
    %75 = arith.mulf %73, %74 : vector<32x32xf32>
    %76 = vector.broadcast %3 : vector<1x32xf32> to vector<32x32xf32>
    %77 = arith.addf %75, %76 : vector<32x32xf32>
    %78 = arith.truncf %77 : vector<32x32xf32> to vector<32x32xbf16>
    %cst_63 = arith.constant dense<0.000000e+00> : vector<32x32xf32>
    %79 = tpu.matmul %78, %8, %cst_63 {dimension_numbers = #tpu.dot_dimension_numbers<[1], [0], [0], [1], [0, 0, 1, 1], [], []>} : vector<32x32xbf16>, vector<32x32xbf16>, vector<32x32xf32> -> vector<32x32xf32>
    %80 = vector.broadcast %9 : vector<1x32xf32> to vector<32x32xf32>
    %81 = arith.addf %79, %80 : vector<32x32xf32>
    %cst_64 = arith.constant dense<0.000000e+00> : vector<32xf32>
    %82 = vector.multi_reduction <add>, %29, %cst_64 [1] : vector<32x32xf32> to vector<32xf32>
    %83 = vector.shape_cast %82 : vector<32xf32> to vector<32x1xf32>
    %cst_65 = arith.constant 3.200000e+01 : f32
    %84 = vector.broadcast %cst_65 : f32 to vector<32x1xf32>
    %85 = arith.divf %83, %84 : vector<32x1xf32>
    %86 = vector.broadcast %85 : vector<32x1xf32> to vector<32x32xf32>
    %87 = arith.subf %29, %86 : vector<32x32xf32>
    %88 = arith.mulf %87, %87 : vector<32x32xf32>
    %cst_66 = arith.constant dense<0.000000e+00> : vector<32xf32>
    %89 = vector.multi_reduction <add>, %88, %cst_66 [1] : vector<32x32xf32> to vector<32xf32>
    %90 = vector.shape_cast %89 : vector<32xf32> to vector<32x1xf32>
    %cst_67 = arith.constant 3.200000e+01 : f32
    %91 = vector.broadcast %cst_67 : f32 to vector<32x1xf32>
    %92 = arith.divf %90, %91 : vector<32x1xf32>
    %93 = vector.broadcast %85 : vector<32x1xf32> to vector<32x32xf32>
    %94 = arith.subf %29, %93 : vector<32x32xf32>
    %cst_68 = arith.constant 9.99999974E-6 : f32
    %95 = vector.broadcast %cst_68 : f32 to vector<32x1xf32>
    %96 = arith.addf %92, %95 : vector<32x1xf32>
    %97 = math.rsqrt %96 : vector<32x1xf32>
    %98 = vector.broadcast %97 : vector<32x1xf32> to vector<32x32xf32>
    %99 = arith.mulf %94, %98 : vector<32x32xf32>
    %100 = vector.broadcast %4 : vector<1x32xf32> to vector<32x32xf32>
    %101 = arith.mulf %99, %100 : vector<32x32xf32>
    %102 = vector.broadcast %5 : vector<1x32xf32> to vector<32x32xf32>
    %103 = arith.addf %101, %102 : vector<32x32xf32>
    %104 = arith.truncf %103 : vector<32x32xf32> to vector<32x32xbf16>
    %cst_69 = arith.constant dense<0.000000e+00> : vector<32x32xf32>
    %105 = tpu.matmul %104, %10, %cst_69 {dimension_numbers = #tpu.dot_dimension_numbers<[1], [0], [0], [1], [0, 0, 1, 1], [], []>} : vector<32x32xbf16>, vector<32x32xbf16>, vector<32x32xf32> -> vector<32x32xf32>
    %106 = vector.broadcast %11 : vector<1x32xf32> to vector<32x32xf32>
    %107 = arith.addf %105, %106 : vector<32x32xf32>
    %cst_70 = arith.constant 0.000000e+00 : f32
    %108 = vector.broadcast %cst_70 : f32 to vector<16x32xf32>
    %109 = vector.extract_strided_slice %55 {offsets = [0, 0], sizes = [32, 8], strides = [1, 1]} : vector<32x32xf32> to vector<32x8xf32>
    %110 = vector.shape_cast %109 : vector<32x8xf32> to vector<2x16x8xf32>
    %111 = arith.truncf %110 : vector<2x16x8xf32> to vector<2x16x8xbf16>
    %112 = vector.extract_strided_slice %81 {offsets = [0, 0], sizes = [32, 8], strides = [1, 1]} : vector<32x32xf32> to vector<32x8xf32>
    %113 = vector.shape_cast %112 : vector<32x8xf32> to vector<2x16x8xf32>
    %114 = arith.truncf %113 : vector<2x16x8xf32> to vector<2x16x8xbf16>
    %115 = vector.extract_strided_slice %107 {offsets = [0, 0], sizes = [32, 8], strides = [1, 1]} : vector<32x32xf32> to vector<32x8xf32>
    %116 = vector.shape_cast %115 : vector<32x8xf32> to vector<2x16x8xf32>
    %117 = arith.truncf %116 : vector<2x16x8xf32> to vector<2x16x8xbf16>
    "tpu.trace_start"() <{level = 10 : i32, message = "nqd,nkd->nqk"}> : () -> ()
    %cst_71 = arith.constant dense<0.000000e+00> : vector<2x16x16xf32>
    %118 = tpu.matmul %111, %114, %cst_71 {dimension_numbers = #tpu.dot_dimension_numbers<[2], [2], [1], [1], [0, 0, 0, 1, 1, 1], [0], [0]>} : vector<2x16x8xbf16>, vector<2x16x8xbf16>, vector<2x16x16xf32> -> vector<2x16x16xf32>
    "tpu.trace_stop"() : () -> ()
    %cst_72 = arith.constant dense<0xFF800000> : vector<2x16xf32>
    %119 = vector.multi_reduction <maximumf>, %118, %cst_72 [2] : vector<2x16x16xf32> to vector<2x16xf32>
    %120 = vector.shape_cast %119 : vector<2x16xf32> to vector<2x16x1xf32>
    %cst_73 = arith.constant dense<0xFF800000> : vector<16x1xf32>
    %121 = vector.multi_reduction <maximumf>, %120, %cst_73 [0] : vector<2x16x1xf32> to vector<16x1xf32>
    %122 = vector.shape_cast %121 : vector<16x1xf32> to vector<1x16x1xf32>
    %123 = vector.broadcast %122 : vector<1x16x1xf32> to vector<2x16x16xf32>
    %124 = arith.subf %118, %123 : vector<2x16x16xf32>
    %125 = math.exp %124 : vector<2x16x16xf32>
    %cst_74 = arith.constant dense<0.000000e+00> : vector<2x16xf32>
    %126 = vector.multi_reduction <add>, %125, %cst_74 [2] : vector<2x16x16xf32> to vector<2x16xf32>
    %127 = vector.shape_cast %126 : vector<2x16xf32> to vector<2x16x1xf32>
    %cst_75 = arith.constant dense<0.000000e+00> : vector<16x1xf32>
    %128 = vector.multi_reduction <add>, %127, %cst_75 [0] : vector<2x16x1xf32> to vector<16x1xf32>
    %129 = vector.shape_cast %128 : vector<16x1xf32> to vector<1x16x1xf32>
    %130 = tpu.reciprocal %129 {approx = true} : vector<1x16x1xf32> -> vector<1x16x1xf32>
    %131 = vector.broadcast %130 : vector<1x16x1xf32> to vector<2x16x16xf32>
    %132 = arith.mulf %125, %131 : vector<2x16x16xf32>
    %133 = arith.truncf %132 : vector<2x16x16xf32> to vector<2x16x16xbf16>
    "tpu.trace_start"() <{level = 10 : i32, message = "nqk,nkd->nqd"}> : () -> ()
    %cst_76 = arith.constant dense<0.000000e+00> : vector<2x16x8xf32>
    %134 = tpu.matmul %133, %117, %cst_76 {dimension_numbers = #tpu.dot_dimension_numbers<[2], [1], [1], [2], [0, 0, 0, 1, 1, 2], [0], [0]>} : vector<2x16x16xbf16>, vector<2x16x8xbf16>, vector<2x16x8xf32> -> vector<2x16x8xf32>
    "tpu.trace_stop"() : () -> ()
    %cst_77 = arith.constant dense<0.000000e+00> : vector<16x8xf32>
    %135 = vector.multi_reduction <add>, %134, %cst_77 [0] : vector<2x16x8xf32> to vector<16x8xf32>
    %136 = arith.truncf %135 : vector<16x8xf32> to vector<16x8xbf16>
    %c0_78 = arith.constant 0 : index
    %c0_79 = arith.constant 0 : index
    %c0_80 = arith.constant 0 : index
    %137 = vector.load %arg18[%c0_78, %c0_79, %c0_80] : memref<4x8x32xbf16, #tpu.memory_space<vmem>>, vector<1x8x32xbf16>
    %138 = vector.shape_cast %137 : vector<1x8x32xbf16> to vector<8x32xbf16>
    %cst_81 = arith.constant dense<0.000000e+00> : vector<16x32xf32>
    %139 = tpu.matmul %136, %138, %cst_81 {dimension_numbers = #tpu.dot_dimension_numbers<[1], [0], [0], [1], [0, 0, 1, 1], [], []>} : vector<16x8xbf16>, vector<8x32xbf16>, vector<16x32xf32> -> vector<16x32xf32>
    %140 = arith.addf %108, %139 : vector<16x32xf32>
    %141 = vector.extract_strided_slice %55 {offsets = [0, 8], sizes = [32, 8], strides = [1, 1]} : vector<32x32xf32> to vector<32x8xf32>
    %142 = vector.shape_cast %141 : vector<32x8xf32> to vector<2x16x8xf32>
    %143 = arith.truncf %142 : vector<2x16x8xf32> to vector<2x16x8xbf16>
    %144 = vector.extract_strided_slice %81 {offsets = [0, 8], sizes = [32, 8], strides = [1, 1]} : vector<32x32xf32> to vector<32x8xf32>
    %145 = vector.shape_cast %144 : vector<32x8xf32> to vector<2x16x8xf32>
    %146 = arith.truncf %145 : vector<2x16x8xf32> to vector<2x16x8xbf16>
    %147 = vector.extract_strided_slice %107 {offsets = [0, 8], sizes = [32, 8], strides = [1, 1]} : vector<32x32xf32> to vector<32x8xf32>
    %148 = vector.shape_cast %147 : vector<32x8xf32> to vector<2x16x8xf32>
    %149 = arith.truncf %148 : vector<2x16x8xf32> to vector<2x16x8xbf16>
    "tpu.trace_start"() <{level = 10 : i32, message = "nqd,nkd->nqk"}> : () -> ()
    %cst_82 = arith.constant dense<0.000000e+00> : vector<2x16x16xf32>
    %150 = tpu.matmul %143, %146, %cst_82 {dimension_numbers = #tpu.dot_dimension_numbers<[2], [2], [1], [1], [0, 0, 0, 1, 1, 1], [0], [0]>} : vector<2x16x8xbf16>, vector<2x16x8xbf16>, vector<2x16x16xf32> -> vector<2x16x16xf32>
    "tpu.trace_stop"() : () -> ()
    %cst_83 = arith.constant dense<0xFF800000> : vector<2x16xf32>
    %151 = vector.multi_reduction <maximumf>, %150, %cst_83 [2] : vector<2x16x16xf32> to vector<2x16xf32>
    %152 = vector.shape_cast %151 : vector<2x16xf32> to vector<2x16x1xf32>
    %cst_84 = arith.constant dense<0xFF800000> : vector<16x1xf32>
    %153 = vector.multi_reduction <maximumf>, %152, %cst_84 [0] : vector<2x16x1xf32> to vector<16x1xf32>
    %154 = vector.shape_cast %153 : vector<16x1xf32> to vector<1x16x1xf32>
    %155 = vector.broadcast %154 : vector<1x16x1xf32> to vector<2x16x16xf32>
    %156 = arith.subf %150, %155 : vector<2x16x16xf32>
    %157 = math.exp %156 : vector<2x16x16xf32>
    %cst_85 = arith.constant dense<0.000000e+00> : vector<2x16xf32>
    %158 = vector.multi_reduction <add>, %157, %cst_85 [2] : vector<2x16x16xf32> to vector<2x16xf32>
    %159 = vector.shape_cast %158 : vector<2x16xf32> to vector<2x16x1xf32>
    %cst_86 = arith.constant dense<0.000000e+00> : vector<16x1xf32>
    %160 = vector.multi_reduction <add>, %159, %cst_86 [0] : vector<2x16x1xf32> to vector<16x1xf32>
    %161 = vector.shape_cast %160 : vector<16x1xf32> to vector<1x16x1xf32>
    %162 = tpu.reciprocal %161 {approx = true} : vector<1x16x1xf32> -> vector<1x16x1xf32>
    %163 = vector.broadcast %162 : vector<1x16x1xf32> to vector<2x16x16xf32>
    %164 = arith.mulf %157, %163 : vector<2x16x16xf32>
    %165 = arith.truncf %164 : vector<2x16x16xf32> to vector<2x16x16xbf16>
    "tpu.trace_start"() <{level = 10 : i32, message = "nqk,nkd->nqd"}> : () -> ()
    %cst_87 = arith.constant dense<0.000000e+00> : vector<2x16x8xf32>
    %166 = tpu.matmul %165, %149, %cst_87 {dimension_numbers = #tpu.dot_dimension_numbers<[2], [1], [1], [2], [0, 0, 0, 1, 1, 2], [0], [0]>} : vector<2x16x16xbf16>, vector<2x16x8xbf16>, vector<2x16x8xf32> -> vector<2x16x8xf32>
    "tpu.trace_stop"() : () -> ()
    %cst_88 = arith.constant dense<0.000000e+00> : vector<16x8xf32>
    %167 = vector.multi_reduction <add>, %166, %cst_88 [0] : vector<2x16x8xf32> to vector<16x8xf32>
    %168 = arith.truncf %167 : vector<16x8xf32> to vector<16x8xbf16>
    %c1 = arith.constant 1 : index
    %c0_89 = arith.constant 0 : index
    %c0_90 = arith.constant 0 : index
    %169 = vector.load %arg18[%c1, %c0_89, %c0_90] : memref<4x8x32xbf16, #tpu.memory_space<vmem>>, vector<1x8x32xbf16>
    %170 = vector.shape_cast %169 : vector<1x8x32xbf16> to vector<8x32xbf16>
    %cst_91 = arith.constant dense<0.000000e+00> : vector<16x32xf32>
    %171 = tpu.matmul %168, %170, %cst_91 {dimension_numbers = #tpu.dot_dimension_numbers<[1], [0], [0], [1], [0, 0, 1, 1], [], []>} : vector<16x8xbf16>, vector<8x32xbf16>, vector<16x32xf32> -> vector<16x32xf32>
    %172 = arith.addf %140, %171 : vector<16x32xf32>
    %173 = vector.extract_strided_slice %55 {offsets = [0, 16], sizes = [32, 8], strides = [1, 1]} : vector<32x32xf32> to vector<32x8xf32>
    %174 = vector.shape_cast %173 : vector<32x8xf32> to vector<2x16x8xf32>
    %175 = arith.truncf %174 : vector<2x16x8xf32> to vector<2x16x8xbf16>
    %176 = vector.extract_strided_slice %81 {offsets = [0, 16], sizes = [32, 8], strides = [1, 1]} : vector<32x32xf32> to vector<32x8xf32>
    %177 = vector.shape_cast %176 : vector<32x8xf32> to vector<2x16x8xf32>
    %178 = arith.truncf %177 : vector<2x16x8xf32> to vector<2x16x8xbf16>
    %179 = vector.extract_strided_slice %107 {offsets = [0, 16], sizes = [32, 8], strides = [1, 1]} : vector<32x32xf32> to vector<32x8xf32>
    %180 = vector.shape_cast %179 : vector<32x8xf32> to vector<2x16x8xf32>
    %181 = arith.truncf %180 : vector<2x16x8xf32> to vector<2x16x8xbf16>
    "tpu.trace_start"() <{level = 10 : i32, message = "nqd,nkd->nqk"}> : () -> ()
    %cst_92 = arith.constant dense<0.000000e+00> : vector<2x16x16xf32>
    %182 = tpu.matmul %175, %178, %cst_92 {dimension_numbers = #tpu.dot_dimension_numbers<[2], [2], [1], [1], [0, 0, 0, 1, 1, 1], [0], [0]>} : vector<2x16x8xbf16>, vector<2x16x8xbf16>, vector<2x16x16xf32> -> vector<2x16x16xf32>
    "tpu.trace_stop"() : () -> ()
    %cst_93 = arith.constant dense<0xFF800000> : vector<2x16xf32>
    %183 = vector.multi_reduction <maximumf>, %182, %cst_93 [2] : vector<2x16x16xf32> to vector<2x16xf32>
    %184 = vector.shape_cast %183 : vector<2x16xf32> to vector<2x16x1xf32>
    %cst_94 = arith.constant dense<0xFF800000> : vector<16x1xf32>
    %185 = vector.multi_reduction <maximumf>, %184, %cst_94 [0] : vector<2x16x1xf32> to vector<16x1xf32>
    %186 = vector.shape_cast %185 : vector<16x1xf32> to vector<1x16x1xf32>
    %187 = vector.broadcast %186 : vector<1x16x1xf32> to vector<2x16x16xf32>
    %188 = arith.subf %182, %187 : vector<2x16x16xf32>
    %189 = math.exp %188 : vector<2x16x16xf32>
    %cst_95 = arith.constant dense<0.000000e+00> : vector<2x16xf32>
    %190 = vector.multi_reduction <add>, %189, %cst_95 [2] : vector<2x16x16xf32> to vector<2x16xf32>
    %191 = vector.shape_cast %190 : vector<2x16xf32> to vector<2x16x1xf32>
    %cst_96 = arith.constant dense<0.000000e+00> : vector<16x1xf32>
    %192 = vector.multi_reduction <add>, %191, %cst_96 [0] : vector<2x16x1xf32> to vector<16x1xf32>
    %193 = vector.shape_cast %192 : vector<16x1xf32> to vector<1x16x1xf32>
    %194 = tpu.reciprocal %193 {approx = true} : vector<1x16x1xf32> -> vector<1x16x1xf32>
    %195 = vector.broadcast %194 : vector<1x16x1xf32> to vector<2x16x16xf32>
    %196 = arith.mulf %189, %195 : vector<2x16x16xf32>
    %197 = arith.truncf %196 : vector<2x16x16xf32> to vector<2x16x16xbf16>
    "tpu.trace_start"() <{level = 10 : i32, message = "nqk,nkd->nqd"}> : () -> ()
    %cst_97 = arith.constant dense<0.000000e+00> : vector<2x16x8xf32>
    %198 = tpu.matmul %197, %181, %cst_97 {dimension_numbers = #tpu.dot_dimension_numbers<[2], [1], [1], [2], [0, 0, 0, 1, 1, 2], [0], [0]>} : vector<2x16x16xbf16>, vector<2x16x8xbf16>, vector<2x16x8xf32> -> vector<2x16x8xf32>
    "tpu.trace_stop"() : () -> ()
    %cst_98 = arith.constant dense<0.000000e+00> : vector<16x8xf32>
    %199 = vector.multi_reduction <add>, %198, %cst_98 [0] : vector<2x16x8xf32> to vector<16x8xf32>
    %200 = arith.truncf %199 : vector<16x8xf32> to vector<16x8xbf16>
    %c2 = arith.constant 2 : index
    %c0_99 = arith.constant 0 : index
    %c0_100 = arith.constant 0 : index
    %201 = vector.load %arg18[%c2, %c0_99, %c0_100] : memref<4x8x32xbf16, #tpu.memory_space<vmem>>, vector<1x8x32xbf16>
    %202 = vector.shape_cast %201 : vector<1x8x32xbf16> to vector<8x32xbf16>
    %cst_101 = arith.constant dense<0.000000e+00> : vector<16x32xf32>
    %203 = tpu.matmul %200, %202, %cst_101 {dimension_numbers = #tpu.dot_dimension_numbers<[1], [0], [0], [1], [0, 0, 1, 1], [], []>} : vector<16x8xbf16>, vector<8x32xbf16>, vector<16x32xf32> -> vector<16x32xf32>
    %204 = arith.addf %172, %203 : vector<16x32xf32>
    %205 = vector.extract_strided_slice %55 {offsets = [0, 24], sizes = [32, 8], strides = [1, 1]} : vector<32x32xf32> to vector<32x8xf32>
    %206 = vector.shape_cast %205 : vector<32x8xf32> to vector<2x16x8xf32>
    %207 = arith.truncf %206 : vector<2x16x8xf32> to vector<2x16x8xbf16>
    %208 = vector.extract_strided_slice %81 {offsets = [0, 24], sizes = [32, 8], strides = [1, 1]} : vector<32x32xf32> to vector<32x8xf32>
    %209 = vector.shape_cast %208 : vector<32x8xf32> to vector<2x16x8xf32>
    %210 = arith.truncf %209 : vector<2x16x8xf32> to vector<2x16x8xbf16>
    %211 = vector.extract_strided_slice %107 {offsets = [0, 24], sizes = [32, 8], strides = [1, 1]} : vector<32x32xf32> to vector<32x8xf32>
    %212 = vector.shape_cast %211 : vector<32x8xf32> to vector<2x16x8xf32>
    %213 = arith.truncf %212 : vector<2x16x8xf32> to vector<2x16x8xbf16>
    "tpu.trace_start"() <{level = 10 : i32, message = "nqd,nkd->nqk"}> : () -> ()
    %cst_102 = arith.constant dense<0.000000e+00> : vector<2x16x16xf32>
    %214 = tpu.matmul %207, %210, %cst_102 {dimension_numbers = #tpu.dot_dimension_numbers<[2], [2], [1], [1], [0, 0, 0, 1, 1, 1], [0], [0]>} : vector<2x16x8xbf16>, vector<2x16x8xbf16>, vector<2x16x16xf32> -> vector<2x16x16xf32>
    "tpu.trace_stop"() : () -> ()
    %cst_103 = arith.constant dense<0xFF800000> : vector<2x16xf32>
    %215 = vector.multi_reduction <maximumf>, %214, %cst_103 [2] : vector<2x16x16xf32> to vector<2x16xf32>
    %216 = vector.shape_cast %215 : vector<2x16xf32> to vector<2x16x1xf32>
    %cst_104 = arith.constant dense<0xFF800000> : vector<16x1xf32>
    %217 = vector.multi_reduction <maximumf>, %216, %cst_104 [0] : vector<2x16x1xf32> to vector<16x1xf32>
    %218 = vector.shape_cast %217 : vector<16x1xf32> to vector<1x16x1xf32>
    %219 = vector.broadcast %218 : vector<1x16x1xf32> to vector<2x16x16xf32>
    %220 = arith.subf %214, %219 : vector<2x16x16xf32>
    %221 = math.exp %220 : vector<2x16x16xf32>
    %cst_105 = arith.constant dense<0.000000e+00> : vector<2x16xf32>
    %222 = vector.multi_reduction <add>, %221, %cst_105 [2] : vector<2x16x16xf32> to vector<2x16xf32>
    %223 = vector.shape_cast %222 : vector<2x16xf32> to vector<2x16x1xf32>
    %cst_106 = arith.constant dense<0.000000e+00> : vector<16x1xf32>
    %224 = vector.multi_reduction <add>, %223, %cst_106 [0] : vector<2x16x1xf32> to vector<16x1xf32>
    %225 = vector.shape_cast %224 : vector<16x1xf32> to vector<1x16x1xf32>
    %226 = tpu.reciprocal %225 {approx = true} : vector<1x16x1xf32> -> vector<1x16x1xf32>
    %227 = vector.broadcast %226 : vector<1x16x1xf32> to vector<2x16x16xf32>
    %228 = arith.mulf %221, %227 : vector<2x16x16xf32>
    %229 = arith.truncf %228 : vector<2x16x16xf32> to vector<2x16x16xbf16>
    "tpu.trace_start"() <{level = 10 : i32, message = "nqk,nkd->nqd"}> : () -> ()
    %cst_107 = arith.constant dense<0.000000e+00> : vector<2x16x8xf32>
    %230 = tpu.matmul %229, %213, %cst_107 {dimension_numbers = #tpu.dot_dimension_numbers<[2], [1], [1], [2], [0, 0, 0, 1, 1, 2], [0], [0]>} : vector<2x16x16xbf16>, vector<2x16x8xbf16>, vector<2x16x8xf32> -> vector<2x16x8xf32>
    "tpu.trace_stop"() : () -> ()
    %cst_108 = arith.constant dense<0.000000e+00> : vector<16x8xf32>
    %231 = vector.multi_reduction <add>, %230, %cst_108 [0] : vector<2x16x8xf32> to vector<16x8xf32>
    %232 = arith.truncf %231 : vector<16x8xf32> to vector<16x8xbf16>
    %c3 = arith.constant 3 : index
    %c0_109 = arith.constant 0 : index
    %c0_110 = arith.constant 0 : index
    %233 = vector.load %arg18[%c3, %c0_109, %c0_110] : memref<4x8x32xbf16, #tpu.memory_space<vmem>>, vector<1x8x32xbf16>
    %234 = vector.shape_cast %233 : vector<1x8x32xbf16> to vector<8x32xbf16>
    %cst_111 = arith.constant dense<0.000000e+00> : vector<16x32xf32>
    %235 = tpu.matmul %232, %234, %cst_111 {dimension_numbers = #tpu.dot_dimension_numbers<[1], [0], [0], [1], [0, 0, 1, 1], [], []>} : vector<16x8xbf16>, vector<8x32xbf16>, vector<16x32xf32> -> vector<16x32xf32>
    %236 = arith.addf %204, %235 : vector<16x32xf32>
    %237 = vector.broadcast %12 : vector<1x32xf32> to vector<16x32xf32>
    %238 = arith.addf %236, %237 : vector<16x32xf32>
    %c0_112 = arith.constant 0 : index
    %c0_113 = arith.constant 0 : index
    %c0_114 = arith.constant 0 : index
    %239 = vector.load %arg5[%c0_112, %c0_113, %c0_114] : memref<1x16x32xf32, #tpu.memory_space<vmem>>, vector<1x16x32xf32>
    %240 = vector.shape_cast %239 : vector<1x16x32xf32> to vector<16x32xf32>
    %241 = arith.addf %238, %240 : vector<16x32xf32>
    %cst_115 = arith.constant dense<0.000000e+00> : vector<16xf32>
    %242 = vector.multi_reduction <add>, %241, %cst_115 [1] : vector<16x32xf32> to vector<16xf32>
    %243 = vector.shape_cast %242 : vector<16xf32> to vector<16x1xf32>
    %cst_116 = arith.constant 3.200000e+01 : f32
    %244 = vector.broadcast %cst_116 : f32 to vector<16x1xf32>
    %245 = arith.divf %243, %244 : vector<16x1xf32>
    %246 = vector.broadcast %245 : vector<16x1xf32> to vector<16x32xf32>
    %247 = arith.subf %241, %246 : vector<16x32xf32>
    %248 = arith.mulf %247, %247 : vector<16x32xf32>
    %cst_117 = arith.constant dense<0.000000e+00> : vector<16xf32>
    %249 = vector.multi_reduction <add>, %248, %cst_117 [1] : vector<16x32xf32> to vector<16xf32>
    %250 = vector.shape_cast %249 : vector<16xf32> to vector<16x1xf32>
    %cst_118 = arith.constant 3.200000e+01 : f32
    %251 = vector.broadcast %cst_118 : f32 to vector<16x1xf32>
    %252 = arith.divf %250, %251 : vector<16x1xf32>
    %253 = vector.broadcast %245 : vector<16x1xf32> to vector<16x32xf32>
    %254 = arith.subf %241, %253 : vector<16x32xf32>
    %cst_119 = arith.constant 9.99999974E-6 : f32
    %255 = vector.broadcast %cst_119 : f32 to vector<16x1xf32>
    %256 = arith.addf %252, %255 : vector<16x1xf32>
    %257 = math.rsqrt %256 : vector<16x1xf32>
    %258 = vector.broadcast %257 : vector<16x1xf32> to vector<16x32xf32>
    %259 = arith.mulf %254, %258 : vector<16x32xf32>
    %260 = vector.broadcast %13 : vector<1x32xf32> to vector<16x32xf32>
    %261 = arith.mulf %259, %260 : vector<16x32xf32>
    %262 = vector.broadcast %14 : vector<1x32xf32> to vector<16x32xf32>
    %263 = arith.addf %261, %262 : vector<16x32xf32>
    %264 = arith.truncf %263 : vector<16x32xf32> to vector<16x32xbf16>
    %cst_120 = arith.constant dense<0.000000e+00> : vector<16x64xf32>
    %265 = tpu.matmul %264, %15, %cst_120 {dimension_numbers = #tpu.dot_dimension_numbers<[1], [0], [0], [1], [0, 0, 1, 1], [], []>} : vector<16x32xbf16>, vector<32x64xbf16>, vector<16x64xf32> -> vector<16x64xf32>
    %266 = vector.broadcast %16 : vector<1x64xf32> to vector<16x64xf32>
    %267 = arith.addf %265, %266 : vector<16x64xf32>
    %cst_121 = arith.constant 5.000000e-01 : f32
    %268 = vector.broadcast %cst_121 : f32 to vector<16x64xf32>
    %269 = arith.mulf %268, %267 : vector<16x64xf32>
    %cst_122 = arith.constant 0.707106769 : f32
    %270 = vector.broadcast %cst_122 : f32 to vector<16x64xf32>
    %271 = arith.mulf %267, %270 : vector<16x64xf32>
    %272 = math.absf %271 : vector<16x64xf32>
    %cst_123 = arith.constant 0.327591091 : f32
    %273 = vector.broadcast %cst_123 : f32 to vector<16x64xf32>
    %274 = arith.mulf %273, %272 : vector<16x64xf32>
    %cst_124 = arith.constant 1.000000e+00 : f32
    %275 = vector.broadcast %cst_124 : f32 to vector<16x64xf32>
    %276 = arith.addf %275, %274 : vector<16x64xf32>
    %277 = tpu.reciprocal %276 {approx = true} : vector<16x64xf32> -> vector<16x64xf32>
    %cst_125 = arith.constant 1.06140542 : f32
    %278 = vector.broadcast %cst_125 : f32 to vector<16x64xf32>
    %279 = arith.mulf %278, %277 : vector<16x64xf32>
    %cst_126 = arith.constant -1.45315206 : f32
    %280 = vector.broadcast %cst_126 : f32 to vector<16x64xf32>
    %281 = arith.addf %279, %280 : vector<16x64xf32>
    %282 = arith.mulf %281, %277 : vector<16x64xf32>
    %cst_127 = arith.constant 1.42141378 : f32
    %283 = vector.broadcast %cst_127 : f32 to vector<16x64xf32>
    %284 = arith.addf %282, %283 : vector<16x64xf32>
    %285 = arith.mulf %284, %277 : vector<16x64xf32>
    %cst_128 = arith.constant -0.284496725 : f32
    %286 = vector.broadcast %cst_128 : f32 to vector<16x64xf32>
    %287 = arith.addf %285, %286 : vector<16x64xf32>
    %288 = arith.mulf %287, %277 : vector<16x64xf32>
    %cst_129 = arith.constant 0.254829586 : f32
    %289 = vector.broadcast %cst_129 : f32 to vector<16x64xf32>
    %290 = arith.addf %288, %289 : vector<16x64xf32>
    %291 = arith.mulf %290, %277 : vector<16x64xf32>
    %cst_130 = arith.constant 0.000000e+00 : f32
    %292 = vector.broadcast %cst_130 : f32 to vector<16x64xf32>
    %293 = arith.subf %292, %272 : vector<16x64xf32>
    %294 = arith.mulf %293, %272 : vector<16x64xf32>
    %295 = math.exp %294 : vector<16x64xf32>
    %296 = arith.mulf %291, %295 : vector<16x64xf32>
    %cst_131 = arith.constant 1.000000e+00 : f32
    %297 = vector.broadcast %cst_131 : f32 to vector<16x64xf32>
    %298 = arith.subf %297, %296 : vector<16x64xf32>
    %cst_132 = arith.constant 0.000000e+00 : f32
    %299 = vector.broadcast %cst_132 : f32 to vector<16x64xf32>
    %300 = arith.cmpf oge, %271, %299 : vector<16x64xf32>
    %cst_133 = arith.constant 0.000000e+00 : f32
    %301 = vector.broadcast %cst_133 : f32 to vector<16x64xf32>
    %302 = arith.subf %301, %298 : vector<16x64xf32>
    %303 = arith.select %300, %298, %302 : vector<16x64xi1>, vector<16x64xf32>
    %cst_134 = arith.constant 1.000000e+00 : f32
    %304 = vector.broadcast %cst_134 : f32 to vector<16x64xf32>
    %305 = arith.addf %304, %303 : vector<16x64xf32>
    %306 = arith.mulf %269, %305 : vector<16x64xf32>
    %307 = arith.truncf %306 : vector<16x64xf32> to vector<16x64xbf16>
    %cst_135 = arith.constant dense<0.000000e+00> : vector<16x32xf32>
    %308 = tpu.matmul %307, %17, %cst_135 {dimension_numbers = #tpu.dot_dimension_numbers<[1], [0], [0], [1], [0, 0, 1, 1], [], []>} : vector<16x64xbf16>, vector<64x32xbf16>, vector<16x32xf32> -> vector<16x32xf32>
    %309 = vector.broadcast %18 : vector<1x32xf32> to vector<16x32xf32>
    %310 = arith.addf %308, %309 : vector<16x32xf32>
    %311 = arith.addf %263, %310 : vector<16x32xf32>
    %cst_136 = arith.constant dense<0.000000e+00> : vector<16xf32>
    %312 = vector.multi_reduction <add>, %311, %cst_136 [1] : vector<16x32xf32> to vector<16xf32>
    %313 = vector.shape_cast %312 : vector<16xf32> to vector<16x1xf32>
    %cst_137 = arith.constant 3.200000e+01 : f32
    %314 = vector.broadcast %cst_137 : f32 to vector<16x1xf32>
    %315 = arith.divf %313, %314 : vector<16x1xf32>
    %316 = vector.broadcast %315 : vector<16x1xf32> to vector<16x32xf32>
    %317 = arith.subf %311, %316 : vector<16x32xf32>
    %318 = arith.mulf %317, %317 : vector<16x32xf32>
    %cst_138 = arith.constant dense<0.000000e+00> : vector<16xf32>
    %319 = vector.multi_reduction <add>, %318, %cst_138 [1] : vector<16x32xf32> to vector<16xf32>
    %320 = vector.shape_cast %319 : vector<16xf32> to vector<16x1xf32>
    %cst_139 = arith.constant 3.200000e+01 : f32
    %321 = vector.broadcast %cst_139 : f32 to vector<16x1xf32>
    %322 = arith.divf %320, %321 : vector<16x1xf32>
    %323 = vector.broadcast %315 : vector<16x1xf32> to vector<16x32xf32>
    %324 = arith.subf %311, %323 : vector<16x32xf32>
    %cst_140 = arith.constant 9.99999974E-6 : f32
    %325 = vector.broadcast %cst_140 : f32 to vector<16x1xf32>
    %326 = arith.addf %322, %325 : vector<16x1xf32>
    %327 = math.rsqrt %326 : vector<16x1xf32>
    %328 = vector.broadcast %327 : vector<16x1xf32> to vector<16x32xf32>
    %329 = arith.mulf %324, %328 : vector<16x32xf32>
    %330 = vector.broadcast %19 : vector<1x32xf32> to vector<16x32xf32>
    %331 = arith.mulf %329, %330 : vector<16x32xf32>
    %332 = vector.broadcast %20 : vector<1x32xf32> to vector<16x32xf32>
    %333 = arith.addf %331, %332 : vector<16x32xf32>
    %c0_141 = arith.constant 0 : index
    %c0_142 = arith.constant 0 : index
    %c0_143 = arith.constant 0 : index
    %334 = vector.load %arg28[%c0_141, %c0_142, %c0_143] : memref<1x16x32xf32, #tpu.memory_space<vmem>>, vector<1x16x32xf32>
    %335 = vector.shape_cast %334 : vector<1x16x32xf32> to vector<16x32xf32>
    %336 = vector.shape_cast %333 : vector<16x32xf32> to vector<1x16x32xf32>
    tpu.vector_store %arg28[%c0_141, %c0_142, %c0_143], %336 {strides = array<i32>} : memref<1x16x32xf32, #tpu.memory_space<vmem>>, vector<1x16x32xf32>,
    return
  }
  func.func @transform_0(%arg0: i32, %arg1: i32) -> (i32, i32, i32, i32) {
    %c0_i32 = arith.constant 0 : i32
    %c0_i32_0 = arith.constant 0 : i32
    %c0_i32_1 = arith.constant 0 : i32
    return %arg0, %c0_i32, %arg1, %c0_i32_0 : i32, i32, i32, i32
  }
  func.func @transform_1(%arg0: i32, %arg1: i32) -> (i32, i32, i32, i32) {
    %c0_i32 = arith.constant 0 : i32
    %c0_i32_0 = arith.constant 0 : i32
    %c0_i32_1 = arith.constant 0 : i32
    %c0_i32_2 = arith.constant 0 : i32
    return %arg0, %c0_i32, %c0_i32_0, %c0_i32_1 : i32, i32, i32, i32
  }
  func.func @transform_2(%arg0: i32, %arg1: i32) -> (i32, i32, i32, i32) {
    %c0_i32 = arith.constant 0 : i32
    %c0_i32_0 = arith.constant 0 : i32
    %c0_i32_1 = arith.constant 0 : i32
    %c0_i32_2 = arith.constant 0 : i32
    return %arg0, %c0_i32, %c0_i32_0, %c0_i32_1 : i32, i32, i32, i32
  }
  func.func @transform_3(%arg0: i32, %arg1: i32) -> (i32, i32, i32) {
    %c0_i32 = arith.constant 0 : i32
    %c0_i32_0 = arith.constant 0 : i32
    return %arg0, %arg1, %c0_i32 : i32, i32, i32
  }
  func.func @transform_4(%arg0: i32, %arg1: i32) -> (i32, i32) {
    %c0_i32 = arith.constant 0 : i32
    %c0_i32_0 = arith.constant 0 : i32
    %c0_i32_1 = arith.constant 0 : i32
    return %c0_i32, %c0_i32_0 : i32, i32
  }
  func.func @transform_5(%arg0: i32, %arg1: i32) -> (i32, i32) {
    %c0_i32 = arith.constant 0 : i32
    %c0_i32_0 = arith.constant 0 : i32
    %c0_i32_1 = arith.constant 0 : i32
    return %c0_i32, %c0_i32_0 : i32, i32
  }
  func.func @transform_6(%arg0: i32, %arg1: i32) -> (i32, i32) {
    %c0_i32 = arith.constant 0 : i32
    %c0_i32_0 = arith.constant 0 : i32
    %c0_i32_1 = arith.constant 0 : i32
    return %c0_i32, %c0_i32_0 : i32, i32
  }
  func.func @transform_7(%arg0: i32, %arg1: i32) -> (i32, i32) {
    %c0_i32 = arith.constant 0 : i32
    %c0_i32_0 = arith.constant 0 : i32
    %c0_i32_1 = arith.constant 0 : i32
    return %c0_i32, %c0_i32_0 : i32, i32
  }
  func.func @transform_8(%arg0: i32, %arg1: i32) -> (i32, i32) {
    %c0_i32 = arith.constant 0 : i32
    %c0_i32_0 = arith.constant 0 : i32
    %c0_i32_1 = arith.constant 0 : i32
    return %c0_i32, %c0_i32_0 : i32, i32
  }
  func.func @transform_9(%arg0: i32, %arg1: i32) -> (i32, i32) {
    %c0_i32 = arith.constant 0 : i32
    %c0_i32_0 = arith.constant 0 : i32
    %c0_i32_1 = arith.constant 0 : i32
    return %c0_i32, %c0_i32_0 : i32, i32
  }
  func.func @transform_10(%arg0: i32, %arg1: i32) -> (i32, i32) {
    %c0_i32 = arith.constant 0 : i32
    %c0_i32_0 = arith.constant 0 : i32
    %c0_i32_1 = arith.constant 0 : i32
    return %c0_i32, %c0_i32_0 : i32, i32
  }
  func.func @transform_11(%arg0: i32, %arg1: i32) -> (i32, i32) {
    %c0_i32 = arith.constant 0 : i32
    %c0_i32_0 = arith.constant 0 : i32
    %c0_i32_1 = arith.constant 0 : i32
    return %c0_i32, %c0_i32_0 : i32, i32
  }
  func.func @transform_12(%arg0: i32, %arg1: i32) -> (i32, i32) {
    %c0_i32 = arith.constant 0 : i32
    %c0_i32_0 = arith.constant 0 : i32
    %c0_i32_1 = arith.constant 0 : i32
    return %c0_i32, %c0_i32_0 : i32, i32
  }
  func.func @transform_13(%arg0: i32, %arg1: i32) -> (i32, i32) {
    %c0_i32 = arith.constant 0 : i32
    %c0_i32_0 = arith.constant 0 : i32
    %c0_i32_1 = arith.constant 0 : i32
    return %c0_i32, %c0_i32_0 : i32, i32
  }
  func.func @transform_14(%arg0: i32, %arg1: i32) -> (i32, i32) {
    %c0_i32 = arith.constant 0 : i32
    %c0_i32_0 = arith.constant 0 : i32
    %c0_i32_1 = arith.constant 0 : i32
    return %c0_i32, %c0_i32_0 : i32, i32
  }
  func.func @transform_15(%arg0: i32, %arg1: i32) -> (i32, i32) {
    %c0_i32 = arith.constant 0 : i32
    %c0_i32_0 = arith.constant 0 : i32
    %c0_i32_1 = arith.constant 0 : i32
    return %c0_i32, %c0_i32_0 : i32, i32
  }
  func.func @transform_16(%arg0: i32, %arg1: i32) -> (i32, i32, i32) {
    %c0_i32 = arith.constant 0 : i32
    %c0_i32_0 = arith.constant 0 : i32
    %c0_i32_1 = arith.constant 0 : i32
    %c0_i32_2 = arith.constant 0 : i32
    return %c0_i32, %c0_i32_0, %c0_i32_1 : i32, i32, i32
  }
  func.func @transform_17(%arg0: i32, %arg1: i32) -> (i32, i32) {
    %c0_i32 = arith.constant 0 : i32
    %c0_i32_0 = arith.constant 0 : i32
    %c0_i32_1 = arith.constant 0 : i32
    return %c0_i32, %c0_i32_0 : i32, i32
  }
  func.func @transform_18(%arg0: i32, %arg1: i32) -> (i32, i32) {
    %c0_i32 = arith.constant 0 : i32
    %c0_i32_0 = arith.constant 0 : i32
    %c0_i32_1 = arith.constant 0 : i32
    return %c0_i32, %c0_i32_0 : i32, i32
  }
  func.func @transform_19(%arg0: i32, %arg1: i32) -> (i32, i32) {
    %c0_i32 = arith.constant 0 : i32
    %c0_i32_0 = arith.constant 0 : i32
    %c0_i32_1 = arith.constant 0 : i32
    return %c0_i32, %c0_i32_0 : i32, i32
  }
  func.func @transform_20(%arg0: i32, %arg1: i32) -> (i32, i32) {
    %c0_i32 = arith.constant 0 : i32
    %c0_i32_0 = arith.constant 0 : i32
    %c0_i32_1 = arith.constant 0 : i32
    return %c0_i32, %c0_i32_0 : i32, i32
  }
  func.func @transform_21(%arg0: i32, %arg1: i32) -> (i32, i32) {
    %c0_i32 = arith.constant 0 : i32
    %c0_i32_0 = arith.constant 0 : i32
    %c0_i32_1 = arith.constant 0 : i32
    return %c0_i32, %c0_i32_0 : i32, i32
  }
  func.func @transform_22(%arg0: i32, %arg1: i32) -> (i32, i32) {
    %c0_i32 = arith.constant 0 : i32
    %c0_i32_0 = arith.constant 0 : i32
    %c0_i32_1 = arith.constant 0 : i32
    return %c0_i32, %c0_i32_0 : i32, i32
  }
  func.func @transform_23(%arg0: i32, %arg1: i32) -> (i32, i32) {
    %c0_i32 = arith.constant 0 : i32
    %c0_i32_0 = arith.constant 0 : i32
    %c0_i32_1 = arith.constant 0 : i32
    return %c0_i32, %c0_i32_0 : i32, i32
  }
  func.func @transform_24(%arg0: i32, %arg1: i32) -> (i32, i32) {
    %c0_i32 = arith.constant 0 : i32
    %c0_i32_0 = arith.constant 0 : i32
    %c0_i32_1 = arith.constant 0 : i32
    return %c0_i32, %c0_i32_0 : i32, i32
  }
  func.func @transform_25(%arg0: i32, %arg1: i32) -> (i32, i32) {
    %c0_i32 = arith.constant 0 : i32
    %c0_i32_0 = arith.constant 0 : i32
    %c0_i32_1 = arith.constant 0 : i32
    return %c0_i32, %c0_i32_0 : i32, i32
  }
  func.func @transform_26(%arg0: i32, %arg1: i32) -> (i32, i32, i32) {
    %c0_i32 = arith.constant 0 : i32
    %c0_i32_0 = arith.constant 0 : i32
    return %arg0, %arg1, %c0_i32 : i32, i32, i32
  }
}

</mosaic_0001>

<bundles_post_ra>
// kernel: tpu_custom_call.1
= control target key start
LH: loop header
LB: loop body
LE: loop exit
PB: predicated region body
PF: predicated region fallthrough
CT: control target
= control target key end

     0   :  { %s5583_s0 = inlined_call_operand.hbm [shape: f32[2,2,16,32], index: 0, kind: input, shape index: {}]   ;;  %s5584_s1 = inlined_call_operand.hbm [shape: f32[2,2,16,32], index: 1, kind: input, shape index: {}]   ;;  %s5585_s2 = inlined_call_operand.hbm [shape: f32[2,2,16,32], index: 2, kind: input, shape index: {}]   ;;  %s5586_s3 = inlined_call_operand.vmem [shape: f32[2,16,32], index: 3, kind: input, shape index: {}]   ;;  %s5587_s4 = inlined_call_operand.hbm [shape: f32[1,32], index: 4, kind: input, shape index: {}]   ;;  %s5588_s5 = inlined_call_operand.hbm [shape: f32[1,32], index: 5, kind: input, shape index: {}]   ;;  %s5589_s6 = inlined_call_operand.hbm [shape: f32[1,32], index: 6, kind: input, shape index: {}]   ;;  %s5590_s7 = inlined_call_operand.hbm [shape: f32[1,32], index: 7, kind: input, shape index: {}]   ;;  %s5591_s8 = inlined_call_operand.hbm [shape: f32[1,32], index: 8, kind: input, shape index: {}]   ;;  %s5592_s9 = inlined_call_operand.hbm [shape: f32[1,32], index: 9, kind: input, shape index: {}]   ;;  %s5593_s10 = inlined_call_operand.vmem [shape: bf16[32,32], index: 10, kind: input, shape index: {}]   ;;  %s5594_s11 = inlined_call_operand.hbm [shape: f32[1,32], index: 11, kind: input, shape index: {}]   ;;  %s5595_s12 = inlined_call_operand.vmem [shape: bf16[32,32], index: 12, kind: input, shape index: {}]   ;;  %s5596_s13 = inlined_call_operand.hbm [shape: f32[1,32], index: 13, kind: input, shape index: {}]   ;;  %s5597_s14 = inlined_call_operand.hbm [shape: bf16[32,32], index: 14, kind: input, shape index: {}]   ;;  %s5598_s15 = inlined_call_operand.hbm [shape: f32[1,32], index: 15, kind: input, shape index: {}]   ;;  %s5599_s16 = inlined_call_operand.hbm [shape: bf16[4,8,32], index: 16, kind: input, shape index: {}]   ;;  %s5600_s17 = inlined_call_operand.hbm [shape: f32[1,32], index: 17, kind: input, shape index: {}]   ;;  %s5601_s18 = inlined_call_operand.hbm [shape: f32[1,32], index: 18, kind: input, shape index: {}]   ;;  %s5602_s19 = inlined_call_operand.vmem [shape: f32[1,32], index: 19, kind: input, shape index: {}]   ;;  %s5603_s20 = inlined_call_operand.hbm [shape: bf16[32,64], index: 20, kind: input, shape index: {}]   ;;  %s5604_s21 = inlined_call_operand.vmem [shape: f32[1,64], index: 21, kind: input, shape index: {}]   ;;  %s5605_s22 = inlined_call_operand.vmem [shape: bf16[64,32], index: 22, kind: input, shape index: {}]   ;;  %s5606_s23 = inlined_call_operand.vmem [shape: f32[1,32], index: 23, kind: input, shape index: {}]   ;;  %s5607_s24 = inlined_call_operand.vmem [shape: f32[1,32], index: 24, kind: input, shape index: {}]   ;;  %s5608_s25 = inlined_call_operand.vmem [shape: f32[1,32], index: 25, kind: input, shape index: {}]   ;;  %s5609_s26 = inlined_call_operand.hbm [shape: f32[2,16,32], index: 26, kind: output, shape index: {}]  }
   0x1   :  { %5634 = sst [smem:[#allocation46_spill]] %s5583_s0 }
   0x2   :  { %5635 = sst [smem:[#allocation47_spill]] %s5584_s1 }
   0x3   :  { %5636 = sst [smem:[#allocation48_spill]] %s5585_s2 }
   0x4   :  { %5637 = sst [smem:[#allocation49_spill]] %s5586_s3 }
   0x5   :  { %5638 = sst [smem:[#allocation50_spill]] %s5587_s4 }
   0x6   :  { %5639 = sst [smem:[#allocation51_spill]] %s5588_s5 }
   0x7   :  { %5640 = sst [smem:[#allocation52_spill]] %s5589_s6 }
   0x8   :  { %5641 = sst [smem:[#allocation53_spill]] %s5590_s7 }
   0x9   :  { %5642 = sst [smem:[#allocation54_spill]] %s5591_s8 }
   0xa   :  { %5643 = sst [smem:[#allocation55_spill]] %s5592_s9 }
   0xb   :  { %5644 = sst [smem:[#allocation56_spill]] %s5593_s10 }
   0xc   :  { %5645 = sst [smem:[#allocation57_spill]] %s5594_s11 }
   0xd   :  { %5646 = sst [smem:[#allocation58_spill]] %s5596_s13 }
   0xe   :  { %5647 = sst [smem:[#allocation59_spill]] %s5597_s14 }
   0xf   :  { %5648 = sst [smem:[#allocation60_spill]] %s5598_s15 }
  0x10   :  { %5649 = sst [smem:[#allocation61_spill]] %s5599_s16 }
  0x11   :  { %5650 = sst [smem:[#allocation62_spill]] %s5600_s17 }
  0x12   :  { %5651 = sst [smem:[#allocation63_spill]] %s5601_s18 }
  0x13   :  { %5652 = sst [smem:[#allocation64_spill]] %s5604_s21 }
  0x14   :  { %5653 = sst [smem:[#allocation65_spill]] %s5605_s22 }
  0x15   :  { %5654 = sst [smem:[#allocation66_spill]] %s5606_s23 }
  0x16   :  { %5655 = sst [smem:[#allocation67_spill]] %s5607_s24 }
  0x17   :  { %5656 = sst [smem:[#allocation68_spill]] %s5608_s25 }
  0x18   :  { %5657 = sst [smem:[#allocation69_spill]] %s5609_s26 }
  0x19   :  { %31 = vsyncpa [#allocation3], 0 }
  0x1a   :  { %33 = vsyncpa [#allocation3 + $0x1], 0 }
  0x1b   :  { %34 = vsyncpa [#allocation6], 0 }
  0x1c   :  { %36 = vsyncpa [#allocation6 + $0x1], 0 }
  0x1d   :  { %37 = vsyncpa [#allocation9], 0 }
  0x1e   :  { %38 = vsyncpa [#allocation12], 0 }
  0x1f   :  { %39 = vsyncpa [#allocation15], 0 }
  0x20   :  { %40 = vsyncpa [#allocation18], 0 }
  0x21   :  { %41 = vsyncpa [#allocation21], 0 }
  0x22   :  { %42 = vsyncpa [#allocation24], 0 }
  0x23   :  { %43 = vsyncpa [#allocation27], 0 }
  0x24   :  { %44 = vsyncpa [#allocation4], 0 }
  0x25   :  { %46 = vsyncpa [#allocation4 + $0x1], 0  ;;  %s4800_s27 = smov 0   ;;  %s4802_s3 = smov 0  }
  0x26   :  { %s4804_s7 = smov 0   ;;  %s4806_s28 = smov 0  }
  0x27   :  { %s4808_s8 = smov 0   ;;  %s4810_s4 = smov 0  }
  0x28 LB: > { %5658 = sst [smem:[#allocation40_spill]] %s4614_s27  ;;  %s4831_s29 = sadd.s32 4294967295, %s4634_s4   ;;  %s4634_s4 = sphi %s4810_s4, %s52_s4   ;;  %s4630_s8 = sphi %s4808_s8, %s5729_s8   ;;  %s4626_s28 = sphi %s4806_s28, %s5728_s28   ;;  %s4622_s7 = sphi %s4804_s7, %s5732_s7   ;;  %s4618_s3 = sphi %s4802_s3, %s5731_s3   ;;  %s4614_s27 = sphi %s4800_s27, %s5730_s27  }
  0x29   : > { %5659 = sst [smem:[#allocation41_spill]] %s4630_s8  ;;  %p3414_p0 = scmp.ge.s32.totalorder %s4634_s4, 1 }
  0x2a   : > { %5660 = sst [smem:[#allocation42_spill]] %s4634_s4  ;;  %p5613_p1 = scmp.eq.s32.totalorder %s4831_s29, 0 }
  0x2b   : > { %p667_p2 = scmp.lt.s32.totalorder %s4634_s4, 3  ;;  %s4636_s9 = smov [#allocation8]  }
  0x2c   : > { %s680_s30 = sshll.u32 %s4636_s9, 4  ;;  %s4637_s2 = smov [#allocation11]   ;;  %s681_s30 = int_to_ptr.vmem [resolvable:$true] %s680_s30 }
  0x2d   : > { %p4836_p3 = pnand %p3414_p0, %p667_p2  ;;  %s702_s5 = sshll.u32 %s4637_s2, 4  ;;  %s703_s5 = int_to_ptr.vmem [resolvable:$true] %s702_s5 }
  0x2e   : > { %s4638_s6 = smov [#allocation14]   ;;  %s4085_s26 = scalar_lea.vmem %s681_s30, 16 }
  0x2f   : > { %s5661_s0 = scalar_select %p4836_p3, 1, 0 }
  0x30   : > { %p3814_p5 = pneg %p4836_p3  ;;  %s724_s1 = sshll.u32 %s4638_s6, 4  ;;  %s4849_s1 = int_to_ptr.vmem [resolvable:$true] %s724_s1 }
  0x31   : > { %p4086_p8 = scmp.ne.s32.totalorder %s681_s30, %s4085_s26  ;;  %s4092_s2 = scalar_lea.vmem %s681_s30, 32 }
  0x32   : > { %p4845_p6 = pnand %p3814_p5, %p5613_p1  ;;  %p4093_p11 = scmp.lt.s32.totalorder %s681_s30, %s681_s30 }
  0x33   : > { %p4094_p12 = scmp.lt.s32.totalorder %s4092_s2, %s4085_s26 }
  0x34   : > { %p4853_p7 = pneg %p4845_p6 }
  0x35   : > { %p4095_p13 = por %p4094_p12, %p4093_p11 }
  0x36   : > { %p4088_p9 = pnand %p4086_p8, %p4853_p7 }
  0x38   : > { %p4089_p10 = pneg %p4088_p9 }
  0x3a   : > { %p4096_p0 = pnand %p4095_p13, %p4089_p10 }
  0x3c   : > { %4099 = shalt.err (!%p4096_p0)
}
  0x3d   : > { %s5664_s24 = sld [smem:[#allocation50_spill]]  ;;  %s4111_s23 = scalar_lea.vmem %s703_s5, 16 }
  0x3e   : > { %p4112_p2 = scmp.ne.s32.totalorder %s703_s5, %s4111_s23  ;;  %s4118_s21 = scalar_lea.vmem %s703_s5, 32 }
  0x3f   : > { %p4119_p8 = scmp.lt.s32.totalorder %s703_s5, %s703_s5  ;;  %p4120_p9 = scmp.lt.s32.totalorder %s4118_s21, %s4111_s23 }
  0x40   : > { %p4114_p5 = pnand %p4112_p2, %p4853_p7 }
  0x41   : > { %p4121_p1 = por %p4120_p9, %p4119_p8 }
  0x42   : > { %p4115_p4 = pneg %p4114_p5 }
  0x43   : > { %3817 = dma.hbm_to_vmem [thread:$0]  (!%p4845_p6), %s5664_s24, 16, %s681_s30, [#allocation9]  }
  0x44   : > { %p4122_p3 = pnand %p4121_p1, %p4115_p4 }
  0x46   : > { %4125 = shalt.err (!%p4122_p3)
}
  0x47   : > { %s5665_s22 = sld [smem:[#allocation52_spill]]  ;;  %s4137_s24 = scalar_lea.vmem %s4849_s1, 16 }
  0x48   : > { %p4138_p10 = scmp.ne.s32.totalorder %s4849_s1, %s4137_s24  ;;  %s4144_s21 = scalar_lea.vmem %s4849_s1, 32 }
  0x49   : > { %p4145_p1 = scmp.lt.s32.totalorder %s4849_s1, %s4849_s1  ;;  %p4146_p3 = scmp.lt.s32.totalorder %s4144_s21, %s4137_s24 }
  0x4a   : > { %p4140_p11 = pnand %p4138_p10, %p4853_p7 }
  0x4b   : > { %p4147_p4 = por %p4146_p3, %p4145_p1 }
  0x4c   : > { %p4141_p12 = pneg %p4140_p11 }
  0x4d   : > { %3823 = dma.hbm_to_vmem [thread:$0]  (!%p4845_p6), %s5665_s22, 16, %s703_s5, [#allocation12]  }
  0x4e   : > { %p4148_p13 = pnand %p4147_p4, %p4141_p12 }
  0x50   : > { %4151 = shalt.err (!%p4148_p13)
}
  0x51   : > { %s5666_s30 = sld [smem:[#allocation54_spill]]  ;;  %s4639_s22 = smov [#allocation17]  }
  0x52   : > { %s749_s5 = sshll.u32 %s4639_s22, 4  ;;  %s4640_s6 = smov [#allocation20]   ;;  %s750_s5 = int_to_ptr.vmem [resolvable:$true] %s749_s5 }
  0x53   : > { %s773_s26 = sshll.u32 %s4640_s6, 4  ;;  %s4163_s2 = scalar_lea.vmem %s750_s5, 16  ;;  %s774_s26 = int_to_ptr.vmem [resolvable:$true] %s773_s26 }
  0x54   : > { %p4164_p0 = scmp.ne.s32.totalorder %s750_s5, %s4163_s2  ;;  %s4170_s24 = scalar_lea.vmem %s750_s5, 32 }
  0x55   : > { %p4171_p8 = scmp.lt.s32.totalorder %s750_s5, %s750_s5  ;;  %p4172_p9 = scmp.lt.s32.totalorder %s4170_s24, %s4163_s2 }
  0x56   : > { %p4166_p2 = pnand %p4164_p0, %p4853_p7 }
  0x57   : > { %3829 = dma.hbm_to_vmem [thread:$0]  (!%p4845_p6), %s5666_s30, 16, %s4849_s1, [#allocation15]  }
  0x58   : > { %p4167_p5 = pneg %p4166_p2  ;;  %p4173_p10 = por %p4172_p9, %p4171_p8 }
  0x5a   : > { %p4174_p11 = pnand %p4173_p10, %p4167_p5 }
  0x5c   : > { %4177 = shalt.err (!%p4174_p11)
}
  0x5d   : > { %s5667_s11 = sld [smem:[#allocation57_spill]]  ;;  %s4189_s23 = scalar_lea.vmem %s774_s26, 256 }
  0x5e   : > { %p4190_p12 = scmp.ne.s32.totalorder %s774_s26, %s4189_s23  ;;  %p4197_p4 = scmp.lt.s32.totalorder %s774_s26, %s774_s26 }
  0x5f   : > { %p4198_p13 = scmp.lt.s32.totalorder %s4189_s23, %s4189_s23 }
  0x60   : > { %p4192_p1 = pnand %p4190_p12, %p4853_p7 }
  0x61   : > { %p4199_p0 = por %p4198_p13, %p4197_p4 }
  0x62   : > { %p4193_p3 = pneg %p4192_p1 }
  0x63   : > { %3835 = dma.hbm_to_vmem [thread:$0]  (!%p4845_p6), %s5667_s11, 16, %s750_s5, [#allocation18]  }
  0x64   : > { %p4200_p2 = pnand %p4199_p0, %p4193_p3 }
  0x66   : > { %4203 = shalt.err (!%p4200_p2)
}
  0x67   : > { %s5616_s25 = smov 64   ;;  %s5617_s30 = smov 4  }
  0x68   : > { %s5668_s14 = sld [smem:[#allocation59_spill]]  ;;  %s4643_s6 = smov [#allocation23]  }
  0x69   : > { %s797_s2 = sshll.u32 %s4643_s6, 4  ;;  %s4644_s24 = smov [#allocation26]   ;;  %s798_s2 = int_to_ptr.vmem [resolvable:$true] %s797_s2 }
  0x6a   : > { %s822_s21 = sshll.u32 %s4644_s24, 4  ;;  %s4215_s1 = scalar_lea.vmem %s798_s2, 256  ;;  %s823_s21 = int_to_ptr.vmem [resolvable:$true] %s822_s21 }
  0x6b   : > { %p4216_p5 = scmp.ne.s32.totalorder %s798_s2, %s4215_s1  ;;  %p4223_p10 = scmp.lt.s32.totalorder %s798_s2, %s798_s2 }
  0x6c   : > { %p4224_p11 = scmp.lt.s32.totalorder %s4215_s1, %s4215_s1 }
  0x6d   : > { %p4218_p8 = pnand %p4216_p5, %p4853_p7 }
  0x6e   : > { %3841 = dma.hbm_to_vmem [thread:$0]  (!%p4845_p6), %s5668_s14, 256, %s774_s26, [#allocation21], %s5616_s25, %s5616_s25, %s5617_s30  }
  0x6f   : > { %p4219_p9 = pneg %p4218_p8  ;;  %p4225_p12 = por %p4224_p11, %p4223_p10 }
  0x71   : > { %p4226_p1 = pnand %p4225_p12, %p4219_p9 }
  0x73   : > { %4229 = shalt.err (!%p4226_p1)
}
  0x74   : > { %s5669_s16 = sld [smem:[#allocation61_spill]]  ;;  %s4241_s22 = scalar_lea.vmem %s823_s21, 16 }
  0x75   : > { %p4242_p3 = scmp.ne.s32.totalorder %s823_s21, %s4241_s22  ;;  %s4248_s5 = scalar_lea.vmem %s823_s21, 32 }
  0x76   : > { %p4249_p0 = scmp.lt.s32.totalorder %s823_s21, %s823_s21  ;;  %p4250_p2 = scmp.lt.s32.totalorder %s4248_s5, %s4241_s22 }
  0x77   : > { %p4244_p4 = pnand %p4242_p3, %p4853_p7 }
  0x78   : > { %p4251_p5 = por %p4250_p2, %p4249_p0 }
  0x79   : > { %p4245_p13 = pneg %p4244_p4 }
  0x7a   : > { %3847 = dma.hbm_to_vmem [thread:$0]  (!%p4845_p6), %s5669_s16, 256, %s798_s2, [#allocation24], %s5616_s25, %s5616_s25, %s5617_s30  }
  0x7b   : > { %p4252_p8 = pnand %p4251_p5, %p4245_p13 }
  0x7d   : > { %4255 = shalt.err (!%p4252_p8)
}
  0x7e   : > { %s5670_s18 = sld [smem:[#allocation63_spill]]  ;;  %s3413_s2 = sadd.s32 4294967294, %s4634_s4  }
  0x7f   : > { %s64_s1 = sadd.s32 1, %s4630_s8  ;;  %s73_s26 = sadd.s32 1, %s4622_s7 }
  0x80   : > { %p66_p9 = scmp.ge.s32.totalorder %s64_s1, 2  ;;  %p80_p10 = scmp.ne.s32.totalorder %s4622_s7, %s4618_s3 }
  0x81   : > { %p81_p11 = scmp.eq.s32.totalorder %s4634_s4, 0  ;;  %p86_p12 = scmp.ne.s32.totalorder %s4618_s3, %s4614_s27 }
  0x82   : > { %s5734_s1 = smov (%p66_p9, %s64_s1), 0  ;;  %p5673_p3 = scmp.eq.s32.totalorder %s4831_s29, 0 }
  0x83   : > { %5671 = sst [smem:[#allocation43_spill]] %s5734_s1  ;;  %p4928_p1 = por %p81_p11, %p80_p10 }
  0x84   : > { %3853 = dma.hbm_to_vmem [thread:$0]  (!%p4845_p6), %s5670_s18, 16, %s823_s21, [#allocation27]  }
  0x85   : > { %p4934_p4 = por %p5673_p3, %p86_p12  ;;  %s68_s22 = ssub.s32 %s4630_s8, %s5734_s1 }
  0x86   : > { %p654_p13 = scmp.eq.s32.totalorder %s4831_s29, 1  ;;  %p71_p0 = scmp.eq.s32.totalorder %s68_s22, 0 }
  0x87   : > { %s5674_s21 = scalar_select %p4934_p4, 1, 0 }
  0x88   : > { %p660_p2 = scmp.eq.s32.totalorder %s3413_s2, 1  ;;  %p4941_p5 = por %p654_p13, %p80_p10 }
  0x89   : > { %p3885_p8 = scmp.lt.s32.totalorder %s4634_s4, 2  ;;  %s5619_s25 = sand.u32 1, %s4622_s7  }
  0x8a   : > { %s5675_s5 = scalar_select %p4941_p5, 1, 0 }
  0x8b   : > { %s4947_s6 = scalar_select %p71_p0, %s4622_s7, %s73_s26  }
  0x8c   : > { %p4949_p9 = por %p660_p2, %p86_p12  ;;  %s4956_s30 = sshll.u32 %s5619_s25, 5 }
  0x8d   : > { %5676 = sst [smem:[#allocation44_spill]] %s4947_s6  ;;  %s4959_s11 = sshll.u32 %s4630_s8, 9 }
  0x8e   : > { %s5677_s24 = scalar_select %p4949_p9, 1, 0 }
  0x8f   : > { %p4963_p10 = pnand %p3885_p8, %p4928_p1  ;;  %s887_s26 = sand.u32 1, %s4634_s4  }
  0x90   : > { %5678 = sst [smem:[#allocation45_spill]] %s5677_s24  ;;  %s891_s1 = scalar_lea.vmem [#allocation5], %s4956_s30 }
  0x91   : > { %s5679_s2 = scalar_select %p4963_p10, 1, 0 }
  0x92   : > { %s5680_s16 = sld [smem:[#allocation47_spill]]  ;;  %s898_s6 = sshll.u32 %s891_s1, 4  ;;  %s899_s6 = int_to_ptr.vmem [resolvable:$true] %s898_s6 }
  0x93   : > { %s4645_s25 = smov [#allocation10]   ;;  %s4973_s8 = scalar_lea.sflag [#allocation6], %s887_s26 }
  0x94   : > { %s691_s24 = sshll.u32 %s4645_s25, 4  ;;  %p5625_p11 = pneg %p4963_p10  ;;  %s692_s24 = int_to_ptr.vmem [resolvable:$true] %s691_s24 }
  0x95   : > { %s4269_s23 = scalar_lea.vmem %s899_s6, 512  ;;  %s4646_s4 = smov [#allocation5]  }
  0x96   : > { %p4270_p12 = scmp.ne.s32.totalorder %s899_s6, %s4269_s23  ;;  %s4274_s27 = sshll.u32 %s4646_s4, 4  ;;  %s4275_s27 = int_to_ptr.vmem [resolvable:$false] %s4274_s27 }
  0x97   : > { %s4276_s14 = scalar_lea.vmem %s4275_s27, 1024  ;;  %p4277_p13 = scmp.lt.s32.totalorder %s899_s6, %s4275_s27 }
  0x98   : > { %s897_s18 = scalar_lea.hbm %s5680_s16, %s4959_s11  ;;  %p4272_p1 = pnand %p4270_p12, %p5625_p11 }
  0x99   : > { %p4278_p0 = scmp.lt.s32.totalorder %s4276_s14, %s4269_s23 }
  0x9a   : > { %p4273_p3 = pneg %p4272_p1 }
  0x9b   : > { %p4279_p2 = por %p4278_p0, %p4277_p13 }
  0x9d   : > { %p4280_p8 = pnand %p4279_p2, %p4273_p3 }
  0x9f   : > { %4283 = shalt.err (!%p4280_p8)
}
  0xa0   : > { %s5626_s16 = smov 128   ;;  %s5632_s25 = smov 8  }
  0xa1   : > { %3863 = dma.hbm_to_vmem [thread:$0]  (!%p4963_p10), %s897_s18, 512, %s899_s6, %s4973_s8, %s5626_s16, %s5626_s16, %s5632_s25  }
  0xa2   : > { %s4295_s1 = scalar_lea.vmem %s692_s24, 16  ;;  %s4302_s27 = scalar_lea.vmem %s692_s24, 32 }
  0xa3   : > { %p4296_p12 = scmp.ne.s32.totalorder %s692_s24, %s4295_s1  ;;  %p4303_p13 = scmp.lt.s32.totalorder %s692_s24, %s692_s24 }
  0xa4   : > { %p4304_p3 = scmp.lt.s32.totalorder %s4302_s27, %s4295_s1 }
  0xa5   : > { %p4298_p1 = pnand %p4296_p12, %p4853_p7 }
  0xa6   : > { %p4305_p0 = por %p4304_p3, %p4303_p13 }
  0xa7   : > { %p4299_p11 = pneg %p4298_p1 }
  0xa9   : > { %p4306_p2 = pnand %p4305_p0, %p4299_p11 }
  0xab   : > { %4309 = shalt.err (!%p4306_p2)
}
  0xac   : > { %s5681_s22 = sld [smem:[#allocation51_spill]]  ;;  %s4649_s18 = smov [#allocation13]  }
  0xad   : > { %s713_s6 = sshll.u32 %s4649_s18, 4  ;;  %s4650_s23 = smov [#allocation16]   ;;  %s714_s6 = int_to_ptr.vmem [resolvable:$true] %s713_s6 }
  0xae   : > { %s735_s14 = sshll.u32 %s4650_s23, 4  ;;  %s4321_s16 = scalar_lea.vmem %s714_s6, 16  ;;  %s736_s14 = int_to_ptr.vmem [resolvable:$true] %s735_s14 }
  0xaf   : > { %p4322_p8 = scmp.ne.s32.totalorder %s714_s6, %s4321_s16  ;;  %s4328_s1 = scalar_lea.vmem %s714_s6, 32 }
  0xb0   : > { %p4329_p11 = scmp.lt.s32.totalorder %s714_s6, %s714_s6  ;;  %p4330_p13 = scmp.lt.s32.totalorder %s4328_s1, %s4321_s16 }
  0xb1   : > { %p4324_p12 = pnand %p4322_p8, %p4853_p7 }
  0xb2   : > { %3820 = dma.hbm_to_vmem [thread:$0]  (!%p4845_p6), %s5681_s22, 16, %s692_s24, [#allocation9]  }
  0xb3   : > { %p4325_p1 = pneg %p4324_p12  ;;  %p4331_p3 = por %p4330_p13, %p4329_p11 }
  0xb5   : > { %p4332_p0 = pnand %p4331_p3, %p4325_p1 }
  0xb7   : > { %4335 = shalt.err (!%p4332_p0)
}
  0xb8   : > { %s5682_s4 = sld [smem:[#allocation53_spill]]  ;;  %s4347_s26 = scalar_lea.vmem %s736_s14, 16 }
  0xb9   : > { %p4348_p2 = scmp.ne.s32.totalorder %s736_s14, %s4347_s26  ;;  %s4354_s22 = scalar_lea.vmem %s736_s14, 32 }
  0xba   : > { %p4355_p12 = scmp.lt.s32.totalorder %s736_s14, %s736_s14  ;;  %p4356_p5 = scmp.lt.s32.totalorder %s4354_s22, %s4347_s26 }
  0xbb   : > { %p4350_p9 = pnand %p4348_p2, %p4853_p7 }
  0xbc   : > { %p4357_p4 = por %p4356_p5, %p4355_p12 }
  0xbd   : > { %p4351_p8 = pneg %p4350_p9 }
  0xbe   : > { %3826 = dma.hbm_to_vmem [thread:$0]  (!%p4845_p6), %s5682_s4, 16, %s714_s6, [#allocation12]  }
  0xbf   : > { %p4358_p11 = pnand %p4357_p4, %p4351_p8 }
  0xc1   : > { %4361 = shalt.err (!%p4358_p11)
}
  0xc2   : > { %s5683_s23 = sld [smem:[#allocation55_spill]]  ;;  %s4651_s6 = smov [#allocation19]  }
  0xc3   : > { %s763_s1 = sshll.u32 %s4651_s6, 4  ;;  %s4652_s27 = smov [#allocation22]   ;;  %s764_s1 = int_to_ptr.vmem [resolvable:$true] %s763_s1 }
  0xc4   : > { %s787_s24 = sshll.u32 %s4652_s27, 4  ;;  %s4373_s4 = scalar_lea.vmem %s764_s1, 16  ;;  %s788_s24 = int_to_ptr.vmem [resolvable:$true] %s787_s24 }
  0xc5   : > { %p4374_p9 = scmp.ne.s32.totalorder %s764_s1, %s4373_s4  ;;  %s4380_s26 = scalar_lea.vmem %s764_s1, 32 }
  0xc6   : > { %p4381_p4 = scmp.lt.s32.totalorder %s764_s1, %s764_s1  ;;  %p4382_p5 = scmp.lt.s32.totalorder %s4380_s26, %s4373_s4 }
  0xc7   : > { %p4376_p1 = pnand %p4374_p9, %p4853_p7 }
  0xc8   : > { %3832 = dma.hbm_to_vmem [thread:$0]  (!%p4845_p6), %s5683_s23, 16, %s736_s14, [#allocation15]  }
  0xc9   : > { %p4377_p13 = pneg %p4376_p1  ;;  %p4383_p3 = por %p4382_p5, %p4381_p4 }
  0xcb   : > { %p4384_p0 = pnand %p4383_p3, %p4377_p13 }
  0xcd   : > { %4387 = shalt.err (!%p4384_p0)
}
  0xce   : > { %s5684_s13 = sld [smem:[#allocation58_spill]]  ;;  %s4399_s16 = scalar_lea.vmem %s788_s24, 16 }
  0xcf   : > { %p4400_p2 = scmp.ne.s32.totalorder %s788_s24, %s4399_s16  ;;  %s4406_s18 = scalar_lea.vmem %s788_s24, 32 }
  0xd0   : > { %p4407_p11 = scmp.lt.s32.totalorder %s788_s24, %s788_s24  ;;  %p4408_p9 = scmp.lt.s32.totalorder %s4406_s18, %s4399_s16 }
  0xd1   : > { %p4402_p8 = pnand %p4400_p2, %p4853_p7 }
  0xd2   : > { %p4409_p1 = por %p4408_p9, %p4407_p11 }
  0xd3   : > { %p4403_p12 = pneg %p4402_p8 }
  0xd4   : > { %3838 = dma.hbm_to_vmem [thread:$0]  (!%p4845_p6), %s5684_s13, 16, %s764_s1, [#allocation18]  }
  0xd5   : > { %p4410_p4 = pnand %p4409_p1, %p4403_p12 }
  0xd7   : > { %4413 = shalt.err (!%p4410_p4)
}
  0xd8   : > { %s5685_s15 = sld [smem:[#allocation60_spill]]  ;;  %s4653_s1 = smov [#allocation25]  }
  0xd9   : > { %s811_s27 = sshll.u32 %s4653_s1, 4  ;;  %s4654_s4 = smov [#allocation28]   ;;  %s812_s27 = int_to_ptr.vmem [resolvable:$true] %s811_s27 }
  0xda   : > { %s835_s26 = sshll.u32 %s4654_s4, 4  ;;  %s4425_s22 = scalar_lea.vmem %s812_s27, 16  ;;  %s836_s26 = int_to_ptr.vmem [resolvable:$true] %s835_s26 }
  0xdb   : > { %p4426_p13 = scmp.ne.s32.totalorder %s812_s27, %s4425_s22  ;;  %s4432_s14 = scalar_lea.vmem %s812_s27, 32 }
  0xdc   : > { %p4433_p0 = scmp.lt.s32.totalorder %s812_s27, %s812_s27  ;;  %p4434_p2 = scmp.lt.s32.totalorder %s4432_s14, %s4425_s22 }
  0xdd   : > { %p4428_p5 = pnand %p4426_p13, %p4853_p7 }
  0xde   : > { %3844 = dma.hbm_to_vmem [thread:$0]  (!%p4845_p6), %s5685_s15, 16, %s788_s24, [#allocation21]  }
  0xdf   : > { %p4429_p3 = pneg %p4428_p5  ;;  %p4435_p8 = por %p4434_p2, %p4433_p0 }
  0xe1   : > { %p4436_p12 = pnand %p4435_p8, %p4429_p3 }
  0xe3   : > { %4439 = shalt.err (!%p4436_p12)
}
  0xe4   : > { %s5686_s17 = sld [smem:[#allocation62_spill]]  ;;  %s4451_s18 = scalar_lea.vmem %s836_s26, 256 }
  0xe5   : > { %p4452_p11 = scmp.ne.s32.totalorder %s836_s26, %s4451_s18  ;;  %p4459_p4 = scmp.lt.s32.totalorder %s836_s26, %s836_s26 }
  0xe6   : > { %p4460_p13 = scmp.lt.s32.totalorder %s4451_s18, %s4451_s18 }
  0xe7   : > { %p4454_p9 = pnand %p4452_p11, %p4853_p7 }
  0xe8   : > { %p4461_p5 = por %p4460_p13, %p4459_p4 }
  0xe9   : > { %p4455_p1 = pneg %p4454_p9 }
  0xea   : > { %3850 = dma.hbm_to_vmem [thread:$0]  (!%p4845_p6), %s5686_s17, 16, %s812_s27, [#allocation24]  }
  0xeb   : > { %p4462_p10 = pnand %p4461_p5, %p4455_p1 }
  0xed   : > { %4465 = shalt.err (!%p4462_p10)
}
  0xee   : > { %s5687_s23 = smov 4   ;;  %s5688_s6 = smov 64  }
  0xef   : > { %3856 = dma.hbm_to_vmem [thread:$0]  (!%p4845_p6), %s5603_s20, 256, %s836_s26, [#allocation27], %s5688_s6, %s5688_s6, %s5687_s23  }
  0xf0   : > { %s5689_s22 = sld [smem:[#allocation46_spill]]  ;;  %s868_s16 = scalar_lea.vmem [#allocation2], %s4956_s30 }
  0xf1   : > { %s877_s24 = sshll.u32 %s868_s16, 4  ;;  %s5690_s25 = sld [smem:[#allocation48_spill]]  ;;  %s878_s24 = int_to_ptr.vmem [resolvable:$true] %s877_s24 }
  0xf2   : > { %s5691_s15 = sand.u32 1, %s4622_s7   ;;  %s4479_s1 = scalar_lea.vmem %s878_s24, 512 }
  0xf3   : > { %s865_s17 = scalar_lea.sflag [#allocation3], %s5691_s15  ;;  %p4480_p7 = scmp.ne.s32.totalorder %s878_s24, %s4479_s1 }
  0xf4   : > { %p5692_p10 = scmp.ne.s32.totalorder %s5679_s2, 0  ;;  %s4655_s26 = smov [#allocation2]  }
  0xf5   : > { %s4484_s23 = sshll.u32 %s4655_s26, 4  ;;  %s4485_s23 = int_to_ptr.vmem [resolvable:$false] %s4484_s23 }
  0xf6   : > { %s876_s14 = scalar_lea.hbm %s5689_s22, %s4959_s11  ;;  %p5693_p3 = pneg %p5692_p10 }
  0xf7   : > { %s918_s13 = scalar_lea.hbm %s5690_s25, %s4959_s11  ;;  %s4486_s6 = scalar_lea.vmem %s4485_s23, 1024 }
  0xf8   : > { %p4482_p0 = pnand %p4480_p7, %p5693_p3  ;;  %p4487_p6 = scmp.lt.s32.totalorder %s878_s24, %s4485_s23 }
  0xf9   : > { %p4488_p8 = scmp.lt.s32.totalorder %s4486_s6, %s4479_s1 }
  0xfa   : > { %p4483_p2 = pneg %p4482_p0 }
  0xfb   : > { %p4489_p12 = por %p4488_p8, %p4487_p6 }
  0xfd   : > { %p4490_p11 = pnand %p4489_p12, %p4483_p2 }
  0xff   : > { %4493 = shalt.err (!%p4490_p11)
}
 0x100   : > { %s5694_s4 = smov 8   ;;  %s5695_s9 = smov 128  }
 0x101   : > { %3860 = dma.hbm_to_vmem [thread:$0]  (!%p5692_p10), %s876_s14, 512, %s878_s24, %s865_s17, %s5695_s9, %s5695_s9, %s5694_s4  }
 0x102   : > { %s912_s15 = scalar_lea.vmem [#allocation7], %s4956_s30  ;;  %p5696_p1 = pmov %p5693_p3 }
 0x103   : > { %s919_s27 = sshll.u32 %s912_s15, 4  ;;  %s4656_s16 = smov [#allocation7]   ;;  %s920_s27 = int_to_ptr.vmem [resolvable:$true] %s919_s27 }
 0x104   : > { %s4507_s22 = scalar_lea.vmem %s920_s27, 512  ;;  %s4512_s10 = sshll.u32 %s4656_s16, 4  ;;  %s4513_s10 = int_to_ptr.vmem [resolvable:$false] %s4512_s10 }
 0x105   : > { %p4508_p9 = scmp.ne.s32.totalorder %s920_s27, %s4507_s22  ;;  %s4514_s18 = scalar_lea.vmem %s4513_s10, 1024 }
 0x106   : > { %p4515_p5 = scmp.lt.s32.totalorder %s920_s27, %s4513_s10  ;;  %p4516_p7 = scmp.lt.s32.totalorder %s4514_s18, %s4507_s22 }
 0x107   : > { %p4510_p4 = pnand %p4508_p9, %p5696_p1 }
 0x108   : > { %p4517_p3 = por %p4516_p7, %p4515_p5 }
 0x109   : > { %p4511_p13 = pneg %p4510_p4 }
 0x10b   : > { %p4518_p0 = pnand %p4517_p3, %p4511_p13 }
 0x10d   : > { %4521 = shalt.err (!%p4518_p0)
}
 0x10e   : > { %3866 = dma.hbm_to_vmem [thread:$0]  (!%p5692_p10), %s918_s13, 512, %s920_s27, %s4973_s8, %s5695_s9, %s5695_s9, %s5694_s4  }
 0x10f   : > { %p5697_p2 = scmp.ne.s32.totalorder %s5661_s0, 0 }
 0x110   : > { %s5075_s14 = sand.u32 (!%p5697_p2), 1, %s4618_s3   ;;  %p5698_p6 = scmp.ne.s32.totalorder (!%p5697_p2), %s5674_s21, 0 }
 0x111   : > { %944 = sbr.rel (%p5697_p2) target bundleno = 4849 (0x12f1), region = 124  ;;  %s3440_s2 = sshll.u32 (!%p5697_p2), %s5075_s14, 5 }
 0x112   : > { %s947_s24 = scalar_lea.sflag (!%p5697_p2), [#allocation3], %s5075_s14  ;;  %s950_s1 = scalar_lea.vmem (!%p5697_p2), [#allocation2], %s3440_s2 }
 0x116   : > { %4573 = dma.done.wait (%p5698_p6), %s947_s24, 512  }
 0x117   : > { %4575 = vsyncadd (%p5698_p6), %s947_s24, 4294966784  ;;  %s955_s11 = sand.u32 1, %s4831_s29   ;;  %s5084_s8 = scalar_lea.vmem [#allocation5], %s3440_s2 }
 0x118   : > { %s956_s13 = scalar_lea.sflag [#allocation6], %s955_s11 }
 0x119   : > { %4577 = dma.done.wait (%p5698_p6), %s956_s13, 1024  }
 0x11a   : > { %4579 = vsyncadd (%p5698_p6), %s956_s13, 4294966272  ;;  %s5090_s0 = scalar_lea.vmem [#allocation7], %s3440_s2  ;;  %p5699_p10 = scmp.eq.s32.totalorder %s4831_s29, 0 }
 0x11c   : > { %4581 = dma.done.wait (%p5699_p10), [#allocation9], 32   ;;  %p5700_p8 = pmov %p5699_p10 }
 0x11e   : > { %4583 = vsyncadd (%p5700_p8), [#allocation9], 4294967264  ;;  %p5701_p12 = pmov %p5700_p8 }
 0x11f   : > { %p5702_p11 = pmov %p5700_p8 }
 0x120   : > { %4585 = dma.done.wait (%p5701_p12), [#allocation12], 32  }
 0x121   : > { %4587 = vsyncadd (%p5702_p11), [#allocation12], 4294967264  ;;  %p5703_p9 = pmov %p5700_p8 }
 0x122   : > { %p5704_p1 = pmov %p5700_p8 }
 0x123   : > { %4589 = dma.done.wait (%p5703_p9), [#allocation15], 32  }
 0x124   : > { %4591 = vsyncadd (%p5704_p1), [#allocation15], 4294967264  ;;  %p5705_p4 = pmov %p5704_p1 }
 0x125   : > { %p5706_p13 = pmov %p5704_p1 }
 0x126   : > { %4593 = dma.done.wait (%p5705_p4), [#allocation18], 32  }
 0x127   : > { %4595 = vsyncadd (%p5706_p13), [#allocation18], 4294967264  ;;  %p5707_p5 = pmov %p5704_p1 }
 0x128   : > { %p5708_p7 = pmov %p5704_p1 }
 0x129   : > { %4597 = dma.done.wait (%p5707_p5), [#allocation21], 272  }
 0x12a   : > { %4599 = vsyncadd (%p5708_p7), [#allocation21], 4294967024  ;;  %p5709_p3 = pmov %p5704_p1 }
 0x12b   : > { %p5710_p0 = pmov %p5704_p1 }
 0x12c   : > { %4601 = dma.done.wait (%p5709_p3), [#allocation24], 272  }
 0x12d   : > { %4603 = vsyncadd (%p5710_p0), [#allocation24], 4294967024  ;;  %p5711_p2 = pmov %p5710_p0 }
 0x12e   : > { %p5712_p6 = pmov %p5710_p0 }
 0x12f   : > { %4605 = dma.done.wait (%p5711_p2), [#allocation27], 272  }
 0x130   : > { %4607 = vsyncadd (%p5712_p6), [#allocation27], 4294967024  ;;  %vm1177_vm0 = vcmask 261120   ;;  %v1165_v0 = vld [vmem:[%s950_s1] sm:$0xff]  ;;  %v1167_v1 = vld [vmem:[%s950_s1 + $0x10] sm:$0xff]  ;;  %s5713_s26 = sld [smem:[#allocation56_spill]] }
 0x131   : > { %v1166_v2 = vld [vmem:[%s950_s1 + $0x8] sm:$0xff]  ;;  %v1178_v3 = vsel %vm1177_vm0, %v1165_v0, 0.0  ;;  %v1184_v4 = vsel %vm1177_vm0, %v1167_v1, 0.0  ;;  %v1168_v5 = vld [vmem:[%s950_s1 + $0x18] sm:$0xff]  ;;  %v1169_v6 = vld [vmem:[%s5084_s8] sm:$0xff]  ;;  %vm4658_vm1 = vmmov 0  }
 0x132   : > { %v1170_v7 = vld [vmem:[%s5084_s8 + $0x8] sm:$0xff]  ;;  %1179 = vadd.xlane.f32.xlu0 %v1178_v3  ;;  %1185 = vadd.xlane.f32.xlu1 %v1184_v4  ;;  %v1181_v8 = vsel %vm1177_vm0, %v1166_v2, 0.0  ;;  %v1187_v9 = vsel %vm1177_vm0, %v1168_v5, 0.0  ;;  %v1326_v10 = vsel %vm1177_vm0, %v1169_v6, 0.0  ;;  %v1171_v12 = vld [vmem:[%s5084_s8 + $0x10] sm:$0xff]  ;;  %v1172_v13 = vld [vmem:[%s5084_s8 + $0x18] sm:$0xff] }
 0x133   : > { %v1329_v11 = vsel %vm1177_vm0, %v1170_v7, 0.0  ;;  %v1332_v14 = vsel %vm1177_vm0, %v1171_v12, 0.0  ;;  %v1335_v15 = vsel %vm1177_vm0, %v1172_v13, 0.0  ;;  %v1173_v54 = vld [vmem:[%s5090_s0] sm:$0xff]  ;;  %v5175_v58 = vld [vmem:[%s5090_s0 + $0x8] sm:$0xff]  ;;  %v5178_v59 = vld [vmem:[%s5090_s0 + $0x10] sm:$0xff] }
 0x134   : > { %v1473_v57 = vsel %vm1177_vm0, %v1173_v54, 0.0  ;;  %v1476_v60 = vsel %vm1177_vm0, %v5175_v58, 0.0  ;;  %v1479_v61 = vsel %vm1177_vm0, %v5178_v59, 0.0  ;;  %v5185_v62 = vld [vmem:[%s5090_s0 + $0x18] sm:$0xff]  ;;  %vm1626_vm2 = vcmask 64512   ;;  %s4659_s22 = smov 120  }
 0x135   : > { %v1482_v63 = vsel %vm1177_vm0, %v5185_v62, 0.0  ;;  %vm1721_vm3 = vcmask 130048   ;;  %s4660_s16 = smov 112   ;;  %vm2128_vm4 = vcmask 1043456   ;;  %s4661_s10 = smov 104   ;;  %vm3024_vm7 = vcmask 523264  }
 0x136   : > { %1182 = vadd.xlane.f32.xlu0 %v1181_v8  ;;  %1188 = vadd.xlane.f32.xlu1 %v1187_v9  ;;  %p1114_p10 = scmp.lt.s32.totalorder %s4626_s28, 1  ;;  %s5714_s24 = sld [smem:[#allocation49_spill]] }
 0x137   : > { %s5715_s29 = sld [smem:[#allocation65_spill]]  ;;  %s3525_s0 = sshll.u32 %s4626_s28, 8 }
 0x138   : > { %s1115_s18 = scalar_select %p1114_p10, %s4626_s28, 1 }
 0x139   : > { %s5719_s8 = sld [smem:[#allocation68_spill]]  ;;  %s3116_s27 = scalar_lea.sflag [#allocation4], %s5075_s14 }
 0x13a   : > { %1327 = vadd.xlane.f32.xlu0 %v1326_v10  ;;  %1330 = vadd.xlane.f32.xlu1 %v1329_v11  ;;  %s3524_s17 = sshll.u32 %s1115_s18, 4  ;;  %s5720_s9 = sld [smem:[#allocation69_spill]] }
 0x13b   : > { %p5721_p12 = scmp.ne.s32.totalorder %s5675_s5, 0 }
 0x13c   : > { %s1121_s1 = scalar_lea.vmem %s5714_s24, %s3524_s17  ;;  %s5717_s17 = sld [smem:[#allocation66_spill]] }
 0x13d   : > { %s5718_s24 = sld [smem:[#allocation67_spill]] }
 0x13e   : > { %1333 = vadd.xlane.f32.xlu0 %v1332_v14  ;;  %1336 = vadd.xlane.f32.xlu1 %v1335_v15 }
 0x140   : > { %s5532_s15 = scalar_lea.hbm %s5720_s9, %s3525_s0 }
 0x1bb   : > { %v1180_v16 = vpop.xlane.xlu0 %1179  ;;  %v1186_v17 = vpop.xlane.xlu1 %1185 }
 0x1bc   : > { %v1191_v18 = vmul.f32 0.03125, %v1180_v16  ;;  %v1193_v19 = vmul.f32 0.03125, %v1186_v17 }
 0x1be   : > { %v5132_v20 = vsub.f32 %v1165_v0, %v1191_v18  ;;  %v5134_v21 = vsub.f32 %v1167_v1, %v1193_v19  ;;  %v3974_v0 = vld [vmem:[%s5713_s26 + $0x8] sm:$0xff]   ;;  %v3975_v1 = vld [vmem:[%s5713_s26] sm:$0xff]  }
 0x1bf   : > { %v1183_v22 = vpop.xlane.xlu0 %1182  ;;  %v1189_v23 = vpop.xlane.xlu1 %1188  ;;  %3586 = vmatprep.subr.bf16.mxu1 %v3974_v0 }
 0x1c0   : > { %v1192_v24 = vmul.f32 0.03125, %v1183_v22  ;;  %v1194_v25 = vmul.f32 0.03125, %v1189_v23  ;;  %v1199_v26 = vmul.f32 %v5132_v20, %v5132_v20  ;;  %v1201_v27 = vmul.f32 %v5134_v21, %v5134_v21  ;;  %3587 = vmatpush3.bf16.msra.mxu1 %v3974_v0 }
 0x1c1   : > { %3588 = vmatprep.subr.bf16.mxu1 %v3975_v1 }
 0x1c2   : > { %v5140_v28 = vsub.f32 %v1166_v2, %v1192_v24  ;;  %v5142_v29 = vsub.f32 %v1168_v5, %v1194_v25  ;;  %v1203_v30 = vsel %vm1177_vm0, %v1199_v26, 0.0  ;;  %v1209_v33 = vsel %vm1177_vm0, %v1201_v27, 0.0  ;;  %v5198_v2 = vld [vmem:[%s5595_s12 + $0x8] sm:$0xff]  }
 0x1c3   : > { %1204 = vadd.xlane.f32.xlu0 %v1203_v30  ;;  %v1328_v31 = vpop.xlane.xlu0 %1327  ;;  %v1331_v32 = vpop.xlane.xlu1 %1330 }
 0x1c4   : > { %v1338_v34 = vmul.f32 0.03125, %v1328_v31  ;;  %v1339_v35 = vmul.f32 0.03125, %v1331_v32  ;;  %v1200_v36 = vmul.f32 %v5140_v28, %v5140_v28  ;;  %v1202_v37 = vmul.f32 %v5142_v29, %v5142_v29  ;;  %3589 = vmatpush3.bf16.msra.mxu1 %v3975_v1 }
 0x1c5   : > { %3594 = vmatprep.subr.bf16.mxu1 %v5198_v2 }
 0x1c6   : > { %v5150_v38 = vsub.f32 %v1169_v6, %v1338_v34  ;;  %v5152_v39 = vsub.f32 %v1170_v7, %v1339_v35  ;;  %v1206_v40 = vsel %vm1177_vm0, %v1200_v36, 0.0  ;;  %v1212_v43 = vsel %vm1177_vm0, %v1202_v37, 0.0  ;;  %v3460_v35 = vld [vmem:[#allocation8] ss:$0 sm:$0xff] }
 0x1c7   : > { %1210 = vadd.xlane.f32.xlu0 %v1209_v33  ;;  %1207 = vadd.xlane.f32.xlu1 %v1206_v40  ;;  %v1334_v41 = vpop.xlane.xlu0 %1333  ;;  %v1337_v42 = vpop.xlane.xlu1 %1336 }
 0x1c8   : > { %v1340_v44 = vmul.f32 0.03125, %v1334_v41  ;;  %v1341_v45 = vmul.f32 0.03125, %v1337_v42  ;;  %v1346_v46 = vmul.f32 %v5150_v38, %v5150_v38  ;;  %v1347_v47 = vmul.f32 %v5152_v39, %v5152_v39 }
 0x1ca   : > { %v5160_v48 = vsub.f32 %v1171_v12, %v1340_v44  ;;  %v5162_v49 = vsub.f32 %v1172_v13, %v1341_v45  ;;  %v1350_v50 = vsel %vm1177_vm0, %v1346_v46, 0.0  ;;  %v1353_v51 = vsel %vm1177_vm0, %v1347_v47, 0.0 }
 0x1cb   : > { %1213 = vadd.xlane.f32.xlu1 %v1212_v43  ;;  %1351 = vadd.xlane.f32.xlu0 %v1350_v50 }
 0x1cc   : > { %v1348_v52 = vmul.f32 %v5160_v48, %v5160_v48  ;;  %v1349_v53 = vmul.f32 %v5162_v49, %v5162_v49 }
 0x1ce   : > { %v1356_v55 = vsel %vm1177_vm0, %v1348_v52, 0.0  ;;  %v1359_v56 = vsel %vm1177_vm0, %v1349_v53, 0.0 }
 0x1cf   : > { %1354 = vadd.xlane.f32.xlu1 %v1353_v51  ;;  %1357 = vadd.xlane.f32.xlu0 %v1356_v55 }
 0x1d3   : > { %1360 = vadd.xlane.f32.xlu1 %v1359_v56  ;;  %1474 = vadd.xlane.f32.xlu0 %v1473_v57 }
 0x1d7   : > { %1477 = vadd.xlane.f32.xlu1 %v1476_v60  ;;  %1480 = vadd.xlane.f32.xlu0 %v1479_v61 }
 0x1db   : > { %1483 = vadd.xlane.f32.xlu1 %v1482_v63 }
 0x24c   : > { %v1205_v3 = vpop.xlane.xlu0 %1204 }
 0x24d   : > { %v1215_v4 = vmul.f32 0.03125, %v1205_v3 }
 0x24f   : > { %v1219_v5 = vadd.f32 1e-05, %v1215_v4  ;;  %v3467_v4 = vld [vmem:[#allocation11] ss:$0 sm:$0xff] }
 0x250   : > { %v1208_v6 = vpop.xlane.xlu1 %1207  ;;  %v1211_v7 = vpop.xlane.xlu0 %1210 }
 0x251   : > { %3986 = vrsqrt.f32 %v1219_v5  ;;  %v1216_v8 = vmul.f32 0.03125, %v1208_v6  ;;  %v1217_v9 = vmul.f32 0.03125, %v1211_v7 }
 0x253   : > { %v1220_v10 = vadd.f32 1e-05, %v1216_v8  ;;  %v1221_v11 = vadd.f32 1e-05, %v1217_v9 }
 0x254   : > { %v1214_v12 = vpop.xlane.xlu1 %1213  ;;  %v1352_v13 = vpop.xlane.xlu0 %1351 }
 0x255   : > { %3988 = vrsqrt.f32 %v1220_v10  ;;  %v1218_v14 = vmul.f32 0.03125, %v1214_v12  ;;  %v1362_v15 = vmul.f32 0.03125, %v1352_v13 }
 0x256   : > { %3990 = vrsqrt.f32 %v1221_v11 }
 0x257   : > { %v1222_v16 = vadd.f32 1e-05, %v1218_v14  ;;  %v1366_v17 = vadd.f32 1e-05, %v1362_v15 }
 0x258   : > { %v1355_v18 = vpop.xlane.xlu1 %1354  ;;  %v1358_v19 = vpop.xlane.xlu0 %1357 }
 0x259   : > { %3992 = vrsqrt.f32 %v1222_v16  ;;  %v1363_v22 = vmul.f32 0.03125, %v1355_v18  ;;  %v1364_v23 = vmul.f32 0.03125, %v1358_v19  ;;  %v3977_v18 = vld [vmem:[%s5595_s12] sm:$0xff]  }
 0x25a   : > { %3994 = vrsqrt.f32 %v1366_v17 }
 0x25b   : > { %v1367_v24 = vadd.f32 1e-05, %v1363_v22  ;;  %v1368_v25 = vadd.f32 1e-05, %v1364_v23 }
 0x25c   : > { %v1361_v26 = vpop.xlane.xlu1 %1360  ;;  %v1475_v27 = vpop.xlane.xlu0 %1474 }
 0x25d   : > { %3996 = vrsqrt.f32 %v1367_v24  ;;  %v1365_v30 = vmul.f32 0.03125, %v1361_v26  ;;  %v1485_v31 = vmul.f32 0.03125, %v1475_v27 }
 0x25e   : > { %v3987_v32 = vpop.eup %3986  ;;  %3998 = vrsqrt.f32 %v1368_v25 }
 0x25f   : > { %v1369_v33 = vadd.f32 1e-05, %v1365_v30  ;;  %v5201_v34 = vsub.f32 %v1173_v54, %v1485_v31  ;;  %v1227_v36 = vmul.f32 %v3987_v32, %v5132_v20  ;;  %v3461_v20 = vld [vmem:[#allocation10] ss:$0 sm:$0xff]  ;;  %v3978_v30 = vld [vmem:[#allocation20 + $0x8] sm:$0xff]   ;;  %v4657_v31 = vmov 0.0  }
 0x260   : > { %v1478_v37 = vpop.xlane.xlu1 %1477  ;;  %v1481_v40 = vpop.xlane.xlu0 %1480  ;;  %3602 = vmatprep.subr.bf16.mxu0 %v3978_v30 }
 0x261   : > { %4000 = vrsqrt.f32 %v1369_v33  ;;  %v1486_v41 = vmul.f32 0.03125, %v1478_v37  ;;  %v1487_v42 = vmul.f32 0.03125, %v1481_v40  ;;  %v1493_v43 = vmul.f32 %v5201_v34, %v5201_v34  ;;  %3603 = vmatpush3.bf16.msra.mxu0 %v3978_v30 }
 0x262   : > { %v3989_v44 = vpop.eup %3988  ;;  %v1237_v45 = vmul.f32 %v3460_v35, %v1227_v36 }
 0x263   : > { %v3991_v46 = vpop.eup %3990  ;;  %v5207_v47 = vsub.f32 %v5175_v58, %v1486_v41  ;;  %v5210_v50 = vsub.f32 %v5178_v59, %v1487_v42  ;;  %v1497_v51 = vsel %vm1177_vm0, %v1493_v43, 0.0  ;;  %v1228_v52 = vmul.f32 %v3989_v44, %v5140_v28 }
 0x264   : > { %v1484_v53 = vpop.xlane.xlu1 %1483  ;;  %1498 = vadd.xlane.f32.xlu0 %v1497_v51  ;;  %v1229_v54 = vmul.f32 %v3991_v46, %v5134_v21  ;;  %v1247_v59 = vadd.f32 %v3461_v20, %v1237_v45 }
 0x265   : > { %v1488_v55 = vmul.f32 0.03125, %v1484_v53  ;;  %v1494_v56 = vmul.f32 %v5207_v47, %v5207_v47  ;;  %v1495_v57 = vmul.f32 %v5210_v50, %v5210_v50  ;;  %v1238_v58 = vmul.f32 %v3460_v35, %v1228_v52 }
 0x266   : > { %v3993_v60 = vpop.eup %3992  ;;  %v1239_v3 = vmul.f32 %v3460_v35, %v1229_v54 }
 0x267   : > { %v3995_v61 = vpop.eup %3994  ;;  %v5220_v63 = vsub.f32 %v5185_v62, %v1488_v55  ;;  %v1500_v28 = vsel %vm1177_vm0, %v1494_v56, 0.0  ;;  %v1503_v0 = vsel %vm1177_vm0, %v1495_v57, 0.0  ;;  %v1248_v1 = vadd.f32 %v3461_v20, %v1238_v58  ;;  %v3475_v56 = vld [vmem:[#allocation16] ss:$0 sm:$0xff] }
 0x268   : > { %1501 = vadd.xlane.f32.xlu1 %v1500_v28  ;;  %1504 = vadd.xlane.f32.xlu0 %v1503_v0  ;;  %v1230_v21 = vmul.f32 %v3993_v60, %v5142_v29  ;;  %v1374_v5 = vmul.f32 %v3995_v61, %v5150_v38  ;;  %v1249_v13 = vadd.f32 %v3461_v20, %v1239_v3  ;;  %v3468_v38 = vld [vmem:[#allocation13] ss:$0 sm:$0xff] }
 0x269   : > { %v1251_v6 = vpack.c.bf16 %v1248_v1, %v1247_v59  ;;  %v1496_v7 = vmul.f32 %v5220_v63, %v5220_v63 }
 0x26a   : > { %v3997_v8 = vpop.eup %3996  ;;  %v1240_v62 = vmul.f32 %v3460_v35, %v1230_v21  ;;  %v1384_v12 = vmul.f32 %v3467_v4, %v1374_v5 }
 0x26b   : > { %v3999_v9 = vpop.eup %3998  ;;  %3590 = vmatprep.mubr.msk.bf16.mxu1 %vm1177_vm0, %v1251_v6  ;;  %v1506_v10 = vsel %vm1177_vm0, %v1496_v7, 0.0  ;;  %v1375_v11 = vmul.f32 %v3997_v8, %v5152_v39  ;;  %v3469_v8 = vld [vmem:[#allocation19] ss:$0 sm:$0xff] }
 0x26c   : > { %v1376_v29 = vmul.f32 %v3999_v9, %v5160_v48  ;;  %1507 = vadd.xlane.f32.xlu1 %v1506_v10  ;;  %v1250_v14 = vadd.f32 %v3461_v20, %v1240_v62  ;;  %v1394_v22 = vadd.f32 %v3468_v38, %v1384_v12  ;;  %v3474_v20 = vld [vmem:[#allocation14] ss:$0 sm:$0xff] }
 0x26d   : > { %v1385_v15 = vmul.f32 %v3467_v4, %v1375_v11 }
 0x26e   : > { %v4001_v16 = vpop.eup %4000  ;;  %v1252_v17 = vpack.c.bf16 %v1250_v14, %v1249_v13  ;;  %v1386_v24 = vmul.f32 %v3467_v4, %v1376_v29 }
 0x26f   : > { %v1377_v19 = vmul.f32 %v4001_v16, %v5162_v49  ;;  %v1395_v23 = vadd.f32 %v3468_v38, %v1385_v15  ;;  %v3979_v49 = vld [vmem:[#allocation20] sm:$0xff]   ;;  %v3462_v15 = vld [vmem:[#allocation17] ss:$0 sm:$0xff] }
 0x270   : > { %3591 = vmatmul.mubr.msk.bf16.vlgmr.msra.gmra.mxu1 %vm1177_vm0, %v1252_v17  ;;  %v1396_v25 = vadd.f32 %v3468_v38, %v1386_v24  ;;  %3604 = vmatprep.subr.bf16.mxu0 %v3979_v49 }
 0x271   : > { %3595 = vmatpush3.bf16.msra.mxu1 %v5198_v2  ;;  %v1398_v39 = vpack.c.bf16 %v1395_v23, %v1394_v22  ;;  %v1387_v48 = vmul.f32 %v3467_v4, %v1377_v19  ;;  %3605 = vmatpush3.bf16.msra.mxu0 %v3979_v49 }
 0x272   : > { %3596 = vmatprep.subr.bf16.mxu1 %v3977_v18  ;;  %3616 = vmatprep.subr.bf16.mxu0 %v4657_v31 }
 0x273   : > { %3598 = vmatprep.mubr.msk.bf16.mxu1 %vm1177_vm0, %v1398_v39  ;;  %v1397_v26 = vadd.f32 %v3468_v38, %v1387_v48  ;;  %v3476_v48 = vld [vmem:[#allocation22] ss:$0 sm:$0xff] }
 0x275   : > { %3597 = vmatpush3.bf16.msra.mxu1 %v3977_v18  ;;  %v1399_v27 = vpack.c.bf16 %v1397_v26, %v1396_v25 }
 0x276   : > { %3610 = vmatprep.subr.bf16.mxu1 %v4657_v31 }
 0x278   : > { %3599 = vmatmul.mubr.msk.bf16.vlgmr.msra.gmra.mxu1 %vm1177_vm0, %v1399_v27 }
 0x279   : > { %3612 = vmatprep.mubr.msk.bf16.mxu1 %vm4658_vm1, %v4657_v31 }
 0x2ed   : > { %v1499_v2 = vpop.xlane.xlu0 %1498 }
 0x2ee   : > { %v1509_v32 = vmul.f32 0.03125, %v1499_v2 }
 0x2f0   : > { %v1513_v33 = vadd.f32 1e-05, %v1509_v32 }
 0x2f1   : > { %v1502_v35 = vpop.xlane.xlu1 %1501  ;;  %v1505_v36 = vpop.xlane.xlu0 %1504 }
 0x2f2   : > { %4002 = vrsqrt.f32 %v1513_v33  ;;  %v1510_v37 = vmul.f32 0.03125, %v1502_v35  ;;  %v1511_v40 = vmul.f32 0.03125, %v1505_v36 }
 0x2f4   : > { %v1514_v41 = vadd.f32 1e-05, %v1510_v37  ;;  %v1515_v42 = vadd.f32 1e-05, %v1511_v40 }
 0x2f5   : > { %v1508_v43 = vpop.xlane.xlu1 %1507 }
 0x2f6   : > { %4004 = vrsqrt.f32 %v1514_v41  ;;  %v1512_v44 = vmul.f32 0.03125, %v1508_v43 }
 0x2f7   : > { %4006 = vrsqrt.f32 %v1515_v42 }
 0x2f8   : > { %v1516_v45 = vadd.f32 1e-05, %v1512_v44 }
 0x2fa   : > { %4008 = vrsqrt.f32 %v1516_v45 }
 0x2ff   : > { %v4003_v46 = vpop.eup %4002 }
 0x300   : > { %v1521_v51 = vmul.f32 %v4003_v46, %v5201_v34 }
 0x302   : > { %v1531_v55 = vmul.f32 %v3474_v20, %v1521_v51 }
 0x303   : > { %v4005_v52 = vpop.eup %4004 }
 0x304   : > { %v4007_v53 = vpop.eup %4006  ;;  %v1522_v54 = vmul.f32 %v4005_v52, %v5207_v47  ;;  %v1541_v59 = vadd.f32 %v3475_v56, %v1531_v55 }
 0x305   : > { %v1523_v57 = vmul.f32 %v4007_v53, %v5210_v50 }
 0x306   : > { %v1532_v58 = vmul.f32 %v3474_v20, %v1522_v54 }
 0x307   : > { %v4009_v60 = vpop.eup %4008  ;;  %v1533_v0 = vmul.f32 %v3474_v20, %v1523_v57 }
 0x308   : > { %v1542_v61 = vadd.f32 %v3475_v56, %v1532_v58  ;;  %v1524_v28 = vmul.f32 %v4009_v60, %v5220_v63 }
 0x309   : > { %v1543_v34 = vadd.f32 %v3475_v56, %v1533_v0 }
 0x30a   : > { %v1545_v1 = vpack.c.bf16 %v1542_v61, %v1541_v59  ;;  %v1534_v21 = vmul.f32 %v3474_v20, %v1524_v28 }
 0x30c   : > { %3606 = vmatprep.mubr.msk.bf16.mxu0 %vm1177_vm0, %v1545_v1  ;;  %v1544_v3 = vadd.f32 %v3475_v56, %v1534_v21 }
 0x30e   : > { %v1546_v4 = vpack.c.bf16 %v1544_v3, %v1543_v34 }
 0x310   : > { %3607 = vmatmul.mubr.msk.bf16.vlgmr.msra.gmra.mxu0 %vm1177_vm0, %v1546_v4 }
 0x311   : > { %3618 = vmatprep.mubr.msk.bf16.mxu0 %vm4658_vm1, %v4657_v31 }
 0x330   : > { %v3592_v47 = vpop.f32.mrf.mxu1 }
 0x331   : > { %v1320_v18 = vadd.f32 %v3592_v47, %v3462_v15 }
 0x332   : > { %v1311_v50 = vpop.f32.mrf.mxu1 }
 0x333   : > { %v1312_v22 = vadd.f32 %v3462_v15, %v1311_v50 }
 0x334   : > { %v3593_v5 = vpop.f32.mrf.mxu1 }
 0x335   : > { %v1323_v16 = vadd.f32 %v3593_v5, %v3462_v15 }
 0x336   : > { %v1314_v6 = vpop.f32.mrf.mxu1 }
 0x337   : > { %v1315_v19 = vadd.f32 %v3462_v15, %v1314_v6  ;;  %v5262_v23 = vpack.c.bf16 %v1323_v16, %v1320_v18 }
 0x338   : > { %v3600_v7 = vpop.f32.mrf.mxu1 }
 0x339   : > { %v1467_v9 = vadd.f32 %v3600_v7, %v3469_v8  ;;  %v5264_v24 = vpack.c.bf16 %v1315_v19, %v1312_v22 }
 0x33a   : > { %v1458_v63 = vpop.f32.mrf.mxu1 }
 0x33b   : > { %v1459_v12 = vadd.f32 %v3469_v8, %v1458_v63 }
 0x33c   : > { %v3601_v62 = vpop.f32.mrf.mxu1 }
 0x33d   : > { %v1470_v10 = vadd.f32 %v3601_v62, %v3469_v8 }
 0x33e   : > { %v1461_v11 = vpop.f32.mrf.mxu1 }
 0x33f   : > { %v5252_v29 = vpack.c.bf16 %v1470_v10, %v1467_v9  ;;  %v1462_v13 = vadd.f32 %v3469_v8, %v1461_v11 }
 0x341   : > { %v5254_v14 = vpack.c.bf16 %v1462_v13, %v1459_v12  ;;  %v1678_v38 = vsel %vm1626_vm2, %v5252_v29, 0 }
 0x342   : > { %3617 = vmatpush3.bf16.xpose.msra.mxu0 %v1678_v38 }
 0x343   : > { %v1631_v17 = vsel %vm1626_vm2, %v5254_v14, 0  ;;  %3628 = vmatprep.subr.bf16.mxu0 %v4657_v31 }
 0x344   : > { %3611 = vmatpush3.bf16.xpose.msra.mxu1 %v1631_v17 }
 0x345   : > { %3622 = vmatprep.subr.bf16.mxu1 %v4657_v31 }
 0x349   : > { %3619 = vmatmul.mubr.msk.bf16.vlgmr.msra.gmra.mxu0 %vm1626_vm2, %v5262_v23 }
 0x34a   : > { %3630 = vmatprep.mubr.msk.bf16.mxu0 %vm4658_vm1, %v4657_v31 }
 0x34b   : > { %3613 = vmatmul.mubr.msk.bf16.vlgmr.msra.gmra.mxu1 %vm1626_vm2, %v5264_v24 }
 0x34c   : > { %3624 = vmatprep.mubr.msk.bf16.mxu1 %vm4658_vm1, %v4657_v31 }
 0x3d0   : > { %v3608_v39 = vpop.f32.mrf.mxu0 }
 0x3d1   : > { %v1614_v27 = vadd.f32 %v3608_v39, %v3476_v48 }
 0x3d2   : > { %v1605_v25 = vpop.f32.mrf.mxu0 }
 0x3d3   : > { %v1606_v2 = vadd.f32 %v3476_v48, %v1605_v25 }
 0x3d4   : > { %v3609_v26 = vpop.f32.mrf.mxu0 }
 0x3d5   : > { %v1617_v30 = vadd.f32 %v3609_v26, %v3476_v48 }
 0x3d6   : > { %v1608_v49 = vpop.f32.mrf.mxu0 }
 0x3d7   : > { %v5274_v32 = vpack.c.bf16 %v1617_v30, %v1614_v27  ;;  %v1609_v33 = vadd.f32 %v3476_v48, %v1608_v49 }
 0x3d9   : > { %v5276_v35 = vpack.c.bf16 %v1609_v33, %v1606_v2  ;;  %3629 = vmatpush3.bf16.msra.mxu0 %v5274_v32 }
 0x3da   : > { %3640 = vmatprep.subr.bf16.mxu0 %v4657_v31 }
 0x3db   : > { %3623 = vmatpush3.bf16.msra.mxu1 %v5276_v35 }
 0x3dc   : > { %3634 = vmatprep.subr.bf16.mxu1 %v4657_v31 }
 0x409   : > { %v1714_v36 = vpop.f32.mrf.mxu0 }
 0x40a   : > { %v1728_v46 = vsel %vm1721_vm3, %v1714_v36, -inf }
 0x40b   : > { %v1667_v37 = vpop.f32.mrf.mxu1  ;;  %v3620_v40 = vpop.f32.mrf.mxu0 }
 0x40c   : > { %v1722_v41 = vsel %vm1721_vm3, %v1667_v37, -inf }
 0x40d   : > { %v1717_v42 = vpop.f32.mrf.mxu0  ;;  %1723 = vmax.xlane.f32.xlu0 %v1722_v41  ;;  %v3614_v43 = vpop.f32.mrf.mxu1 }
 0x40e   : > { %v1731_v52 = vsel %vm1721_vm3, %v1717_v42, -inf }
 0x40f   : > { %v1670_v44 = vpop.f32.mrf.mxu1  ;;  %v3621_v45 = vpop.f32.mrf.mxu0 }
 0x410   : > { %v1725_v51 = vsel %vm1721_vm3, %v1670_v44, -inf }
 0x411   : > { %1729 = vmax.xlane.f32.xlu0 %v1728_v46  ;;  %1726 = vmax.xlane.f32.xlu1 %v1725_v51  ;;  %v3615_v20 = vpop.f32.mrf.mxu1 }
 0x415   : > { %1732 = vmax.xlane.f32.xlu1 %v1731_v52 }
 0x426   : > { %1923 = vrot.lane.b32.xlu1 %v5252_v29, %s4659_s22 }
 0x496   : > { %v1724_v53 = vpop.xlane.xlu0 %1723 }
 0x49a   : > { %v1730_v54 = vpop.xlane.xlu0 %1729  ;;  %v1727_v55 = vpop.xlane.xlu1 %1726 }
 0x49b   : > { %v1734_v56 = vmax.f32 %v1724_v53, %v1730_v54 }
 0x49d   : > { %v1736_v57 = vsub.f32 %v1667_v37, %v1734_v56  ;;  %v1738_v58 = vsub.f32 %v1714_v36, %v1734_v56 }
 0x49e   : > { %v1733_v60 = vpop.xlane.xlu1 %1732 }
 0x49f   : > { %v1740_v59 = vmul.f32 1.442695, %v1736_v57  ;;  %v1744_v61 = vmul.f32 1.442695, %v1738_v58  ;;  %v1735_v28 = vmax.f32 %v1727_v55, %v1733_v60 }
 0x4a1   : > { %4010 = vpow2.f32 %v1740_v59  ;;  %v1737_v0 = vsub.f32 %v1670_v44, %v1735_v28  ;;  %v1739_v1 = vsub.f32 %v1717_v42, %v1735_v28 }
 0x4a2   : > { %4012 = vpow2.f32 %v1744_v61  ;;  %v1924_v63 = vpop.permute.xlu1 %1923 }
 0x4a3   : > { %v1742_v21 = vmul.f32 1.442695, %v1737_v0  ;;  %v1746_v34 = vmul.f32 1.442695, %v1739_v1  ;;  %v1929_v25 = vsel %vm1626_vm2, %v1924_v63, 0 }
 0x4a5   : > { %4014 = vpow2.f32 %v1742_v21 }
 0x4a6   : > { %4016 = vpow2.f32 %v1746_v34 }
 0x4ae   : > { %v4011_v3 = vpop.eup %4010 }
 0x4af   : > { %v1748_v4 = vsel %vm1721_vm3, %v4011_v3, 0.0  ;;  %v4013_v47 = vpop.eup %4012 }
 0x4b0   : > { %1749 = vadd.xlane.f32.xlu0 %v1748_v4  ;;  %v1754_v5 = vsel %vm1721_vm3, %v4013_v47, 0.0 }
 0x4b2   : > { %v4015_v50 = vpop.eup %4014 }
 0x4b3   : > { %v1751_v6 = vsel %vm1721_vm3, %v4015_v50, 0.0  ;;  %v4017_v7 = vpop.eup %4016 }
 0x4b4   : > { %1755 = vadd.xlane.f32.xlu0 %v1754_v5  ;;  %1752 = vadd.xlane.f32.xlu1 %v1751_v6  ;;  %v1757_v8 = vsel %vm1721_vm3, %v4017_v7, 0.0 }
 0x4b8   : > { %1758 = vadd.xlane.f32.xlu1 %v1757_v8 }
 0x4c9   : > { %1867 = vrot.lane.b32.xlu1 %v5264_v24, %s4659_s22 }
 0x4ca   : > { %1870 = vrot.lane.b32.xlu0 %v5254_v14, %s4659_s22 }
 0x4cd   : > { %1920 = vrot.lane.b32.xlu1 %v5262_v23, %s4659_s22 }
 0x539   : > { %v1750_v62 = vpop.xlane.xlu0 %1749 }
 0x53d   : > { %v1756_v9 = vpop.xlane.xlu0 %1755  ;;  %v1753_v10 = vpop.xlane.xlu1 %1752 }
 0x53e   : > { %v1760_v11 = vadd.f32 %v1756_v9, %v1750_v62 }
 0x540   : > { %4018 = vrcp.f32 %v1760_v11 }
 0x541   : > { %v1759_v12 = vpop.xlane.xlu1 %1758  ;;  %v1871_v22 = vpop.permute.xlu0 %1870 }
 0x542   : > { %v1761_v13 = vadd.f32 %v1759_v12, %v1753_v10  ;;  %v1876_v26 = vsel %vm1626_vm2, %v1871_v22, 0 }
 0x544   : > { %4020 = vrcp.f32 %v1761_v13 }
 0x545   : > { %v1868_v27 = vpop.permute.xlu1 %1867 }
 0x549   : > { %v1921_v30 = vpop.permute.xlu1 %1920 }
 0x54d   : > { %v4019_v38 = vpop.eup %4018 }
 0x54e   : > { %v1764_v16 = vmul.f32 %v4019_v38, %v4011_v3  ;;  %v1766_v18 = vmul.f32 %v4019_v38, %v4013_v47 }
 0x551   : > { %v4021_v15 = vpop.eup %4020 }
 0x552   : > { %v1765_v17 = vmul.f32 %v4021_v15, %v4015_v50  ;;  %v1767_v19 = vmul.f32 %v4021_v15, %v4017_v7 }
 0x554   : > { %v1768_v39 = vpack.c.bf16 %v1765_v17, %v1764_v16  ;;  %v1769_v48 = vpack.c.bf16 %v1767_v19, %v1766_v18 }
 0x556   : > { %3625 = vmatmul.mubr.msk.bf16.vlgmr.msra.gmra.mxu1 %vm1721_vm3, %v1768_v39  ;;  %3631 = vmatmul.mubr.msk.bf16.vlgmr.msra.gmra.mxu0 %vm1721_vm3, %v1769_v48 }
 0x557   : > { %3635 = vmatpush3.bf16.xpose.msra.mxu1 %v1876_v26  ;;  %3641 = vmatpush3.bf16.xpose.msra.mxu0 %v1929_v25 }
 0x558   : > { %3636 = vmatprep.mubr.msk.bf16.mxu1 %vm4658_vm1, %v4657_v31  ;;  %3642 = vmatprep.mubr.msk.bf16.mxu0 %vm4658_vm1, %v4657_v31 }
 0x559   : > { %3646 = vmatprep.subr.bf16.mxu1 %v4657_v31  ;;  %3652 = vmatprep.subr.bf16.mxu0 %v4657_v31 }
 0x55e   : > { %3637 = vmatmul.mubr.msk.bf16.vlgmr.msra.gmra.mxu1 %vm1626_vm2, %v1868_v27  ;;  %3643 = vmatmul.mubr.msk.bf16.vlgmr.msra.gmra.mxu0 %vm1626_vm2, %v1921_v30 }
 0x55f   : > { %3648 = vmatprep.mubr.msk.bf16.mxu1 %vm4658_vm1, %v4657_v31  ;;  %3654 = vmatprep.mubr.msk.bf16.mxu0 %vm4658_vm1, %v4657_v31 }
 0x616   : > { %v1807_v49 = vpop.f32.mrf.mxu1  ;;  %v1851_v2 = vpop.f32.mrf.mxu0 }
 0x617   : > { %v1858_v33 = vsel %vm1626_vm2, %v1807_v49, 0.0  ;;  %v1859_v36 = vsel %vm1626_vm2, %v1851_v2, 0.0 }
 0x618   : > { %v5316_v37 = vadd.f32 %v1859_v36, %v1858_v33  ;;  %v3626_v40 = vpop.f32.mrf.mxu1  ;;  %v3632_v41 = vpop.f32.mrf.mxu0  ;;  %v1865_v33 = vld [vmem:[#allocation23] sm:$0xf] }
 0x61a   : > { %v1810_v42 = vpop.f32.mrf.mxu1  ;;  %v1854_v43 = vpop.f32.mrf.mxu0 }
 0x61b   : > { %v1861_v44 = vsel %vm1626_vm2, %v1810_v42, 0.0  ;;  %v1862_v45 = vsel %vm1626_vm2, %v1854_v43, 0.0 }
 0x61c   : > { %v5320_v46 = vadd.f32 %v1862_v45, %v1861_v44  ;;  %v3627_v51 = vpop.f32.mrf.mxu1  ;;  %v3633_v20 = vpop.f32.mrf.mxu0  ;;  %v2177_v45 = vsel %vm2128_vm4, %v1865_v33, 0 }
 0x61e   : > { %v1864_v52 = vpack.c.bf16 %v5320_v46, %v5316_v37  ;;  %v1912_v53 = vpop.f32.mrf.mxu1  ;;  %v1965_v54 = vpop.f32.mrf.mxu0 }
 0x61f   : > { %v1972_v55 = vsel %vm1721_vm3, %v1912_v53, -inf  ;;  %v1978_v59 = vsel %vm1721_vm3, %v1965_v54, -inf }
 0x620   : > { %v3644_v56 = vpop.f32.mrf.mxu0  ;;  %1973 = vmax.xlane.f32.xlu0 %v1972_v55  ;;  %v3638_v57 = vpop.f32.mrf.mxu1  ;;  %v2124_v55 = vld [vmem:[#allocation23 + $0x4] sm:$0xf] }
 0x621   : > { %v2130_v56 = vsel %vm2128_vm4, %v2124_v55, 0 }
 0x622   : > { %v1915_v58 = vpop.f32.mrf.mxu1  ;;  %v1968_v60 = vpop.f32.mrf.mxu0 }
 0x623   : > { %v1975_v61 = vsel %vm1721_vm3, %v1915_v58, -inf  ;;  %v1981_v1 = vsel %vm1721_vm3, %v1968_v60, -inf }
 0x624   : > { %v3645_v28 = vpop.f32.mrf.mxu0  ;;  %1979 = vmax.xlane.f32.xlu0 %v1978_v59  ;;  %1976 = vmax.xlane.f32.xlu1 %v1975_v61  ;;  %v3639_v0 = vpop.f32.mrf.mxu1 }
 0x628   : > { %1982 = vmax.xlane.f32.xlu0 %v1981_v1 }
 0x6a9   : > { %v1974_v21 = vpop.xlane.xlu0 %1973 }
 0x6ad   : > { %v1980_v34 = vpop.xlane.xlu0 %1979  ;;  %v1977_v50 = vpop.xlane.xlu1 %1976 }
 0x6ae   : > { %v1984_v3 = vmax.f32 %v1974_v21, %v1980_v34 }
 0x6b0   : > { %v1986_v4 = vsub.f32 %v1912_v53, %v1984_v3  ;;  %v1988_v47 = vsub.f32 %v1965_v54, %v1984_v3 }
 0x6b1   : > { %v1983_v5 = vpop.xlane.xlu0 %1982 }
 0x6b2   : > { %v1990_v6 = vmul.f32 1.442695, %v1986_v4  ;;  %v1994_v7 = vmul.f32 1.442695, %v1988_v47  ;;  %v1985_v8 = vmax.f32 %v1977_v50, %v1983_v5 }
 0x6b4   : > { %4022 = vpow2.f32 %v1990_v6  ;;  %v1987_v63 = vsub.f32 %v1915_v58, %v1985_v8  ;;  %v1989_v62 = vsub.f32 %v1968_v60, %v1985_v8 }
 0x6b5   : > { %4024 = vpow2.f32 %v1994_v7 }
 0x6b6   : > { %v1992_v9 = vmul.f32 1.442695, %v1987_v63  ;;  %v1996_v10 = vmul.f32 1.442695, %v1989_v62 }
 0x6b8   : > { %4026 = vpow2.f32 %v1992_v9 }
 0x6b9   : > { %4028 = vpow2.f32 %v1996_v10 }
 0x6c1   : > { %v4023_v11 = vpop.eup %4022 }
 0x6c2   : > { %v1998_v12 = vsel %vm1721_vm3, %v4023_v11, 0.0  ;;  %v4025_v13 = vpop.eup %4024 }
 0x6c3   : > { %1999 = vadd.xlane.f32.xlu0 %v1998_v12  ;;  %v2004_v15 = vsel %vm1721_vm3, %v4025_v13, 0.0 }
 0x6c5   : > { %v4027_v38 = vpop.eup %4026 }
 0x6c6   : > { %v2001_v16 = vsel %vm1721_vm3, %v4027_v38, 0.0  ;;  %v4029_v17 = vpop.eup %4028 }
 0x6c7   : > { %2005 = vadd.xlane.f32.xlu0 %v2004_v15  ;;  %2002 = vadd.xlane.f32.xlu1 %v2001_v16  ;;  %v2007_v18 = vsel %vm1721_vm3, %v4029_v17, 0.0 }
 0x6cb   : > { %2008 = vadd.xlane.f32.xlu1 %v2007_v18 }
 0x6dc   : > { %2069 = vrot.lane.b32.xlu1 %v5274_v32, %s4659_s22 }
 0x6dd   : > { %2021 = vrot.lane.b32.xlu0 %v5276_v35, %s4659_s22  ;;  %s4662_s22 = smov [#allocation29]  }
 0x6e0   : > { %2222 = vrot.lane.b32.xlu1 %v5254_v14, %s4660_s16 }
 0x6e1   : > { %2220 = vrot.lane.b32.xlu0 %v5264_v24, %s4660_s16 }
 0x6e4   : > { %2273 = vrot.lane.b32.xlu1 %v5252_v29, %s4660_s16 }
 0x6e8   : > { %2271 = vrot.lane.b32.xlu1 %v5262_v23, %s4660_s16 }
 0x74c   : > { %v2000_v19 = vpop.xlane.xlu0 %1999 }
 0x750   : > { %v2006_v22 = vpop.xlane.xlu0 %2005  ;;  %v2003_v39 = vpop.xlane.xlu1 %2002 }
 0x751   : > { %v2010_v48 = vadd.f32 %v2006_v22, %v2000_v19 }
 0x753   : > { %4030 = vrcp.f32 %v2010_v48 }
 0x754   : > { %v2022_v25 = vpop.permute.xlu0 %2021  ;;  %v2009_v26 = vpop.xlane.xlu1 %2008 }
 0x755   : > { %v2011_v27 = vadd.f32 %v2009_v26, %v2003_v39  ;;  %3647 = vmatpush3.bf16.msra.mxu1 %v2022_v25 }
 0x756   : > { %3658 = vmatprep.subr.bf16.mxu1 %v4657_v31 }
 0x757   : > { %4032 = vrcp.f32 %v2011_v27 }
 0x758   : > { %v2070_v30 = vpop.permute.xlu1 %2069  ;;  %v2221_v63 = vpop.permute.xlu0 %2220 }
 0x759   : > { %3653 = vmatpush3.bf16.msra.mxu0 %v2070_v30 }
 0x75a   : > { %3664 = vmatprep.subr.bf16.mxu0 %v4657_v31 }
 0x75c   : > { %v2223_v51 = vpop.permute.xlu1 %2222 }
 0x75d   : > { %v2228_v50 = vsel %vm1626_vm2, %v2223_v51, 0 }
 0x760   : > { %v4031_v49 = vpop.eup %4030  ;;  %v2274_v20 = vpop.permute.xlu1 %2273 }
 0x761   : > { %v2014_v36 = vmul.f32 %v4031_v49, %v4023_v11  ;;  %v2016_v41 = vmul.f32 %v4031_v49, %v4025_v13  ;;  %v2279_v53 = vsel %vm1626_vm2, %v2274_v20, 0 }
 0x764   : > { %v4033_v2 = vpop.eup %4032  ;;  %v2272_v54 = vpop.permute.xlu1 %2271 }
 0x765   : > { %v2015_v40 = vmul.f32 %v4033_v2, %v4027_v38  ;;  %v2017_v42 = vmul.f32 %v4033_v2, %v4029_v17 }
 0x767   : > { %v2018_v43 = vpack.c.bf16 %v2015_v40, %v2014_v36  ;;  %v2019_v44 = vpack.c.bf16 %v2017_v42, %v2016_v41 }
 0x769   : > { %3649 = vmatmul.mubr.msk.bf16.vlgmr.msra.gmra.mxu1 %vm1721_vm3, %v2018_v43  ;;  %3655 = vmatmul.mubr.msk.bf16.vlgmr.msra.gmra.mxu0 %vm1721_vm3, %v2019_v44 }
 0x76a   : > { %3665 = vmatpush3.bf16.msra.mxu0 %v2177_v45  ;;  %3666 = vmatprep.mubr.msk.bf16.mxu0 %vm4658_vm1, %v4657_v31 }
 0x76b   : > { %3676 = vmatprep.subr.bf16.mxu0 %v4657_v31  ;;  %3660 = vmatprep.mubr.msk.bf16.mxu1 %vm4658_vm1, %v4657_v31 }
 0x76c   : > { %3659 = vmatpush3.bf16.msra.mxu1 %v2130_v56 }
 0x76d   : > { %3670 = vmatprep.subr.bf16.mxu1 %v4657_v31 }
 0x771   : > { %3667 = vmatmul.mubr.msk.bf16.vlgmr.msra.gmra.mxu0 %vm1626_vm2, %v1864_v52 }
 0x772   : > { %3677 = vmatpush3.bf16.xpose.msra.mxu0 %v2279_v53  ;;  %3678 = vmatprep.mubr.msk.bf16.mxu0 %vm4658_vm1, %v4657_v31 }
 0x773   : > { %3688 = vmatprep.subr.bf16.mxu0 %v4657_v31 }
 0x779   : > { %3679 = vmatmul.mubr.msk.bf16.vlgmr.msra.gmra.mxu0 %vm1626_vm2, %v2272_v54 }
 0x77a   : > { %3690 = vmatprep.mubr.msk.bf16.mxu0 %vm4658_vm1, %v4657_v31 }
 0x829   : > { %v2061_v37 = vpop.f32.mrf.mxu1  ;;  %v2109_v46 = vpop.f32.mrf.mxu0 }
 0x82a   : > { %v2116_v58 = vsel %vm1626_vm2, %v2061_v37, 0.0  ;;  %v2117_v60 = vsel %vm1626_vm2, %v2109_v46, 0.0 }
 0x82b   : > { %v3650_v52 = vpop.f32.mrf.mxu1  ;;  %v3656_v57 = vpop.f32.mrf.mxu0  ;;  %v2118_v1 = vadd.f32 %v2117_v60, %v2116_v58 }
 0x82d   : > { %v2064_v59 = vpop.f32.mrf.mxu1  ;;  %v2112_v61 = vpop.f32.mrf.mxu0 }
 0x82e   : > { %v2119_v28 = vsel %vm1626_vm2, %v2064_v59, 0.0  ;;  %v2120_v0 = vsel %vm1626_vm2, %v2112_v61, 0.0 }
 0x82f   : > { %v2121_v21 = vadd.f32 %v2120_v0, %v2119_v28  ;;  %v3651_v34 = vpop.f32.mrf.mxu1  ;;  %v3657_v3 = vpop.f32.mrf.mxu0 }
 0x831   : > { %v2122_v4 = vpack.c.bf16 %v2121_v21, %v2118_v1  ;;  %v5371_v47 = vpop.f32.mrf.mxu0 }
 0x833   : > { %3661 = vmatmul.mubr.msk.bf16.vlgmr.msra.gmra.mxu1 %vm1626_vm2, %v2122_v4  ;;  %v3668_v5 = vpop.f32.mrf.mxu0 }
 0x834   : > { %3671 = vmatpush3.bf16.xpose.msra.mxu1 %v2228_v50  ;;  %3672 = vmatprep.mubr.msk.bf16.mxu1 %vm4658_vm1, %v4657_v31 }
 0x835   : > { %v5377_v6 = vpop.f32.mrf.mxu0  ;;  %3682 = vmatprep.subr.bf16.mxu1 %v4657_v31 }
 0x837   : > { %v3669_v7 = vpop.f32.mrf.mxu0 }
 0x838   : > { %v2472_v7 = vld [vmem:[#allocation23 + $0x8] sm:$0xf] }
 0x839   : > { %v2315_v8 = vpop.f32.mrf.mxu0 }
 0x83a   : > { %v2328_v19 = vsel %vm1721_vm3, %v2315_v8, -inf }
 0x83b   : > { %3673 = vmatmul.mubr.msk.bf16.vlgmr.msra.gmra.mxu1 %vm1626_vm2, %v2221_v63  ;;  %v3680_v62 = vpop.f32.mrf.mxu0 }
 0x83c   : > { %3684 = vmatprep.mubr.msk.bf16.mxu1 %vm4658_vm1, %v4657_v31 }
 0x83d   : > { %v2318_v9 = vpop.f32.mrf.mxu0 }
 0x83e   : > { %v2331_v48 = vsel %vm1721_vm3, %v2318_v9, -inf }
 0x83f   : > { %v3681_v10 = vpop.f32.mrf.mxu0 }
 0x8f3   : > { %v5383_v11 = vpop.f32.mrf.mxu1 }
 0x8f5   : > { %v3662_v12 = vpop.f32.mrf.mxu1 }
 0x8f7   : > { %v5385_v13 = vpop.f32.mrf.mxu1 }
 0x8f9   : > { %v3663_v38 = vpop.f32.mrf.mxu1 }
 0x8fb   : > { %v2264_v15 = vpop.f32.mrf.mxu1 }
 0x8fc   : > { %v2322_v16 = vsel %vm1721_vm3, %v2264_v15, -inf }
 0x8fd   : > { %2323 = vmax.xlane.f32.xlu0 %v2322_v16  ;;  %v3674_v17 = vpop.f32.mrf.mxu1 }
 0x8ff   : > { %v2267_v18 = vpop.f32.mrf.mxu1 }
 0x900   : > { %v2325_v22 = vsel %vm1721_vm3, %v2267_v18, -inf }
 0x901   : > { %2329 = vmax.xlane.f32.xlu0 %v2328_v19  ;;  %2326 = vmax.xlane.f32.xlu1 %v2325_v22  ;;  %v3675_v39 = vpop.f32.mrf.mxu1 }
 0x905   : > { %2332 = vmax.xlane.f32.xlu0 %v2331_v48 }
 0x986   : > { %v2324_v25 = vpop.xlane.xlu0 %2323 }
 0x98a   : > { %v2330_v26 = vpop.xlane.xlu0 %2329  ;;  %v2327_v2 = vpop.xlane.xlu1 %2326 }
 0x98b   : > { %v2334_v27 = vmax.f32 %v2324_v25, %v2330_v26 }
 0x98d   : > { %v2336_v30 = vsub.f32 %v2264_v15, %v2334_v27  ;;  %v2338_v49 = vsub.f32 %v2315_v8, %v2334_v27  ;;  %v2477_v8 = vsel %vm2128_vm4, %v2472_v7, 0 }
 0x98e   : > { %v2333_v33 = vpop.xlane.xlu0 %2332 }
 0x98f   : > { %v2340_v36 = vmul.f32 1.442695, %v2336_v30  ;;  %v2344_v40 = vmul.f32 1.442695, %v2338_v49  ;;  %v2335_v41 = vmax.f32 %v2327_v2, %v2333_v33 }
 0x991   : > { %4034 = vpow2.f32 %v2340_v36  ;;  %v2337_v42 = vsub.f32 %v2267_v18, %v2335_v41  ;;  %v2339_v43 = vsub.f32 %v2318_v9, %v2335_v41 }
 0x992   : > { %4036 = vpow2.f32 %v2344_v40 }
 0x993   : > { %v2342_v44 = vmul.f32 1.442695, %v2337_v42  ;;  %v2346_v45 = vmul.f32 1.442695, %v2339_v43  ;;  %v2214_v42 = vadd.f32 %v5371_v47, %v5383_v11 }
 0x995   : > { %4038 = vpow2.f32 %v2342_v44 }
 0x996   : > { %4040 = vpow2.f32 %v2346_v45 }
 0x99e   : > { %v4035_v51 = vpop.eup %4034 }
 0x99f   : > { %v2348_v20 = vsel %vm1721_vm3, %v4035_v51, 0.0  ;;  %v4037_v53 = vpop.eup %4036 }
 0x9a0   : > { %2349 = vadd.xlane.f32.xlu0 %v2348_v20  ;;  %v2354_v55 = vsel %vm1721_vm3, %v4037_v53, 0.0 }
 0x9a2   : > { %v4039_v54 = vpop.eup %4038 }
 0x9a3   : > { %v2351_v56 = vsel %vm1721_vm3, %v4039_v54, 0.0  ;;  %v4041_v37 = vpop.eup %4040 }
 0x9a4   : > { %2355 = vadd.xlane.f32.xlu0 %v2354_v55  ;;  %2352 = vadd.xlane.f32.xlu1 %v2351_v56  ;;  %v2357_v46 = vsel %vm1721_vm3, %v4041_v37, 0.0 }
 0x9a8   : > { %2358 = vadd.xlane.f32.xlu1 %v2357_v46 }
 0x9b9   : > { %2417 = vrot.lane.b32.xlu1 %v5274_v32, %s4660_s16 }
 0x9ba   : > { %2370 = vrot.lane.b32.xlu0 %v5276_v35, %s4660_s16  ;;  %s5716_s16 = sld [smem:[#allocation64_spill]] }
 0x9bd   : > { %2524 = vrot.lane.b32.xlu1 %v5254_v14, %s4661_s10 }
 0x9be   : > { %2522 = vrot.lane.b32.xlu0 %v5264_v24, %s4661_s10 }
 0x9c1   : > { %2575 = vrot.lane.b32.xlu1 %v5252_v29, %s4661_s10 }
 0x9c5   : > { %2573 = vrot.lane.b32.xlu1 %v5262_v23, %s4661_s10 }
 0xa29   : > { %v2350_v52 = vpop.xlane.xlu0 %2349 }
 0xa2d   : > { %v2356_v57 = vpop.xlane.xlu0 %2355  ;;  %v2353_v58 = vpop.xlane.xlu1 %2352 }
 0xa2e   : > { %v2360_v60 = vadd.f32 %v2356_v57, %v2350_v52 }
 0xa30   : > { %4042 = vrcp.f32 %v2360_v60 }
 0xa31   : > { %v2371_v59 = vpop.permute.xlu0 %2370  ;;  %v2359_v61 = vpop.xlane.xlu1 %2358 }
 0xa32   : > { %v2361_v28 = vadd.f32 %v2359_v61, %v2353_v58  ;;  %3683 = vmatpush3.bf16.msra.mxu1 %v2371_v59 }
 0xa33   : > { %3694 = vmatprep.subr.bf16.mxu1 %v4657_v31 }
 0xa34   : > { %4044 = vrcp.f32 %v2361_v28 }
 0xa35   : > { %v2418_v14 = vpop.permute.xlu1 %2417  ;;  %v2523_v5 = vpop.permute.xlu0 %2522 }
 0xa36   : > { %3689 = vmatpush3.bf16.msra.mxu0 %v2418_v14 }
 0xa37   : > { %3700 = vmatprep.subr.bf16.mxu0 %v4657_v31 }
 0xa39   : > { %v2525_v34 = vpop.permute.xlu1 %2524 }
 0xa3a   : > { %v2530_v50 = vsel %vm1626_vm2, %v2525_v34, 0 }
 0xa3d   : > { %v4043_v29 = vpop.eup %4042  ;;  %v2576_v25 = vpop.permute.xlu1 %2575 }
 0xa3e   : > { %v2364_v0 = vmul.f32 %v4043_v29, %v4035_v51  ;;  %v2366_v1 = vmul.f32 %v4043_v29, %v4037_v53  ;;  %v2581_v49 = vsel %vm1626_vm2, %v2576_v25, 0  ;;  %v2217_v51 = vadd.f32 %v5377_v6, %v5385_v13 }
 0xa41   : > { %v4045_v24 = vpop.eup %4044  ;;  %v2574_v41 = vpop.permute.xlu1 %2573 }
 0xa42   : > { %v2365_v23 = vmul.f32 %v4045_v24, %v4039_v54  ;;  %v2367_v21 = vmul.f32 %v4045_v24, %v4041_v37 }
 0xa44   : > { %v2368_v3 = vpack.c.bf16 %v2365_v23, %v2364_v0  ;;  %v2369_v4 = vpack.c.bf16 %v2367_v21, %v2366_v1 }
 0xa46   : > { %3685 = vmatmul.mubr.msk.bf16.vlgmr.msra.gmra.mxu1 %vm1721_vm3, %v2368_v3  ;;  %3691 = vmatmul.mubr.msk.bf16.vlgmr.msra.gmra.mxu0 %vm1721_vm3, %v2369_v4 }
 0xa47   : > { %3701 = vmatpush3.bf16.xpose.msra.mxu0 %v2530_v50  ;;  %3702 = vmatprep.mubr.msk.bf16.mxu0 %vm4658_vm1, %v4657_v31 }
 0xa48   : > { %3696 = vmatprep.mubr.msk.bf16.mxu1 %vm4658_vm1, %v4657_v31  ;;  %3712 = vmatprep.subr.bf16.mxu0 %v4657_v31 }
 0xa49   : > { %3695 = vmatpush3.bf16.msra.mxu1 %v2477_v8 }
 0xa4a   : > { %3706 = vmatprep.subr.bf16.mxu1 %v4657_v31 }
 0xa4e   : > { %3703 = vmatmul.mubr.msk.bf16.vlgmr.msra.gmra.mxu0 %vm1626_vm2, %v2523_v5 }
 0xa4f   : > { %3714 = vmatprep.mubr.msk.bf16.mxu0 %vm4658_vm1, %v4657_v31 }
 0xb06   : > { %v2410_v63 = vpop.f32.mrf.mxu1  ;;  %v2457_v62 = vpop.f32.mrf.mxu0 }
 0xb07   : > { %v2464_v12 = vsel %vm1626_vm2, %v2410_v63, 0.0  ;;  %v2465_v38 = vsel %vm1626_vm2, %v2457_v62, 0.0 }
 0xb08   : > { %v3686_v9 = vpop.f32.mrf.mxu1  ;;  %v3692_v10 = vpop.f32.mrf.mxu0  ;;  %v2466_v19 = vadd.f32 %v2465_v38, %v2464_v12 }
 0xb0a   : > { %v2413_v15 = vpop.f32.mrf.mxu1  ;;  %v2460_v16 = vpop.f32.mrf.mxu0 }
 0xb0b   : > { %v2467_v17 = vsel %vm1626_vm2, %v2413_v15, 0.0  ;;  %v2468_v18 = vsel %vm1626_vm2, %v2460_v16, 0.0 }
 0xb0c   : > { %v2469_v22 = vadd.f32 %v2468_v18, %v2467_v17  ;;  %v3687_v39 = vpop.f32.mrf.mxu1  ;;  %v3693_v48 = vpop.f32.mrf.mxu0 }
 0xb0d   : > { %v2774_v48 = vld [vmem:[#allocation23 + $0xc] sm:$0xf] }
 0xb0e   : > { %v2470_v26 = vpack.c.bf16 %v2469_v22, %v2466_v19  ;;  %v2566_v27 = vpop.f32.mrf.mxu0  ;;  %v2779_v25 = vsel %vm2128_vm4, %v2774_v48, 0  ;;  %v3984_v48 = vld [vmem:[%s5715_s29 + $0x8] sm:$0xff]  }
 0xb0f   : > { %v2624_v30 = vsel %vm1721_vm3, %v2566_v27, -inf }
 0xb10   : > { %2625 = vmax.xlane.f32.xlu0 %v2624_v30  ;;  %3697 = vmatmul.mubr.msk.bf16.vlgmr.msra.gmra.mxu1 %vm1626_vm2, %v2470_v26  ;;  %v3704_v2 = vpop.f32.mrf.mxu0 }
 0xb11   : > { %3707 = vmatpush3.bf16.xpose.msra.mxu1 %v2581_v49  ;;  %3708 = vmatprep.mubr.msk.bf16.mxu1 %vm4658_vm1, %v4657_v31 }
 0xb12   : > { %v2569_v33 = vpop.f32.mrf.mxu0  ;;  %3718 = vmatprep.subr.bf16.mxu1 %v4657_v31 }
 0xb13   : > { %v2627_v36 = vsel %vm1721_vm3, %v2569_v33, -inf }
 0xb14   : > { %2628 = vmax.xlane.f32.xlu1 %v2627_v36  ;;  %v3705_v40 = vpop.f32.mrf.mxu0 }
 0xb18   : > { %3709 = vmatmul.mubr.msk.bf16.vlgmr.msra.gmra.mxu1 %vm1626_vm2, %v2574_v41 }
 0xb19   : > { %3720 = vmatprep.mubr.msk.bf16.mxu1 %vm4658_vm1, %v4657_v31 }
 0xb99   : > { %v2626_v11 = vpop.xlane.xlu0 %2625 }
 0xb9d   : > { %v2629_v6 = vpop.xlane.xlu1 %2628 }
 0xbd0   : > { %v2513_v43 = vpop.f32.mrf.mxu1 }
 0xbd1   : > { %v5438_v44 = vadd.f32 %v2513_v43, %v2214_v42 }
 0xbd2   : > { %v3698_v45 = vpop.f32.mrf.mxu1 }
 0xbd4   : > { %v2516_v20 = vpop.f32.mrf.mxu1 }
 0xbd5   : > { %v5442_v53 = vadd.f32 %v2516_v20, %v2217_v51 }
 0xbd6   : > { %v3699_v54 = vpop.f32.mrf.mxu1 }
 0xbd8   : > { %v2617_v55 = vpop.f32.mrf.mxu1 }
 0xbd9   : > { %v2630_v56 = vsel %vm1721_vm3, %v2617_v55, -inf }
 0xbda   : > { %2631 = vmax.xlane.f32.xlu0 %v2630_v56  ;;  %v3710_v37 = vpop.f32.mrf.mxu1 }
 0xbdc   : > { %v2620_v46 = vpop.f32.mrf.mxu1 }
 0xbdd   : > { %v2633_v52 = vsel %vm1721_vm3, %v2620_v46, -inf }
 0xbde   : > { %2634 = vmax.xlane.f32.xlu0 %v2633_v52  ;;  %v3711_v47 = vpop.f32.mrf.mxu1  ;;  %v2832_v52 = vld [vmem:[%s1121_s1] sm:$0xff] }
 0xc63   : > { %v2632_v57 = vpop.xlane.xlu0 %2631 }
 0xc64   : > { %v2636_v58 = vmax.f32 %v2626_v11, %v2632_v57 }
 0xc66   : > { %v2638_v60 = vsub.f32 %v2566_v27, %v2636_v58  ;;  %v2640_v59 = vsub.f32 %v2617_v55, %v2636_v58  ;;  %v3501_v55 = vld [vmem:[#allocation25] ss:$0 sm:$0xff] }
 0xc67   : > { %v2635_v13 = vpop.xlane.xlu0 %2634 }
 0xc68   : > { %v2642_v61 = vmul.f32 1.442695, %v2638_v60  ;;  %v2646_v28 = vmul.f32 1.442695, %v2640_v59  ;;  %v2637_v14 = vmax.f32 %v2629_v6, %v2635_v13  ;;  %v2833_v59 = vld [vmem:[%s1121_s1 + $0x8] sm:$0xff]  ;;  %s3457_s1 = sshll.u32 %s5075_s14, 4 }
 0xc69   : > { %s1111_s21 = scalar_lea.vmem [#allocation29], %s3457_s1 }
 0xc6a   : > { %4046 = vpow2.f32 %v2642_v61  ;;  %v2639_v29 = vsub.f32 %v2569_v33, %v2637_v14  ;;  %v2641_v24 = vsub.f32 %v2620_v46, %v2637_v14  ;;  %s3131_s23 = sshll.u32 %s1111_s21, 4  ;;  %s5534_s23 = int_to_ptr.vmem [resolvable:$true] %s3131_s23 }
 0xc6b   : > { %4048 = vpow2.f32 %v2646_v28  ;;  %s4522_s28 = scalar_lea.vmem %s5534_s23, 256 }
 0xc6c   : > { %v2644_v0 = vmul.f32 1.442695, %v2639_v29  ;;  %v2648_v23 = vmul.f32 1.442695, %v2641_v24  ;;  %p4523_p8 = scmp.ne.s32.totalorder %s5534_s23, %s4522_s28 }
 0xc6e   : > { %4050 = vpow2.f32 %v2644_v0  ;;  %p4524_p11 = pnand %p4523_p8, %p5721_p12 }
 0xc6f   : > { %4052 = vpow2.f32 %v2648_v23 }
 0xc70   : > { %p4525_p9 = pneg %p4524_p11 }
 0xc77   : > { %v4047_v1 = vpop.eup %4046 }
 0xc78   : > { %v2650_v21 = vsel %vm1721_vm3, %v4047_v1, 0.0  ;;  %v4049_v34 = vpop.eup %4048 }
 0xc79   : > { %2651 = vadd.xlane.f32.xlu0 %v2650_v21  ;;  %v2656_v4 = vsel %vm1721_vm3, %v4049_v34, 0.0 }
 0xc7b   : > { %v4051_v3 = vpop.eup %4050 }
 0xc7c   : > { %v2653_v50 = vsel %vm1721_vm3, %v4051_v3, 0.0  ;;  %v4053_v5 = vpop.eup %4052 }
 0xc7d   : > { %2657 = vadd.xlane.f32.xlu0 %v2656_v4  ;;  %2654 = vadd.xlane.f32.xlu1 %v2653_v50  ;;  %v2659_v7 = vsel %vm1721_vm3, %v4053_v5, 0.0  ;;  %v3981_v4 = vld [vmem:[#allocation28] sm:$0xff]  }
 0xc81   : > { %2660 = vadd.xlane.f32.xlu1 %v2659_v7 }
 0xc92   : > { %2719 = vrot.lane.b32.xlu1 %v5274_v32, %s4661_s10 }
 0xc93   : > { %2672 = vrot.lane.b32.xlu0 %v5276_v35, %s4661_s10 }
 0xd02   : > { %v2652_v8 = vpop.xlane.xlu0 %2651 }
 0xd06   : > { %v2655_v63 = vpop.xlane.xlu1 %2654  ;;  %v2658_v62 = vpop.xlane.xlu0 %2657 }
 0xd07   : > { %v2662_v9 = vadd.f32 %v2658_v62, %v2652_v8 }
 0xd09   : > { %4054 = vrcp.f32 %v2662_v9 }
 0xd0a   : > { %v2661_v10 = vpop.xlane.xlu1 %2660  ;;  %v2673_v12 = vpop.permute.xlu0 %2672 }
 0xd0b   : > { %v2663_v38 = vadd.f32 %v2661_v10, %v2655_v63  ;;  %3713 = vmatpush3.bf16.msra.mxu0 %v2673_v12  ;;  %v3502_v12 = vld [vmem:[#allocation26] ss:$0 sm:$0xff] }
 0xd0c   : > { %3724 = vmatprep.subr.bf16.mxu0 %v4657_v31 }
 0xd0d   : > { %4056 = vrcp.f32 %v2663_v38 }
 0xd0e   : > { %v2720_v15 = vpop.permute.xlu1 %2719 }
 0xd0f   : > { %3719 = vmatpush3.bf16.msra.mxu1 %v2720_v15 }
 0xd10   : > { %3730 = vmatprep.subr.bf16.mxu1 %v4657_v31 }
 0xd16   : > { %v4055_v32 = vpop.eup %4054 }
 0xd17   : > { %v2666_v17 = vmul.f32 %v4055_v32, %v4047_v1  ;;  %v2668_v18 = vmul.f32 %v4055_v32, %v4049_v34 }
 0xd1a   : > { %v4057_v16 = vpop.eup %4056 }
 0xd1b   : > { %v2667_v35 = vmul.f32 %v4057_v16, %v4051_v3  ;;  %v2669_v19 = vmul.f32 %v4057_v16, %v4053_v5  ;;  %v3980_v3 = vld [vmem:[#allocation28 + $0x8] sm:$0xff]  }
 0xd1c   : > { %v3503_v16 = vld [vmem:[%s5602_s19] ss:$0 sm:$0xff] }
 0xd1d   : > { %v2670_v22 = vpack.c.bf16 %v2667_v35, %v2666_v17  ;;  %v2671_v39 = vpack.c.bf16 %v2669_v19, %v2668_v18 }
 0xd1f   : > { %3715 = vmatmul.mubr.msk.bf16.vlgmr.msra.gmra.mxu0 %vm1721_vm3, %v2670_v22  ;;  %3721 = vmatmul.mubr.msk.bf16.vlgmr.msra.gmra.mxu1 %vm1721_vm3, %v2671_v39  ;;  %v3982_v22 = vld [vmem:[%s5715_s29 + $0x18] sm:$0xff]   ;;  %v3983_v39 = vld [vmem:[%s5715_s29 + $0x10] sm:$0xff]  }
 0xd20   : > { %3726 = vmatprep.mubr.msk.bf16.mxu0 %vm4658_vm1, %v4657_v31  ;;  %3734 = vmatprep.mubr.msk.bf16.mxu1 %vm4658_vm1, %v4657_v31 }
 0xd21   : > { %3725 = vmatpush3.bf16.msra.mxu0 %v2779_v25  ;;  %3731 = vmatpush3.bf16.msra.mxu1 %v3980_v3  ;;  %v3985_v25 = vld [vmem:[%s5715_s29] sm:$0xff]  }
 0xd22   : > { %3738 = vmatprep.subr.bf16.mxu0 %v4657_v31  ;;  %3732 = vmatprep.subr.bf16.mxu1 %v4657_v31 }
 0xd25   : > { %3733 = vmatpush3.bf16.msra.mxu1 %v3981_v4 }
 0xddf   : > { %v2712_v26 = vpop.f32.mrf.mxu0  ;;  %v2759_v27 = vpop.f32.mrf.mxu1 }
 0xde0   : > { %v2766_v2 = vsel %vm1626_vm2, %v2712_v26, 0.0  ;;  %v2767_v33 = vsel %vm1626_vm2, %v2759_v27, 0.0  ;;  %v3504_v26 = vld [vmem:[%s5716_s16] ss:$0 sm:$0xff]  ;;  %s4526_s16 = sshll.u32 %s4662_s22, 4  ;;  %s4527_s16 = int_to_ptr.vmem [resolvable:$false] %s4526_s16 }
 0xde1   : > { %v3716_v30 = vpop.f32.mrf.mxu0  ;;  %v3722_v49 = vpop.f32.mrf.mxu1  ;;  %v2768_v43 = vadd.f32 %v2767_v33, %v2766_v2  ;;  %s4528_s10 = scalar_lea.vmem %s4527_s16, 512  ;;  %p4529_p1 = scmp.lt.s32.totalorder %s5534_s23, %s4527_s16 }
 0xde2   : > { %p4530_p4 = scmp.lt.s32.totalorder %s4528_s10, %s4522_s28 }
 0xde3   : > { %v2715_v36 = vpop.f32.mrf.mxu0  ;;  %v2762_v40 = vpop.f32.mrf.mxu1 }
 0xde4   : > { %v2769_v41 = vsel %vm1626_vm2, %v2715_v36, 0.0  ;;  %v2770_v42 = vsel %vm1626_vm2, %v2762_v40, 0.0  ;;  %p4531_p13 = por %p4530_p4, %p4529_p1 }
 0xde5   : > { %v2771_v45 = vadd.f32 %v2770_v42, %v2769_v41  ;;  %v3717_v51 = vpop.f32.mrf.mxu0  ;;  %v3723_v20 = vpop.f32.mrf.mxu1 }
 0xde6   : > { %p4532_p5 = pnand %p4531_p13, %p4525_p9 }
 0xde7   : > { %v2772_v54 = vpack.c.bf16 %v2771_v45, %v2768_v43 }
 0xde9   : > { %3727 = vmatmul.mubr.msk.bf16.vlgmr.msra.gmra.mxu0 %vm1626_vm2, %v2772_v54 }
 0xdea   : > { %3746 = vmatprep.mubr.msk.bf16.mxu0 %vm4658_vm1, %v4657_v31  ;;  %3739 = vmatpush3.bf16.msra.mxu0 %v3982_v22  ;;  %v3508_v22 = vld [vmem:[%s5717_s17] ss:$0 sm:$0xff] }
 0xdeb   : > { %3740 = vmatprep.subr.bf16.mxu0 %v4657_v31 }
 0xdee   : > { %3741 = vmatpush3.bf16.msra.mxu0 %v3983_v39 }
 0xdef   : > { %3742 = vmatprep.subr.bf16.mxu0 %v4657_v31 }
 0xdf2   : > { %3743 = vmatpush3.bf16.msra.mxu0 %v3984_v48 }
 0xdf3   : > { %3744 = vmatprep.subr.bf16.mxu0 %v4657_v31 }
 0xdf6   : > { %3745 = vmatpush3.bf16.msra.mxu0 %v3985_v25 }
 0xea9   : > { %v2815_v56 = vpop.f32.mrf.mxu0 }
 0xeaa   : > { %v2822_v37 = vadd.f32 %v2815_v56, %v5438_v44 }
 0xeab   : > { %v3728_v46 = vpop.f32.mrf.mxu0 }
 0xeac   : > { %v2830_v47 = vadd.f32 %v3501_v55, %v2822_v37 }
 0xead   : > { %v2818_v11 = vpop.f32.mrf.mxu0 }
 0xeae   : > { %v2823_v57 = vadd.f32 %v2818_v11, %v5442_v53  ;;  %v2834_v58 = vadd.f32 %v2832_v52, %v2830_v47 }
 0xeaf   : > { %v3729_v60 = vpop.f32.mrf.mxu0 }
 0xeb0   : > { %v2831_v6 = vadd.f32 %v3501_v55, %v2823_v57  ;;  %v2836_v13 = vsel %vm1177_vm0, %v2834_v58, 0.0 }
 0xeb1   : > { %2837 = vadd.xlane.f32.xlu1 %v2836_v13 }
 0xeb2   : > { %v2835_v61 = vadd.f32 %v2833_v59, %v2831_v6 }
 0xeb4   : > { %v2839_v28 = vsel %vm1177_vm0, %v2835_v61, 0.0 }
 0xeb5   : > { %2840 = vadd.xlane.f32.xlu0 %v2839_v28 }
 0xf3a   : > { %v2838_v14 = vpop.xlane.xlu1 %2837 }
 0xf3b   : > { %v2842_v29 = vmul.f32 0.03125, %v2838_v14 }
 0xf3d   : > { %v2844_v44 = vsub.f32 %v2834_v58, %v2842_v29 }
 0xf3e   : > { %v2841_v24 = vpop.xlane.xlu0 %2840 }
 0xf3f   : > { %v2843_v0 = vmul.f32 0.03125, %v2841_v24  ;;  %v2846_v23 = vmul.f32 %v2844_v44, %v2844_v44 }
 0xf41   : > { %v2845_v1 = vsub.f32 %v2835_v61, %v2843_v0  ;;  %v2848_v53 = vsel %vm1177_vm0, %v2846_v23, 0.0 }
 0xf42   : > { %2849 = vadd.xlane.f32.xlu0 %v2848_v53 }
 0xf43   : > { %v2847_v21 = vmul.f32 %v2845_v1, %v2845_v1 }
 0xf45   : > { %v2851_v34 = vsel %vm1177_vm0, %v2847_v21, 0.0 }
 0xf46   : > { %2852 = vadd.xlane.f32.xlu1 %v2851_v34 }
 0xfcb   : > { %v2850_v50 = vpop.xlane.xlu0 %2849 }
 0xfcc   : > { %v2854_v5 = vmul.f32 0.03125, %v2850_v50 }
 0xfce   : > { %v2856_v7 = vadd.f32 1e-05, %v2854_v5 }
 0xfcf   : > { %v2853_v8 = vpop.xlane.xlu1 %2852 }
 0xfd0   : > { %4058 = vrsqrt.f32 %v2856_v7  ;;  %v2855_v63 = vmul.f32 0.03125, %v2853_v8 }
 0xfd2   : > { %v2857_v62 = vadd.f32 1e-05, %v2855_v63 }
 0xfd4   : > { %4060 = vrsqrt.f32 %v2857_v62 }
 0xfdd   : > { %v4059_v9 = vpop.eup %4058 }
 0xfde   : > { %v2860_v10 = vmul.f32 %v4059_v9, %v2844_v44 }
 0xfe0   : > { %v2868_v32 = vmul.f32 %v3502_v12, %v2860_v10 }
 0xfe1   : > { %v4061_v38 = vpop.eup %4060 }
 0xfe2   : > { %v2861_v15 = vmul.f32 %v4061_v38, %v2845_v1  ;;  %v5486_v35 = vadd.f32 %v3503_v16, %v2868_v32 }
 0xfe4   : > { %v2869_v17 = vmul.f32 %v3502_v12, %v2861_v15 }
 0xfe6   : > { %v5488_v18 = vadd.f32 %v3503_v16, %v2869_v17 }
 0xfe8   : > { %v2878_v19 = vpack.c.bf16 %v5488_v18, %v5486_v35 }
 0xfea   : > { %3735 = vmatmul.mubr.msk.bf16.vlgmr.msra.gmra.mxu1 %vm1177_vm0, %v2878_v19 }
0x10aa   : > { %v2934_v27 = vpop.f32.mrf.mxu1 }
0x10ab   : > { %v2935_v30 = vadd.f32 %v3504_v26, %v2934_v27 }
0x10ac   : > { %v3736_v49 = vpop.f32.mrf.mxu1 }
0x10ad   : > { %v2943_v2 = vmul.f32 0.70710677, %v2935_v30  ;;  %v2941_v38 = vmul.f32 0.5, %v2935_v30 }
0x10ae   : > { %v2937_v33 = vpop.f32.mrf.mxu1 }
0x10af   : > { %v2945_v36 = vand.u32 2147483647, %v2943_v2  ;;  %v2938_v40 = vadd.f32 %v3504_v26, %v2937_v33  ;;  %vm2983_vm5 = vcmp.ge.f32.partialorder %v2943_v2, 0.0 }
0x10b0   : > { %v3737_v41 = vpop.f32.mrf.mxu1 }
0x10b1   : > { %v2947_v42 = vmul.f32 0.3275911, %v2945_v36  ;;  %v2944_v43 = vmul.f32 0.70710677, %v2938_v40  ;;  %v2971_v54 = vsub.f32 0.0, %v2945_v36  ;;  %v2942_v15 = vmul.f32 0.5, %v2938_v40 }
0x10b3   : > { %v2949_v31 = vadd.f32 1.0, %v2947_v42  ;;  %v2946_v45 = vand.u32 2147483647, %v2944_v43  ;;  %v2973_v55 = vmul.f32 %v2971_v54, %v2945_v36  ;;  %vm2984_vm6 = vcmp.ge.f32.partialorder %v2944_v43, 0.0 }
0x10b5   : > { %4062 = vrcp.f32 %v2949_v31  ;;  %v2948_v51 = vmul.f32 0.3275911, %v2946_v45  ;;  %v2972_v56 = vsub.f32 0.0, %v2946_v45  ;;  %v2975_v52 = vmul.f32 1.442695, %v2973_v55 }
0x10b7   : > { %v2950_v20 = vadd.f32 1.0, %v2948_v51  ;;  %v2974_v47 = vmul.f32 %v2972_v56, %v2946_v45 }
0x10b9   : > { %4064 = vrcp.f32 %v2950_v20  ;;  %v2977_v59 = vmul.f32 1.442695, %v2974_v47 }
0x10ba   : > { %4066 = vpow2.f32 %v2975_v52 }
0x10bb   : > { %4068 = vpow2.f32 %v2977_v59 }
0x10c2   : > { %v4063_v37 = vpop.eup %4062 }
0x10c3   : > { %v2953_v46 = vmul.f32 1.0614054, %v4063_v37 }
0x10c5   : > { %v2955_v11 = vadd.f32 -1.4531521, %v2953_v46 }
0x10c6   : > { %v4065_v57 = vpop.eup %4064 }
0x10c7   : > { %v2957_v58 = vmul.f32 %v4063_v37, %v2955_v11  ;;  %v2954_v60 = vmul.f32 1.0614054, %v4065_v57  ;;  %v4067_v21 = vpop.eup %4066  ;;  %v3514_v11 = vld [vmem:[%s5718_s24] ss:$0 sm:$0xff] }
0x10c8   : > { %v4069_v5 = vpop.eup %4068 }
0x10c9   : > { %v2959_v6 = vadd.f32 1.4214138, %v2957_v58  ;;  %v2956_v13 = vadd.f32 -1.4531521, %v2954_v60  ;;  %v3515_v58 = vld [vmem:[%s5719_s8] ss:$0 sm:$0xff] }
0x10cb   : > { %v2961_v61 = vmul.f32 %v4063_v37, %v2959_v6  ;;  %v2958_v28 = vmul.f32 %v4065_v57, %v2956_v13 }
0x10cd   : > { %v2963_v14 = vadd.f32 -0.28449672, %v2961_v61  ;;  %v2960_v29 = vadd.f32 1.4214138, %v2958_v28 }
0x10cf   : > { %v2965_v44 = vmul.f32 %v4063_v37, %v2963_v14  ;;  %v2962_v24 = vmul.f32 %v4065_v57, %v2960_v29 }
0x10d1   : > { %v2967_v0 = vadd.f32 0.2548296, %v2965_v44  ;;  %v2964_v23 = vadd.f32 -0.28449672, %v2962_v24 }
0x10d3   : > { %v2969_v1 = vmul.f32 %v4063_v37, %v2967_v0  ;;  %v2966_v53 = vmul.f32 %v4065_v57, %v2964_v23 }
0x10d5   : > { %v2979_v34 = vmul.f32 %v4067_v21, %v2969_v1  ;;  %v2968_v3 = vadd.f32 0.2548296, %v2966_v53 }
0x10d7   : > { %v2981_v4 = vsub.f32 1.0, %v2979_v34  ;;  %v2970_v50 = vmul.f32 %v4065_v57, %v2968_v3 }
0x10d9   : > { %v2985_v7 = vsub.f32 0.0, %v2981_v4  ;;  %v2980_v8 = vmul.f32 %v4069_v5, %v2970_v50 }
0x10db   : > { %v2987_v63 = vsel %vm2983_vm5, %v2981_v4, %v2985_v7  ;;  %v2982_v62 = vsub.f32 1.0, %v2980_v8 }
0x10dc   : > { %v2989_v10 = vadd.f32 1.0, %v2987_v63 }
0x10dd   : > { %v2986_v9 = vsub.f32 0.0, %v2982_v62 }
0x10de   : > { %v2991_v16 = vmul.f32 %v2989_v10, %v2941_v38 }
0x10df   : > { %v2988_v12 = vsel %vm2984_vm6, %v2982_v62, %v2986_v9 }
0x10e0   : > { %v2990_v32 = vadd.f32 1.0, %v2988_v12 }
0x10e2   : > { %v2992_v17 = vmul.f32 %v2990_v32, %v2942_v15 }
0x10e4   : > { %v2993_v19 = vpack.c.bf16 %v2992_v17, %v2991_v16 }
0x10e6   : > { %3747 = vmatmul.mubr.msk.bf16.vlgmr.msra.gmra.mxu0 %vm3024_vm7, %v2993_v19 }
0x11a6   : > { %v3062_v39 = vpop.f32.mrf.mxu0 }
0x11a7   : > { %v3063_v48 = vadd.f32 %v3508_v22, %v3062_v39 }
0x11a8   : > { %v3748_v25 = vpop.f32.mrf.mxu0 }
0x11a9   : > { %v3069_v26 = vadd.f32 %v3063_v48, %v5486_v35 }
0x11aa   : > { %v3065_v27 = vpop.f32.mrf.mxu0 }
0x11ab   : > { %v3066_v49 = vadd.f32 %v3508_v22, %v3065_v27  ;;  %v3071_v30 = vsel %vm1177_vm0, %v3069_v26, 0.0 }
0x11ac   : > { %3072 = vadd.xlane.f32.xlu0 %v3071_v30  ;;  %v3749_v2 = vpop.f32.mrf.mxu0 }
0x11ad   : > { %v3070_v33 = vadd.f32 %v3066_v49, %v5488_v18 }
0x11af   : > { %v3074_v36 = vsel %vm1177_vm0, %v3070_v33, 0.0 }
0x11b0   : > { %3075 = vadd.xlane.f32.xlu1 %v3074_v36 }
0x1235   : > { %v3073_v40 = vpop.xlane.xlu0 %3072 }
0x1236   : > { %v3077_v41 = vmul.f32 0.03125, %v3073_v40 }
0x1238   : > { %v3079_v42 = vsub.f32 %v3069_v26, %v3077_v41 }
0x1239   : > { %v3076_v43 = vpop.xlane.xlu1 %3075 }
0x123a   : > { %v3078_v31 = vmul.f32 0.03125, %v3076_v43  ;;  %v3081_v45 = vmul.f32 %v3079_v42, %v3079_v42 }
0x123c   : > { %v3080_v51 = vsub.f32 %v3070_v33, %v3078_v31  ;;  %v3083_v35 = vsel %vm1177_vm0, %v3081_v45, 0.0 }
0x123d   : > { %3084 = vadd.xlane.f32.xlu0 %v3083_v35 }
0x123e   : > { %v3082_v20 = vmul.f32 %v3080_v51, %v3080_v51 }
0x1240   : > { %v3086_v54 = vsel %vm1177_vm0, %v3082_v20, 0.0 }
0x1241   : > { %3087 = vadd.xlane.f32.xlu1 %v3086_v54 }
0x12c6   : > { %v3085_v55 = vpop.xlane.xlu0 %3084 }
0x12c7   : > { %v3089_v18 = vmul.f32 0.03125, %v3085_v55 }
0x12c9   : > { %v3091_v56 = vadd.f32 1e-05, %v3089_v18 }
0x12ca   : > { %v3088_v37 = vpop.xlane.xlu1 %3087 }
0x12cb   : > { %4070 = vrsqrt.f32 %v3091_v56  ;;  %v3090_v46 = vmul.f32 0.03125, %v3088_v37 }
0x12cd   : > { %v3092_v52 = vadd.f32 1e-05, %v3090_v46 }
0x12cf   : > { %4072 = vrsqrt.f32 %v3092_v52 }
0x12d8   : > { %v4071_v47 = vpop.eup %4070 }
0x12d9   : > { %v3095_v57 = vmul.f32 %v4071_v47, %v3079_v42 }
0x12db   : > { %v3103_v60 = vmul.f32 %v3514_v11, %v3095_v57 }
0x12dc   : > { %v4073_v59 = vpop.eup %4072 }
0x12dd   : > { %v3111_v6 = vadd.f32 %v3515_v58, %v3103_v60  ;;  %v3096_v13 = vmul.f32 %v4073_v59, %v3080_v51 }
0x12df   : > { %v3104_v61 = vmul.f32 %v3514_v11, %v3096_v13  ;;  %3113 = vst.msk [vmem:[%s1111_s21] sm:$0xff] %vm1177_vm0, %v3111_v6 }
0x12e1   : > { %v3112_v28 = vadd.f32 %v3515_v58, %v3104_v61 }
0x12e3   : > { %3114 = vst.msk [vmem:[%s1111_s21 + $0x8] sm:$0xff] %vm1177_vm0, %v3112_v28 }
0x12e4   : > { %4535 = shalt.err (!%p4532_p5)
}
0x12e5   : > { %s4536_s18 = scalar_lea.hbm %s5532_s15, 256  ;;  %s4540_s2 = scalar_lea.hbm %s5720_s9, 512 }
0x12e6   : > { %p4537_p7 = scmp.ne.s32.totalorder %s5532_s15, %s4536_s18  ;;  %p4541_p2 = scmp.lt.s32.totalorder %s5532_s15, %s5720_s9 }
0x12e7   : > { %p4542_p6 = scmp.lt.s32.totalorder %s4540_s2, %s4536_s18 }
0x12e8   : > { %p4538_p3 = pnand %p4537_p7, %p5721_p12 }
0x12e9   : > { %p4543_p10 = por %p4542_p6, %p4541_p2 }
0x12ea   : > { %p4539_p0 = pneg %p4538_p3 }
0x12ec   : > { %p4544_p8 = pnand %p4543_p10, %p4539_p0 }
0x12ee   : > { %4547 = shalt.err (!%p4544_p8)
}
0x12ef   : > { %s4663_s11 = smov 128   ;;  %s4664_s13 = smov 8  }
0x12f0   : > { %3812 = dma.vmem_to_hbm [thread:$0]  (%p5721_p12), %s5534_s23, 256, %s5532_s15, %s3116_s27, %s4663_s11, %s4663_s11, %s4664_s13  }
0x12f1 PF: > { %s5722_s8 = sld [smem:[#allocation40_spill]] }
0x12f2   : > { %s5723_s0 = sld [smem:[#allocation45_spill]] }
0x12f3   : > { %s5724_s21 = sld [smem:[#allocation42_spill]] }
0x12f7   : > { %s3146_s6 = sand.u32 1, %s5722_s8  }
0x12f8   : > { %p5725_p11 = scmp.ne.s32.totalorder %s5723_s0, 0  ;;  %s3147_s4 = scalar_lea.sflag [#allocation4], %s3146_s6 }
0x12f9   : > { %p5726_p9 = scmp.ge.s32.totalorder %s5724_s21, 2 }
0x12fb   : > { %p3868_p1 = pnand %p5726_p9, %p5725_p11 }
0x12fd   : > { %p3869_p4 = pneg %p3868_p1 }
0x12ff   : > { %4609 = dma.done.wait (%p3869_p4), %s3147_s4, 256  }
0x1300   : > { %4611 = vsyncadd (%p3869_p4), %s3147_s4, 4294967040  ;;  %s52_s4 = sadd.s32 1, %s5724_s21   ;;  %s5727_s5 = sld [smem:[#allocation44_spill]] }
0x1301   : > { %p49_p13 = scmp.ge.s32.totalorder %s52_s4, 4   ;;  %s5728_s28 = sld [smem:[#allocation41_spill]] }
0x1302   : > { %s5729_s8 = sld [smem:[#allocation43_spill]]  ;;  %s5730_s27 = smov %s4618_s3 }
0x1303   : > { %s5731_s3 = smov %s4622_s7  ;;  %51 = sbr.rel (!%p49_p13) target bundleno = 40 (0x28), region = 255 }
0x1306   : > { %s5732_s7 = smov %s5727_s5 }
0x1308   :  { %3152 = vsyncpa [#allocation3], 1 }
0x1309   :  { %3154 = vsyncpa [#allocation3 + $0x1], 1 }
0x130a   :  { %3155 = vsyncpa [#allocation6], 1 }
0x130b   :  { %3157 = vsyncpa [#allocation6 + $0x1], 1 }
0x130c   :  { %3158 = vsyncpa [#allocation9], 1 }
0x130d   :  { %3159 = vsyncpa [#allocation12], 1 }
0x130e   :  { %3160 = vsyncpa [#allocation15], 1 }
0x130f   :  { %3161 = vsyncpa [#allocation18], 1 }
0x1310   :  { %3162 = vsyncpa [#allocation21], 1 }
0x1311   :  { %3163 = vsyncpa [#allocation24], 1 }
0x1312   :  { %3164 = vsyncpa [#allocation27], 1 }
0x1313   :  { %3165 = vsyncpa [#allocation4], 1 }
0x1314   :  { %3167 = vsyncpa [#allocation4 + $0x1], 1 }

</bundles_post_ra>
